<compile_context>
chip_gen: v5e
topology: v5e:2x2
jax: 0.10.0
libtpu: 0.0.40
codegen_flags: <defaults>
</compile_context>

<pallas_src>
import numpy as np
import jax
import jax.numpy as jnp
from jax import lax
from jax.experimental import pallas as pl
from jax.experimental.pallas import tpu as pltpu

# ---------------- configuration (small shapes consistent with the module) ----
IMG_SIZE = 16
PATCH_DIM = 4
CHANNELS = 3
HIDDEN_D = 8
K_HEADS = 2
NUM_CLASSES = 10
BATCH = 16

PATCH_FEAT = PATCH_DIM * PATCH_DIM * CHANNELS          # 48
N_PATCHES = (IMG_SIZE * IMG_SIZE) // (PATCH_DIM ** 2)  # 16
SEQ = N_PATCHES + 1                                    # 17 (class token)
SEQ_PAD = ((SEQ + 7) // 8) * 8                         # 24: sublane-aligned tokens
D_HEAD = HIDDEN_D // K_HEADS                           # 4
MLP_HID = 4 * HIDDEN_D                                 # 32
NUM_CLASSES_PAD = max(128, ((NUM_CLASSES + 127) // 128) * 128)  # lane-dense head
EPS = 1e-5
NEG_BIG = -1e30


def get_positional_embeddings(sequence_length, d):
    result = np.ones((sequence_length, d), dtype=np.float32)
    for i in range(sequence_length):
        for j in range(d):
            result[i, j] = (np.sin(i / 10000 ** (j / d)) if j % 2 == 0
                            else np.cos(i / 10000 ** ((j - 1) / d)))
    return jnp.asarray(result)


# ----------------------------- Pallas kernel ---------------------------------
def vit_kernel(patches_ref,            # (b_tile*SEQ_PAD, PATCH_FEAT)
               wp_ref, bp_ref,         # (PATCH_FEAT, D), (1, D)
               pos_ref,                # (b_tile*SEQ_PAD, D) class token folded in
               wqkv_ref, bqkv_ref,     # (D, 3D) ln1-folded block-diag, (1, 3D)
               w1_ref, b1_ref,         # (D, MLP_HID) ln2-folded, (1, MLP_HID)
               w2_ref, b2_ref,         # (MLP_HID, D), (1, D)
               wh_ref, bh_ref,         # (D, C_PAD), (1, C_PAD)
               out_ref):               # (b_tile, C_PAD)
    bt = out_ref.shape[0]
    m = patches_ref.shape[0]           # = bt * SEQ_PAD (static)

    # --- patch projection: one (M, F) @ (F, D) matmul over all tokens ---
    proj = jnp.dot(patches_ref[...], wp_ref[...],
                   preferred_element_type=jnp.float32) + bp_ref[...]
    tok = proj + pos_ref[...]          # class token / pos-embed folded host-side

    def layernorm(v):                  # gamma/beta folded into the next matmul
        mu = jnp.mean(v, axis=-1, keepdims=True)
        var = jnp.mean((v - mu) ** 2, axis=-1, keepdims=True)
        return (v - mu) * lax.rsqrt(var + EPS)

    # --- multi-head self attention: fused block-diagonal QKV, one 2D matmul ---
    h1 = layernorm(tok)
    qkv = jnp.dot(h1, wqkv_ref[...],
                  preferred_element_type=jnp.float32) + bqkv_ref[...]
    qkv3 = qkv.reshape(bt, SEQ_PAD, 3 * HIDDEN_D)     # 24 rows/image: tile-aligned

    # mask for the padded key positions (>= SEQ)
    kmask = jnp.where(lax.broadcasted_iota(jnp.int32, (1, SEQ_PAD), 1) < SEQ,
                      0.0, NEG_BIG).astype(jnp.float32)

    scale = 1.0 / float(D_HEAD) ** 0.5
    heads = []
    for h in range(K_HEADS):           # tiny static loop (2 heads)
        lo = h * D_HEAD
        qh = qkv3[:, :, lo:lo + D_HEAD]
        kh = qkv3[:, :, HIDDEN_D + lo:HIDDEN_D + lo + D_HEAD]
        vh = qkv3[:, :, 2 * HIDDEN_D + lo:2 * HIDDEN_D + lo + D_HEAD]
        s = jnp.einsum('bqd,bkd->bqk', qh, kh,
                       preferred_element_type=jnp.float32) * scale + kmask
        s = s - jnp.max(s, axis=-1, keepdims=True)
        p = jnp.exp(s)                 # padded keys -> exp(-1e30) == 0
        p = p * pl.reciprocal(jnp.sum(p, axis=-1, keepdims=True), approx=True)
        heads.append(jnp.einsum('bqk,bkd->bqd', p, vh,
                                preferred_element_type=jnp.float32))
    attn = jnp.concatenate(heads, axis=-1).reshape(m, HIDDEN_D)
    x = tok + attn                     # residual, (M, D)

    # --- MLP block (plain 2D matmuls) ---
    h2 = layernorm(x)
    mlp = jnp.dot(h2, w1_ref[...],
                  preferred_element_type=jnp.float32) + b1_ref[...]
    mlp = jax.nn.gelu(mlp, approximate=True)
    mlp = jnp.dot(mlp, w2_ref[...],
                  preferred_element_type=jnp.float32) + b2_ref[...]
    x = x + mlp

    # --- classification head on class tokens; lane-dense padded softmax ---
    cls = x.reshape(bt, SEQ_PAD, HIDDEN_D)[:, 0, :]              # (bt, D)
    logits = jnp.dot(cls, wh_ref[...],
                     preferred_element_type=jnp.float32) + bh_ref[...]
    logits = logits - jnp.max(logits, axis=-1, keepdims=True)
    e = jnp.exp(logits)                # padded classes -> exactly 0
    out_ref[...] = e / jnp.sum(e, axis=-1, keepdims=True)        # dense 128-lane store


# ------------------------------- wrapper --------------------------------------
def _block_diag(w):
    """(H, dh, dh) per-head weights -> (H*dh, H*dh) block-diagonal weight."""
    H, dh, _ = w.shape
    D = H * dh
    out = jnp.zeros((D, D), w.dtype)
    for h in range(H):
        out = out.at[h * dh:(h + 1) * dh, h * dh:(h + 1) * dh].set(w[h])
    return out


def _pick_b_tile(B, cap=512):
    """Batch tile: multiple of 8 (sublane-aligned output block) or the whole
    batch, capped for VMEM; prefer grid >= 2 so the 'parallel' batch axis can
    shard across v7x's two TensorCores."""
    cands = [t for t in range(1, min(B, cap) + 1)
             if B % t == 0 and (t % 8 == 0 or t == B)]
    multi = [t for t in cands if B // t >= 2]
    return max(multi) if multi else max(cands)


def vit_forward(x, params, b_tile=None):
    B, C, H, W = x.shape
    patches = jnp.reshape(x, (B, -1, PATCH_DIM ** 2 * C))        # gen_patches
    assert patches.shape == (B, N_PATCHES, PATCH_FEAT)

    if b_tile is None:
        b_tile = _pick_b_tile(B)
    assert B % b_tile == 0 and (b_tile % 8 == 0 or b_tile == B)
    m_tile = b_tile * SEQ_PAD

    # Row 0 per image = zero patch (class-token slot); rows SEQ.. are padding.
    patches_pad = jnp.zeros((B, SEQ_PAD, PATCH_FEAT), patches.dtype
                            ).at[:, 1:SEQ, :].set(patches)
    patches_flat = patches_pad.reshape(B * SEQ_PAD, PATCH_FEAT)

    # Fold class token (minus proj bias) into positional-embedding row 0.
    pos_eff = params["pos"].at[0].add(params["cls"][0] - params["bp"][0])
    pos_pad = jnp.zeros((SEQ_PAD, HIDDEN_D), jnp.float32).at[:SEQ].set(pos_eff)
    pos_tiled = jnp.tile(pos_pad, (b_tile, 1))                   # (m_tile, D)

    # Fused per-head Q/K/V -> block-diagonal (D, 3D); fold LN1 gamma/beta in.
    wqkv = jnp.concatenate([_block_diag(params["wq"]),
                            _block_diag(params["wk"]),
                            _block_diag(params["wv"])], axis=1)   # (D, 3D)
    bqkv = jnp.concatenate([params["bq"].reshape(1, HIDDEN_D),
                            params["bk"].reshape(1, HIDDEN_D),
                            params["bv"].reshape(1, HIDDEN_D)], axis=1)
    wqkv_eff = wqkv * params["ln1_g"].reshape(HIDDEN_D, 1)
    bqkv_eff = params["ln1_b"] @ wqkv + bqkv

    # Fold LN2 gamma/beta into the first MLP matmul.
    w1_eff = params["w1"] * params["ln2_g"].reshape(HIDDEN_D, 1)
    b1_eff = params["ln2_b"] @ params["w1"] + params["b1"]

    # Lane-dense head: pad to 128 classes; pad bias -1e30 => softmax pad == 0.
    wh_pad = jnp.zeros((HIDDEN_D, NUM_CLASSES_PAD), jnp.float32
                       ).at[:, :NUM_CLASSES].set(params["wh"])
    bh_pad = jnp.full((1, NUM_CLASSES_PAD), NEG_BIG, jnp.float32
                      ).at[:, :NUM_CLASSES].set(params["bh"])

    weights = [params["wp"], params["bp"], pos_tiled,
               wqkv_eff, bqkv_eff, w1_eff, b1_eff,
               params["w2"], params["b2"], wh_pad, bh_pad]

    in_specs = [pl.BlockSpec((m_tile, PATCH_FEAT), lambda b: (b, 0))]
    in_specs += [pl.BlockSpec(w.shape, lambda b: (0, 0)) for w in weights]

    out = pl.pallas_call(
        vit_kernel,
        out_shape=jax.ShapeDtypeStruct((B, NUM_CLASSES_PAD), jnp.float32),
        grid_spec=pltpu.PrefetchScalarGridSpec(
            num_scalar_prefetch=0,
            grid=(B // b_tile,),
            in_specs=in_specs,
            out_specs=pl.BlockSpec((b_tile, NUM_CLASSES_PAD),
                                   lambda b: (b, 0)),
        ),
        compiler_params=pltpu.CompilerParams(
            dimension_semantics=("parallel",)),      # batch tiles independent
    )(patches_flat, *weights)
    return out[:, :NUM_CLASSES]


# ------------------------- pure-JAX reference ---------------------------------
def vit_reference(x, p):
    B, C, H, W = x.shape
    patches = jnp.reshape(x, (B, -1, PATCH_DIM ** 2 * C))
    proj = patches @ p["wp"] + p["bp"]                       # (B, N, D)
    cls = jnp.broadcast_to(p["cls"][None], (B, 1, HIDDEN_D))
    tok = jnp.concatenate([cls, proj], axis=1) + p["pos"]

    def ln(v, g, b):
        mu = v.mean(-1, keepdims=True)
        var = ((v - mu) ** 2).mean(-1, keepdims=True)
        return (v - mu) / jnp.sqrt(var + EPS) * g + b

    h1 = ln(tok, p["ln1_g"], p["ln1_b"])
    heads = []
    for h in range(K_HEADS):
        seq = h1[..., h * D_HEAD:(h + 1) * D_HEAD]
        q = seq @ p["wq"][h] + p["bq"][h]
        k = seq @ p["wk"][h] + p["bk"][h]
        v = seq @ p["wv"][h] + p["bv"][h]
        s = jnp.einsum("bqd,bkd->bqk", q, k) / float(D_HEAD) ** 0.5
        heads.append(jax.nn.softmax(s, axis=-1) @ v)
    x1 = tok + jnp.concatenate(heads, axis=-1)

    h2 = ln(x1, p["ln2_g"], p["ln2_b"])
    m = jax.nn.gelu(h2 @ p["w1"] + p["b1"], approximate=True)
    x2 = x1 + m @ p["w2"] + p["b2"]

    logits = x2[:, 0, :] @ p["wh"] + p["bh"]
    return jax.nn.softmax(logits, axis=-1)


# ------------------------------- params ---------------------------------------
def init_params(key):
    ks = jax.random.split(key, 16)
    u = lambda k, shape, s=0.1: jax.random.uniform(k, shape, jnp.float32, -s, s)
    return {
        "wp":  u(ks[0], (PATCH_FEAT, HIDDEN_D)),
        "bp":  u(ks[1], (1, HIDDEN_D)),
        "cls": jax.random.uniform(ks[2], (1, HIDDEN_D), jnp.float32, 0.0, 1.0),
        "pos": get_positional_embeddings(SEQ, HIDDEN_D),
        "ln1_g": jnp.ones((1, HIDDEN_D), jnp.float32),
        "ln1_b": jnp.zeros((1, HIDDEN_D), jnp.float32),
        "wq": u(ks[3], (K_HEADS, D_HEAD, D_HEAD)),
        "bq": u(ks[4], (K_HEADS, 1, D_HEAD)),
        "wk": u(ks[5], (K_HEADS, D_HEAD, D_HEAD)),
        "bk": u(ks[6], (K_HEADS, 1, D_HEAD)),
        "wv": u(ks[7], (K_HEADS, D_HEAD, D_HEAD)),
        "bv": u(ks[8], (K_HEADS, 1, D_HEAD)),
        "ln2_g": jnp.ones((1, HIDDEN_D), jnp.float32),
        "ln2_b": jnp.zeros((1, HIDDEN_D), jnp.float32),
        "w1": u(ks[9], (HIDDEN_D, MLP_HID)),
        "b1": u(ks[10], (1, MLP_HID)),
        "w2": u(ks[11], (MLP_HID, HIDDEN_D)),
        "b2": u(ks[12], (1, HIDDEN_D)),
        "wh": u(ks[13], (HIDDEN_D, NUM_CLASSES)),
        "bh": u(ks[14], (1, NUM_CLASSES)),
    }


if __name__ == "__main__":
    key = jax.random.PRNGKey(0)
    k_x, k_p = jax.random.split(key)
    x = jax.random.normal(k_x, (BATCH, CHANNELS, IMG_SIZE, IMG_SIZE), jnp.float32)
    params = init_params(k_p)

    out = jax.block_until_ready(vit_forward(x, params))
    ref = jax.block_until_ready(vit_reference(x, params))
    assert out.shape == (BATCH, NUM_CLASSES)
    np.testing.assert_allclose(np.asarray(out), np.asarray(ref),
                               rtol=2e-2, atol=2e-3)
    print("KERNEL_OK")
</pallas_src>

<mosaic_0001>
module attributes {stable_mosaic.version = 11 : i64} {
  func.func @vit_kernel(%arg0: i32, %arg1: memref<192x48xf32, #tpu.memory_space<vmem>>, %arg2: memref<48x8xf32, #tpu.memory_space<vmem>>, %arg3: memref<1x8xf32, #tpu.memory_space<vmem>>, %arg4: memref<192x8xf32, #tpu.memory_space<vmem>>, %arg5: memref<8x24xf32, #tpu.memory_space<vmem>>, %arg6: memref<1x24xf32, #tpu.memory_space<vmem>>, %arg7: memref<8x32xf32, #tpu.memory_space<vmem>>, %arg8: memref<1x32xf32, #tpu.memory_space<vmem>>, %arg9: memref<32x8xf32, #tpu.memory_space<vmem>>, %arg10: memref<1x8xf32, #tpu.memory_space<vmem>>, %arg11: memref<8x128xf32, #tpu.memory_space<vmem>>, %arg12: memref<1x128xf32, #tpu.memory_space<vmem>>, %arg13: memref<8x128xf32, #tpu.memory_space<vmem>>) attributes {dimension_semantics = [#tpu.dimension_semantics<parallel>], iteration_bounds = array<i64: 2>, scalar_prefetch = 0 : i64, scratch_operands = 0 : i64, tpu.core_type = #tpu.core_type<tc>, window_params = [{transform_indices = @transform_0, window_bounds = array<i64: 192, 48>}, {pipeline_mode = #tpu.pipeline_mode<synchronous>, transform_indices = @transform_1, window_bounds = array<i64: 48, 8>}, {pipeline_mode = #tpu.pipeline_mode<synchronous>, transform_indices = @transform_2, window_bounds = array<i64: 1, 8>}, {pipeline_mode = #tpu.pipeline_mode<synchronous>, transform_indices = @transform_3, window_bounds = array<i64: 192, 8>}, {pipeline_mode = #tpu.pipeline_mode<synchronous>, transform_indices = @transform_4, window_bounds = array<i64: 8, 24>}, {pipeline_mode = #tpu.pipeline_mode<synchronous>, transform_indices = @transform_5, window_bounds = array<i64: 1, 24>}, {pipeline_mode = #tpu.pipeline_mode<synchronous>, transform_indices = @transform_6, window_bounds = array<i64: 8, 32>}, {pipeline_mode = #tpu.pipeline_mode<synchronous>, transform_indices = @transform_7, window_bounds = array<i64: 1, 32>}, {pipeline_mode = #tpu.pipeline_mode<synchronous>, transform_indices = @transform_8, window_bounds = array<i64: 32, 8>}, {pipeline_mode = #tpu.pipeline_mode<synchronous>, transform_indices = @transform_9, window_bounds = array<i64: 1, 8>}, {pipeline_mode = #tpu.pipeline_mode<synchronous>, transform_indices = @transform_10, window_bounds = array<i64: 8, 128>}, {pipeline_mode = #tpu.pipeline_mode<synchronous>, transform_indices = @transform_11, window_bounds = array<i64: 1, 128>}, {transform_indices = @transform_12, window_bounds = array<i64: 8, 128>}]} {
    %c0 = arith.constant 0 : index
    %c0_0 = arith.constant 0 : index
    %0 = vector.load %arg1[%c0, %c0_0] : memref<192x48xf32, #tpu.memory_space<vmem>>, vector<192x48xf32>
    %c0_1 = arith.constant 0 : index
    %c0_2 = arith.constant 0 : index
    %1 = vector.load %arg2[%c0_1, %c0_2] : memref<48x8xf32, #tpu.memory_space<vmem>>, vector<48x8xf32>
    %cst = arith.constant dense<0.000000e+00> : vector<192x8xf32>
    %2 = tpu.matmul %0, %1, %cst {dimension_numbers = #tpu.dot_dimension_numbers<[1], [0], [0], [1], [0, 0, 1, 1], [], []>} : vector<192x48xf32>, vector<48x8xf32>, vector<192x8xf32> -> vector<192x8xf32>
    %c0_3 = arith.constant 0 : index
    %c0_4 = arith.constant 0 : index
    %3 = vector.load %arg3[%c0_3, %c0_4] : memref<1x8xf32, #tpu.memory_space<vmem>>, vector<1x8xf32>
    %4 = vector.broadcast %3 : vector<1x8xf32> to vector<192x8xf32>
    %5 = arith.addf %2, %4 : vector<192x8xf32>
    %c0_5 = arith.constant 0 : index
    %c0_6 = arith.constant 0 : index
    %6 = vector.load %arg4[%c0_5, %c0_6] : memref<192x8xf32, #tpu.memory_space<vmem>>, vector<192x8xf32>
    %7 = arith.addf %5, %6 : vector<192x8xf32>
    %cst_7 = arith.constant dense<0.000000e+00> : vector<192xf32>
    %8 = vector.multi_reduction <add>, %7, %cst_7 [1] : vector<192x8xf32> to vector<192xf32>
    %9 = vector.shape_cast %8 : vector<192xf32> to vector<192x1xf32>
    %cst_8 = arith.constant 8.000000e+00 : f32
    %10 = vector.broadcast %cst_8 : f32 to vector<192x1xf32>
    %11 = arith.divf %9, %10 : vector<192x1xf32>
    %12 = vector.broadcast %11 : vector<192x1xf32> to vector<192x8xf32>
    %13 = arith.subf %7, %12 : vector<192x8xf32>
    %14 = arith.mulf %13, %13 : vector<192x8xf32>
    %cst_9 = arith.constant dense<0.000000e+00> : vector<192xf32>
    %15 = vector.multi_reduction <add>, %14, %cst_9 [1] : vector<192x8xf32> to vector<192xf32>
    %16 = vector.shape_cast %15 : vector<192xf32> to vector<192x1xf32>
    %cst_10 = arith.constant 8.000000e+00 : f32
    %17 = vector.broadcast %cst_10 : f32 to vector<192x1xf32>
    %18 = arith.divf %16, %17 : vector<192x1xf32>
    %19 = vector.broadcast %11 : vector<192x1xf32> to vector<192x8xf32>
    %20 = arith.subf %7, %19 : vector<192x8xf32>
    %cst_11 = arith.constant 9.99999974E-6 : f32
    %21 = vector.broadcast %cst_11 : f32 to vector<192x1xf32>
    %22 = arith.addf %18, %21 : vector<192x1xf32>
    %23 = math.rsqrt %22 : vector<192x1xf32>
    %24 = vector.broadcast %23 : vector<192x1xf32> to vector<192x8xf32>
    %25 = arith.mulf %20, %24 : vector<192x8xf32>
    %c0_12 = arith.constant 0 : index
    %c0_13 = arith.constant 0 : index
    %26 = vector.load %arg5[%c0_12, %c0_13] : memref<8x24xf32, #tpu.memory_space<vmem>>, vector<8x24xf32>
    %cst_14 = arith.constant dense<0.000000e+00> : vector<192x24xf32>
    %27 = tpu.matmul %25, %26, %cst_14 {dimension_numbers = #tpu.dot_dimension_numbers<[1], [0], [0], [1], [0, 0, 1, 1], [], []>} : vector<192x8xf32>, vector<8x24xf32>, vector<192x24xf32> -> vector<192x24xf32>
    %c0_15 = arith.constant 0 : index
    %c0_16 = arith.constant 0 : index
    %28 = vector.load %arg6[%c0_15, %c0_16] : memref<1x24xf32, #tpu.memory_space<vmem>>, vector<1x24xf32>
    %29 = vector.broadcast %28 : vector<1x24xf32> to vector<192x24xf32>
    %30 = arith.addf %27, %29 : vector<192x24xf32>
    %31 = vector.shape_cast %30 : vector<192x24xf32> to vector<8x24x24xf32>
    %32 = tpu.iota {dimensions = array<i32: 1>} : vector<1x24xi32>
    %c17_i32 = arith.constant 17 : i32
    %33 = vector.broadcast %c17_i32 : i32 to vector<1x24xi32>
    %34 = arith.cmpi slt, %32, %33 : vector<1x24xi32>
    %cst_17 = arith.constant 0.000000e+00 : f32
    %cst_18 = arith.constant -1.000000e+30 : f32
    %35 = vector.broadcast %cst_17 : f32 to vector<1x24xf32>
    %36 = vector.broadcast %cst_18 : f32 to vector<1x24xf32>
    %37 = arith.select %34, %35, %36 : vector<1x24xi1>, vector<1x24xf32>
    %38 = vector.extract_strided_slice %31 {offsets = [0, 0, 0], sizes = [8, 24, 4], strides = [1, 1, 1]} : vector<8x24x24xf32> to vector<8x24x4xf32>
    %39 = vector.extract_strided_slice %31 {offsets = [0, 0, 8], sizes = [8, 24, 4], strides = [1, 1, 1]} : vector<8x24x24xf32> to vector<8x24x4xf32>
    %40 = vector.extract_strided_slice %31 {offsets = [0, 0, 16], sizes = [8, 24, 4], strides = [1, 1, 1]} : vector<8x24x24xf32> to vector<8x24x4xf32>
    "tpu.trace_start"() <{level = 10 : i32, message = "bqd,bkd->bqk"}> : () -> ()
    %cst_19 = arith.constant dense<0.000000e+00> : vector<8x24x24xf32>
    %41 = tpu.matmul %38, %39, %cst_19 {dimension_numbers = #tpu.dot_dimension_numbers<[2], [2], [1], [1], [0, 0, 0, 1, 1, 1], [0], [0]>} : vector<8x24x4xf32>, vector<8x24x4xf32>, vector<8x24x24xf32> -> vector<8x24x24xf32>
    "tpu.trace_stop"() : () -> ()
    %cst_20 = arith.constant 5.000000e-01 : f32
    %42 = vector.broadcast %cst_20 : f32 to vector<8x24x24xf32>
    %43 = arith.mulf %41, %42 : vector<8x24x24xf32>
    %44 = vector.shape_cast %37 : vector<1x24xf32> to vector<1x1x24xf32>
    %45 = vector.broadcast %44 : vector<1x1x24xf32> to vector<8x24x24xf32>
    %46 = arith.addf %43, %45 : vector<8x24x24xf32>
    %cst_21 = arith.constant dense<0xFF800000> : vector<8x24xf32>
    %47 = vector.multi_reduction <maximumf>, %46, %cst_21 [2] : vector<8x24x24xf32> to vector<8x24xf32>
    %48 = vector.shape_cast %47 : vector<8x24xf32> to vector<8x24x1xf32>
    %49 = vector.broadcast %48 : vector<8x24x1xf32> to vector<8x24x24xf32>
    %50 = arith.subf %46, %49 : vector<8x24x24xf32>
    %51 = math.exp %50 : vector<8x24x24xf32>
    %cst_22 = arith.constant dense<0.000000e+00> : vector<8x24xf32>
    %52 = vector.multi_reduction <add>, %51, %cst_22 [2] : vector<8x24x24xf32> to vector<8x24xf32>
    %53 = vector.shape_cast %52 : vector<8x24xf32> to vector<8x24x1xf32>
    %54 = tpu.reciprocal %53 {approx = true} : vector<8x24x1xf32> -> vector<8x24x1xf32>
    %55 = vector.broadcast %54 : vector<8x24x1xf32> to vector<8x24x24xf32>
    %56 = arith.mulf %51, %55 : vector<8x24x24xf32>
    "tpu.trace_start"() <{level = 10 : i32, message = "bqk,bkd->bqd"}> : () -> ()
    %cst_23 = arith.constant dense<0.000000e+00> : vector<8x24x4xf32>
    %57 = tpu.matmul %56, %40, %cst_23 {dimension_numbers = #tpu.dot_dimension_numbers<[2], [1], [1], [2], [0, 0, 0, 1, 1, 2], [0], [0]>} : vector<8x24x24xf32>, vector<8x24x4xf32>, vector<8x24x4xf32> -> vector<8x24x4xf32>
    "tpu.trace_stop"() : () -> ()
    %58 = vector.extract_strided_slice %31 {offsets = [0, 0, 4], sizes = [8, 24, 4], strides = [1, 1, 1]} : vector<8x24x24xf32> to vector<8x24x4xf32>
    %59 = vector.extract_strided_slice %31 {offsets = [0, 0, 12], sizes = [8, 24, 4], strides = [1, 1, 1]} : vector<8x24x24xf32> to vector<8x24x4xf32>
    %60 = vector.extract_strided_slice %31 {offsets = [0, 0, 20], sizes = [8, 24, 4], strides = [1, 1, 1]} : vector<8x24x24xf32> to vector<8x24x4xf32>
    "tpu.trace_start"() <{level = 10 : i32, message = "bqd,bkd->bqk"}> : () -> ()
    %cst_24 = arith.constant dense<0.000000e+00> : vector<8x24x24xf32>
    %61 = tpu.matmul %58, %59, %cst_24 {dimension_numbers = #tpu.dot_dimension_numbers<[2], [2], [1], [1], [0, 0, 0, 1, 1, 1], [0], [0]>} : vector<8x24x4xf32>, vector<8x24x4xf32>, vector<8x24x24xf32> -> vector<8x24x24xf32>
    "tpu.trace_stop"() : () -> ()
    %cst_25 = arith.constant 5.000000e-01 : f32
    %62 = vector.broadcast %cst_25 : f32 to vector<8x24x24xf32>
    %63 = arith.mulf %61, %62 : vector<8x24x24xf32>
    %64 = vector.shape_cast %37 : vector<1x24xf32> to vector<1x1x24xf32>
    %65 = vector.broadcast %64 : vector<1x1x24xf32> to vector<8x24x24xf32>
    %66 = arith.addf %63, %65 : vector<8x24x24xf32>
    %cst_26 = arith.constant dense<0xFF800000> : vector<8x24xf32>
    %67 = vector.multi_reduction <maximumf>, %66, %cst_26 [2] : vector<8x24x24xf32> to vector<8x24xf32>
    %68 = vector.shape_cast %67 : vector<8x24xf32> to vector<8x24x1xf32>
    %69 = vector.broadcast %68 : vector<8x24x1xf32> to vector<8x24x24xf32>
    %70 = arith.subf %66, %69 : vector<8x24x24xf32>
    %71 = math.exp %70 : vector<8x24x24xf32>
    %cst_27 = arith.constant dense<0.000000e+00> : vector<8x24xf32>
    %72 = vector.multi_reduction <add>, %71, %cst_27 [2] : vector<8x24x24xf32> to vector<8x24xf32>
    %73 = vector.shape_cast %72 : vector<8x24xf32> to vector<8x24x1xf32>
    %74 = tpu.reciprocal %73 {approx = true} : vector<8x24x1xf32> -> vector<8x24x1xf32>
    %75 = vector.broadcast %74 : vector<8x24x1xf32> to vector<8x24x24xf32>
    %76 = arith.mulf %71, %75 : vector<8x24x24xf32>
    "tpu.trace_start"() <{level = 10 : i32, message = "bqk,bkd->bqd"}> : () -> ()
    %cst_28 = arith.constant dense<0.000000e+00> : vector<8x24x4xf32>
    %77 = tpu.matmul %76, %60, %cst_28 {dimension_numbers = #tpu.dot_dimension_numbers<[2], [1], [1], [2], [0, 0, 0, 1, 1, 2], [0], [0]>} : vector<8x24x24xf32>, vector<8x24x4xf32>, vector<8x24x4xf32> -> vector<8x24x4xf32>
    "tpu.trace_stop"() : () -> ()
    %78 = tpu.concatenate %57, %77 in 2 : vector<8x24x4xf32>, vector<8x24x4xf32> -> vector<8x24x8xf32>
    %79 = vector.shape_cast %78 : vector<8x24x8xf32> to vector<192x8xf32>
    %80 = arith.addf %7, %79 : vector<192x8xf32>
    %cst_29 = arith.constant dense<0.000000e+00> : vector<192xf32>
    %81 = vector.multi_reduction <add>, %80, %cst_29 [1] : vector<192x8xf32> to vector<192xf32>
    %82 = vector.shape_cast %81 : vector<192xf32> to vector<192x1xf32>
    %cst_30 = arith.constant 8.000000e+00 : f32
    %83 = vector.broadcast %cst_30 : f32 to vector<192x1xf32>
    %84 = arith.divf %82, %83 : vector<192x1xf32>
    %85 = vector.broadcast %84 : vector<192x1xf32> to vector<192x8xf32>
    %86 = arith.subf %80, %85 : vector<192x8xf32>
    %87 = arith.mulf %86, %86 : vector<192x8xf32>
    %cst_31 = arith.constant dense<0.000000e+00> : vector<192xf32>
    %88 = vector.multi_reduction <add>, %87, %cst_31 [1] : vector<192x8xf32> to vector<192xf32>
    %89 = vector.shape_cast %88 : vector<192xf32> to vector<192x1xf32>
    %cst_32 = arith.constant 8.000000e+00 : f32
    %90 = vector.broadcast %cst_32 : f32 to vector<192x1xf32>
    %91 = arith.divf %89, %90 : vector<192x1xf32>
    %92 = vector.broadcast %84 : vector<192x1xf32> to vector<192x8xf32>
    %93 = arith.subf %80, %92 : vector<192x8xf32>
    %cst_33 = arith.constant 9.99999974E-6 : f32
    %94 = vector.broadcast %cst_33 : f32 to vector<192x1xf32>
    %95 = arith.addf %91, %94 : vector<192x1xf32>
    %96 = math.rsqrt %95 : vector<192x1xf32>
    %97 = vector.broadcast %96 : vector<192x1xf32> to vector<192x8xf32>
    %98 = arith.mulf %93, %97 : vector<192x8xf32>
    %c0_34 = arith.constant 0 : index
    %c0_35 = arith.constant 0 : index
    %99 = vector.load %arg7[%c0_34, %c0_35] : memref<8x32xf32, #tpu.memory_space<vmem>>, vector<8x32xf32>
    %cst_36 = arith.constant dense<0.000000e+00> : vector<192x32xf32>
    %100 = tpu.matmul %98, %99, %cst_36 {dimension_numbers = #tpu.dot_dimension_numbers<[1], [0], [0], [1], [0, 0, 1, 1], [], []>} : vector<192x8xf32>, vector<8x32xf32>, vector<192x32xf32> -> vector<192x32xf32>
    %c0_37 = arith.constant 0 : index
    %c0_38 = arith.constant 0 : index
    %101 = vector.load %arg8[%c0_37, %c0_38] : memref<1x32xf32, #tpu.memory_space<vmem>>, vector<1x32xf32>
    %102 = vector.broadcast %101 : vector<1x32xf32> to vector<192x32xf32>
    %103 = arith.addf %100, %102 : vector<192x32xf32>
    %104 = arith.mulf %103, %103 : vector<192x32xf32>
    %105 = arith.mulf %103, %104 : vector<192x32xf32>
    %cst_39 = arith.constant 4.471500e-02 : f32
    %106 = vector.broadcast %cst_39 : f32 to vector<192x32xf32>
    %107 = arith.mulf %106, %105 : vector<192x32xf32>
    %108 = arith.addf %103, %107 : vector<192x32xf32>
    %cst_40 = arith.constant 0.797884583 : f32
    %109 = vector.broadcast %cst_40 : f32 to vector<192x32xf32>
    %110 = arith.mulf %109, %108 : vector<192x32xf32>
    %111 = math.tanh %110 : vector<192x32xf32>
    %cst_41 = arith.constant 1.000000e+00 : f32
    %112 = vector.broadcast %cst_41 : f32 to vector<192x32xf32>
    %113 = arith.addf %112, %111 : vector<192x32xf32>
    %cst_42 = arith.constant 5.000000e-01 : f32
    %114 = vector.broadcast %cst_42 : f32 to vector<192x32xf32>
    %115 = arith.mulf %114, %113 : vector<192x32xf32>
    %116 = arith.mulf %103, %115 : vector<192x32xf32>
    %c0_43 = arith.constant 0 : index
    %c0_44 = arith.constant 0 : index
    %117 = vector.load %arg9[%c0_43, %c0_44] : memref<32x8xf32, #tpu.memory_space<vmem>>, vector<32x8xf32>
    %cst_45 = arith.constant dense<0.000000e+00> : vector<192x8xf32>
    %118 = tpu.matmul %116, %117, %cst_45 {dimension_numbers = #tpu.dot_dimension_numbers<[1], [0], [0], [1], [0, 0, 1, 1], [], []>} : vector<192x32xf32>, vector<32x8xf32>, vector<192x8xf32> -> vector<192x8xf32>
    %c0_46 = arith.constant 0 : index
    %c0_47 = arith.constant 0 : index
    %119 = vector.load %arg10[%c0_46, %c0_47] : memref<1x8xf32, #tpu.memory_space<vmem>>, vector<1x8xf32>
    %120 = vector.broadcast %119 : vector<1x8xf32> to vector<192x8xf32>
    %121 = arith.addf %118, %120 : vector<192x8xf32>
    %122 = arith.addf %80, %121 : vector<192x8xf32>
    %123 = vector.shape_cast %122 : vector<192x8xf32> to vector<8x24x8xf32>
    %124 = vector.extract_strided_slice %123 {offsets = [0, 0, 0], sizes = [8, 1, 8], strides = [1, 1, 1]} : vector<8x24x8xf32> to vector<8x1x8xf32>
    %125 = vector.shape_cast %124 : vector<8x1x8xf32> to vector<8x8xf32>
    %c0_48 = arith.constant 0 : index
    %c0_49 = arith.constant 0 : index
    %126 = vector.load %arg11[%c0_48, %c0_49] : memref<8x128xf32, #tpu.memory_space<vmem>>, vector<8x128xf32>
    %cst_50 = arith.constant dense<0.000000e+00> : vector<8x128xf32>
    %127 = tpu.matmul %125, %126, %cst_50 {dimension_numbers = #tpu.dot_dimension_numbers<[1], [0], [0], [1], [0, 0, 1, 1], [], []>} : vector<8x8xf32>, vector<8x128xf32>, vector<8x128xf32> -> vector<8x128xf32>
    %c0_51 = arith.constant 0 : index
    %c0_52 = arith.constant 0 : index
    %128 = vector.load %arg12[%c0_51, %c0_52] : memref<1x128xf32, #tpu.memory_space<vmem>>, vector<1x128xf32>
    %129 = vector.broadcast %128 : vector<1x128xf32> to vector<8x128xf32>
    %130 = arith.addf %127, %129 : vector<8x128xf32>
    %cst_53 = arith.constant dense<0xFF800000> : vector<8xf32>
    %131 = vector.multi_reduction <maximumf>, %130, %cst_53 [1] : vector<8x128xf32> to vector<8xf32>
    %132 = vector.shape_cast %131 : vector<8xf32> to vector<8x1xf32>
    %133 = vector.broadcast %132 : vector<8x1xf32> to vector<8x128xf32>
    %134 = arith.subf %130, %133 : vector<8x128xf32>
    %135 = math.exp %134 : vector<8x128xf32>
    %cst_54 = arith.constant dense<0.000000e+00> : vector<8xf32>
    %136 = vector.multi_reduction <add>, %135, %cst_54 [1] : vector<8x128xf32> to vector<8xf32>
    %137 = vector.shape_cast %136 : vector<8xf32> to vector<8x1xf32>
    %138 = vector.broadcast %137 : vector<8x1xf32> to vector<8x128xf32>
    %139 = arith.divf %135, %138 : vector<8x128xf32>
    %c0_55 = arith.constant 0 : index
    %c0_56 = arith.constant 0 : index
    %140 = vector.load %arg13[%c0_55, %c0_56] : memref<8x128xf32, #tpu.memory_space<vmem>>, vector<8x128xf32>
    tpu.vector_store %arg13[%c0_55, %c0_56], %139 {strides = array<i32>} : memref<8x128xf32, #tpu.memory_space<vmem>>, vector<8x128xf32>,
    return
  }
  func.func @transform_0(%arg0: i32) -> (i32, i32) {
    %c0_i32 = arith.constant 0 : i32
    %c0_i32_0 = arith.constant 0 : i32
    return %arg0, %c0_i32 : i32, i32
  }
  func.func @transform_1(%arg0: i32) -> (i32, i32) {
    %c0_i32 = arith.constant 0 : i32
    %c0_i32_0 = arith.constant 0 : i32
    %c0_i32_1 = arith.constant 0 : i32
    return %c0_i32, %c0_i32_0 : i32, i32
  }
  func.func @transform_2(%arg0: i32) -> (i32, i32) {
    %c0_i32 = arith.constant 0 : i32
    %c0_i32_0 = arith.constant 0 : i32
    %c0_i32_1 = arith.constant 0 : i32
    return %c0_i32, %c0_i32_0 : i32, i32
  }
  func.func @transform_3(%arg0: i32) -> (i32, i32) {
    %c0_i32 = arith.constant 0 : i32
    %c0_i32_0 = arith.constant 0 : i32
    %c0_i32_1 = arith.constant 0 : i32
    return %c0_i32, %c0_i32_0 : i32, i32
  }
  func.func @transform_4(%arg0: i32) -> (i32, i32) {
    %c0_i32 = arith.constant 0 : i32
    %c0_i32_0 = arith.constant 0 : i32
    %c0_i32_1 = arith.constant 0 : i32
    return %c0_i32, %c0_i32_0 : i32, i32
  }
  func.func @transform_5(%arg0: i32) -> (i32, i32) {
    %c0_i32 = arith.constant 0 : i32
    %c0_i32_0 = arith.constant 0 : i32
    %c0_i32_1 = arith.constant 0 : i32
    return %c0_i32, %c0_i32_0 : i32, i32
  }
  func.func @transform_6(%arg0: i32) -> (i32, i32) {
    %c0_i32 = arith.constant 0 : i32
    %c0_i32_0 = arith.constant 0 : i32
    %c0_i32_1 = arith.constant 0 : i32
    return %c0_i32, %c0_i32_0 : i32, i32
  }
  func.func @transform_7(%arg0: i32) -> (i32, i32) {
    %c0_i32 = arith.constant 0 : i32
    %c0_i32_0 = arith.constant 0 : i32
    %c0_i32_1 = arith.constant 0 : i32
    return %c0_i32, %c0_i32_0 : i32, i32
  }
  func.func @transform_8(%arg0: i32) -> (i32, i32) {
    %c0_i32 = arith.constant 0 : i32
    %c0_i32_0 = arith.constant 0 : i32
    %c0_i32_1 = arith.constant 0 : i32
    return %c0_i32, %c0_i32_0 : i32, i32
  }
  func.func @transform_9(%arg0: i32) -> (i32, i32) {
    %c0_i32 = arith.constant 0 : i32
    %c0_i32_0 = arith.constant 0 : i32
    %c0_i32_1 = arith.constant 0 : i32
    return %c0_i32, %c0_i32_0 : i32, i32
  }
  func.func @transform_10(%arg0: i32) -> (i32, i32) {
    %c0_i32 = arith.constant 0 : i32
    %c0_i32_0 = arith.constant 0 : i32
    %c0_i32_1 = arith.constant 0 : i32
    return %c0_i32, %c0_i32_0 : i32, i32
  }
  func.func @transform_11(%arg0: i32) -> (i32, i32) {
    %c0_i32 = arith.constant 0 : i32
    %c0_i32_0 = arith.constant 0 : i32
    %c0_i32_1 = arith.constant 0 : i32
    return %c0_i32, %c0_i32_0 : i32, i32
  }
  func.func @transform_12(%arg0: i32) -> (i32, i32) {
    %c0_i32 = arith.constant 0 : i32
    %c0_i32_0 = arith.constant 0 : i32
    return %arg0, %c0_i32 : i32, i32
  }
}

</mosaic_0001>

<bundles_post_ra>
// kernel: tpu_custom_call.1
= control target key start
LH: loop header
LB: loop body
LE: loop exit
PB: predicated region body
PF: predicated region fallthrough
CT: control target
= control target key end

     0   :  { %17 = vsyncpa [#allocation3], 0  ;;  %s8375_s0 = inlined_call_operand.vmem [shape: f32[384,48], index: 0, kind: input, shape index: {}]   ;;  %s8376_s1 = inlined_call_operand.vmem [shape: f32[48,8], index: 1, kind: input, shape index: {}]   ;;  %s8377_s2 = inlined_call_operand.vmem [shape: f32[1,8], index: 2, kind: input, shape index: {}]   ;;  %s8378_s3 = inlined_call_operand.vmem [shape: f32[192,8], index: 3, kind: input, shape index: {}]   ;;  %s8379_s4 = inlined_call_operand.vmem [shape: f32[8,24], index: 4, kind: input, shape index: {}]   ;;  %s8380_s5 = inlined_call_operand.vmem [shape: f32[1,24], index: 5, kind: input, shape index: {}]   ;;  %s8381_s6 = inlined_call_operand.vmem [shape: f32[8,32], index: 6, kind: input, shape index: {}]   ;;  %s8382_s7 = inlined_call_operand.vmem [shape: f32[1,32], index: 7, kind: input, shape index: {}]   ;;  %s8383_s8 = inlined_call_operand.vmem [shape: f32[32,8], index: 8, kind: input, shape index: {}]   ;;  %s8384_s9 = inlined_call_operand.vmem [shape: f32[1,8], index: 9, kind: input, shape index: {}]   ;;  %s8385_s10 = inlined_call_operand.vmem [shape: f32[8,128], index: 10, kind: input, shape index: {}]   ;;  %s8386_s11 = inlined_call_operand.vmem [shape: f32[1,128], index: 11, kind: input, shape index: {}]   ;;  %s8387_s12 = inlined_call_operand.hbm [shape: f32[16,128], index: 12, kind: output, shape index: {}]  }
   0x1   :  { %19 = vsyncpa [#allocation3 + $0x1], 0  ;;  %s5751_s21 = smov 0   ;;  %s5753_s22 = smov 0  }
   0x2   :  { %s5755_s23 = smov 0   ;;  %s5757_s24 = smov 0  }
   0x3 LB: > { %8422 = sst [smem:[#allocation5_spill]] %s5672_s23  ;;  %s5772_s25 = sadd.s32 4294967295, %s5676_s24   ;;  %s5676_s24 = sphi %s5757_s24, %s8538_s24   ;;  %s5672_s23 = sphi %s5755_s23, %s8535_s23   ;;  %s5668_s22 = sphi %s5753_s22, %s8537_s22   ;;  %s5664_s21 = sphi %s5751_s21, %s8536_s21  }
   0x4   : > { %s4840_s26 = sadd.s32 4294967294, %s5676_s24   ;;  %s5776_s27 = sadd.s32 1, %s5676_s24  }
   0x5   : > { %s289_s28 = sadd.s32 1, %s5672_s23  ;;  %s286_s29 = ssub.s32 %s5676_s24, %s5776_s27 }
   0x6   : > { %p299_p0 = scmp.ne.s32.totalorder %s5672_s23, %s5668_s22  ;;  %p287_p1 = scmp.eq.s32.totalorder %s286_s29, 0 }
   0x7   : > { %p300_p2 = scmp.eq.s32.totalorder %s5772_s25, 1  ;;  %p305_p3 = scmp.ne.s32.totalorder %s5668_s22, %s5664_s21 }
   0x8   : > { %p306_p4 = scmp.eq.s32.totalorder %s4840_s26, 1  ;;  %p4843_p7 = scmp.ge.s32.totalorder %s5676_s24, 1 }
   0x9   : > { %s5787_s30 = scalar_select %p287_p1, %s5672_s23, %s289_s28  }
   0xa   : > { %p5789_p5 = por %p300_p2, %p299_p0  ;;  %p5793_p6 = por %p306_p4, %p305_p3 }
   0xb   : > { %8423 = sst [smem:[#allocation6_spill]] %s5787_s30  ;;  %p366_p8 = scmp.lt.s32.totalorder %s5676_s24, 3 }
   0xd   : > { %p367_p9 = pnand %p4843_p7, %p366_p8 }
   0xf   : > { %370 = sbr.rel (%p367_p9) target bundleno = 3404 (0xd4c), region = 68 }
  0x14   : > { %v443_v0 = vld [vmem:[%s8376_s1 + $0x28] sm:$0xff]  ;;  %v442_v1 = vld [vmem:[%s8376_s1 + $0x20] sm:$0xff]  ;;  %s408_s19 = smul.u32 24, %s5772_s25  ;;  %v441_v2 = vld [vmem:[%s8376_s1 + $0x18] sm:$0xff]  ;;  %vm448_vm0 = vcmask 392192   ;;  %vm658_vm1 = vcmask 64512  }
  0x15   : > { %531 = vmatpush.msra.mxu0 %v443_v0  ;;  %5091 = vmatpush.msra.mxu3 %v443_v0  ;;  %v440_v3 = vld [vmem:[%s8376_s1 + $0x10] sm:$0xff]  ;;  %v439_v4 = vld [vmem:[%s8376_s1 + $0x8] sm:$0xff]  ;;  %v438_v5 = vld [vmem:[%s8376_s1] sm:$0xff]  ;;  %s5680_s23 = smov 120   ;;  %s5681_s30 = smov 116  }
  0x16   : > { %p409_p10 = scmp.lt.s32.totalorder %s408_s19, 47  ;;  %v5874_v30 = vld [vmem:[%s8377_s2] ss:$0 sm:$0xff]  ;;  %v611_v40 = vld [vmem:[%s8378_s3 + $0x8] sm:$0xff]  ;;  %v612_v50 = vld [vmem:[%s8378_s3 + $0x10] sm:$0xff]  ;;  %s5683_s28 = smov 108  }
  0x17   : > { %532 = vmatpush.msra.mxu0 %v442_v1  ;;  %5092 = vmatpush.msra.mxu3 %v442_v1  ;;  %v610_v32 = vld [vmem:[%s8378_s3] sm:$0xff]  ;;  %v623_v47 = vld [vmem:[%s8378_s3 + $0x68] sm:$0xff]  ;;  %v624_v57 = vld [vmem:[%s8378_s3 + $0x70] sm:$0xff]  ;;  %s5685_s29 = smov 4   ;;  %s405_s16 = sand.u32 1, %s5668_s22  }
  0x18   : > { %s8540_s19 = smov (!%p409_p10, %s408_s19), 47  ;;  %v622_v37 = vld [vmem:[%s8378_s3 + $0x60] sm:$0xff]  ;;  %v613_v60 = vld [vmem:[%s8378_s3 + $0x18] sm:$0xff]  ;;  %s4844_s18 = sshll.u32 %s405_s16, 3 }
  0x19   : > { %533 = vmatpush.msra.mxu0 %v441_v2  ;;  %5093 = vmatpush.msra.mxu3 %v441_v2  ;;  %s4845_s17 = sshll.u32 %s8540_s19, 3  ;;  %s5682_s19 = smov 112  }
  0x1a   : > { %s5818_s26 = scalar_lea.vmem %s8375_s0, %s4845_s17  ;;  %s5088_s17 = sshll.u32 %s5772_s25, 3 }
  0x1b   : > { %534 = vmatpush.msra.mxu0 %v440_v3  ;;  %5094 = vmatpush.msra.mxu3 %v440_v3  ;;  %v414_v6 = vld [vmem:[%s5818_s26] sm:$0xff]  ;;  %v415_v8 = vld [vmem:[%s5818_s26 + $0x8] sm:$0xff]  ;;  %v416_v10 = vld [vmem:[%s5818_s26 + $0x10] sm:$0xff]  ;;  %s4766_s25 = scalar_lea.sflag [#allocation3], %s405_s16 }
  0x1c   : > { %v426_v7 = vld [vmem:[%s5818_s26 + $0x60] sm:$0xff]  ;;  %v427_v9 = vld [vmem:[%s5818_s26 + $0x68] sm:$0xff]  ;;  %v428_v11 = vld [vmem:[%s5818_s26 + $0x70] sm:$0xff] }
  0x1d   : > { %535 = vmatpush.msra.mxu0 %v439_v4  ;;  %5095 = vmatpush.msra.mxu3 %v439_v4  ;;  %v417_v12 = vld [vmem:[%s5818_s26 + $0x18] sm:$0xff]  ;;  %v418_v14 = vld [vmem:[%s5818_s26 + $0x20] sm:$0xff]  ;;  %v419_v16 = vld [vmem:[%s5818_s26 + $0x28] sm:$0xff] }
  0x1e   : > { %v429_v13 = vld [vmem:[%s5818_s26 + $0x78] sm:$0xff]  ;;  %v430_v15 = vld [vmem:[%s5818_s26 + $0x80] sm:$0xff]  ;;  %v431_v17 = vld [vmem:[%s5818_s26 + $0x88] sm:$0xff] }
  0x1f   : > { %536 = vmatpush.msra.mxu0 %v438_v5  ;;  %5096 = vmatpush.msra.mxu3 %v438_v5  ;;  %v420_v18 = vld [vmem:[%s5818_s26 + $0x30] sm:$0xff]  ;;  %v421_v20 = vld [vmem:[%s5818_s26 + $0x38] sm:$0xff]  ;;  %v422_v22 = vld [vmem:[%s5818_s26 + $0x40] sm:$0xff] }
  0x20   : > { %4846 = vmatmul.msk.f32.vlgmr.msra.gmra.mxu0 %vm448_vm0, %v414_v6  ;;  %4858 = vmatmul.msk.f32.vlgmr.msra.gmra.mxu3 %vm448_vm0, %v426_v7  ;;  %v432_v19 = vld [vmem:[%s5818_s26 + $0x90] sm:$0xff]  ;;  %v433_v21 = vld [vmem:[%s5818_s26 + $0x98] sm:$0xff]  ;;  %v434_v23 = vld [vmem:[%s5818_s26 + $0xa0] sm:$0xff] }
  0x21   : > { %v423_v24 = vld [vmem:[%s5818_s26 + $0x48] sm:$0xff]  ;;  %v424_v26 = vld [vmem:[%s5818_s26 + $0x50] sm:$0xff]  ;;  %v425_v28 = vld [vmem:[%s5818_s26 + $0x58] sm:$0xff] }
  0x22   : > { %v435_v25 = vld [vmem:[%s5818_s26 + $0xa8] sm:$0xff]  ;;  %v436_v27 = vld [vmem:[%s5818_s26 + $0xb0] sm:$0xff]  ;;  %v437_v29 = vld [vmem:[%s5818_s26 + $0xb8] sm:$0xff]  ;;  %s5679_s26 = smov 124  }
  0x23   : > { %v625_v3 = vld [vmem:[%s8378_s3 + $0x78] sm:$0xff] }
  0x28   : > { %4847 = vmatmul.msk.f32.gmra.mxu0 %vm448_vm0, %v415_v8  ;;  %4859 = vmatmul.msk.f32.gmra.mxu3 %vm448_vm0, %v427_v9  ;;  %v614_v8 = vld [vmem:[%s8378_s3 + $0x20] sm:$0xff] }
  0x30   : > { %4848 = vmatmul.msk.f32.gmra.mxu0 %vm448_vm0, %v416_v10  ;;  %4860 = vmatmul.msk.f32.gmra.mxu3 %vm448_vm0, %v428_v11 }
  0x38   : > { %4849 = vmatmul.msk.f32.gmra.mxu0 %vm448_vm0, %v417_v12  ;;  %4861 = vmatmul.msk.f32.gmra.mxu3 %vm448_vm0, %v429_v13 }
  0x40   : > { %4850 = vmatmul.msk.f32.gmra.mxu0 %vm448_vm0, %v418_v14  ;;  %4862 = vmatmul.msk.f32.gmra.mxu3 %vm448_vm0, %v430_v15  ;;  %v626_v15 = vld [vmem:[%s8378_s3 + $0x80] sm:$0xff] }
  0x48   : > { %4851 = vmatmul.msk.f32.gmra.mxu0 %vm448_vm0, %v419_v16  ;;  %4863 = vmatmul.msk.f32.gmra.mxu3 %vm448_vm0, %v431_v17 }
  0x50   : > { %4852 = vmatmul.msk.f32.gmra.mxu0 %vm448_vm0, %v420_v18  ;;  %4864 = vmatmul.msk.f32.gmra.mxu3 %vm448_vm0, %v432_v19  ;;  %v616_v19 = vld [vmem:[%s8378_s3 + $0x30] sm:$0xff] }
  0x58   : > { %4853 = vmatmul.msk.f32.gmra.mxu0 %vm448_vm0, %v421_v20  ;;  %4865 = vmatmul.msk.f32.gmra.mxu3 %vm448_vm0, %v433_v21 }
  0x60   : > { %4854 = vmatmul.msk.f32.gmra.mxu0 %vm448_vm0, %v422_v22  ;;  %4866 = vmatmul.msk.f32.gmra.mxu3 %vm448_vm0, %v434_v23  ;;  %v615_v23 = vld [vmem:[%s8378_s3 + $0x28] sm:$0xff] }
  0x68   : > { %4855 = vmatmul.msk.f32.gmra.mxu0 %vm448_vm0, %v423_v24  ;;  %4867 = vmatmul.msk.f32.gmra.mxu3 %vm448_vm0, %v435_v25 }
  0x70   : > { %4856 = vmatmul.msk.f32.gmra.mxu0 %vm448_vm0, %v424_v26  ;;  %4868 = vmatmul.msk.f32.gmra.mxu3 %vm448_vm0, %v436_v27 }
  0x78   : > { %4857 = vmatmul.msk.f32.gmra.mxu0 %vm448_vm0, %v425_v28  ;;  %4869 = vmatmul.msk.f32.gmra.mxu3 %vm448_vm0, %v437_v29  ;;  %v617_v29 = vld [vmem:[%s8378_s3 + $0x38] sm:$0xff] }
  0x9d   : > { %v538_v31 = vpop.f32.mrf.mxu0 }
  0x9e   : > { %v539_v33 = vadd.f32 %v5874_v30, %v538_v31 }
  0xa0   : > { %v5880_v34 = vadd.f32 %v610_v32, %v539_v33 }
  0xa2   : > { %8426 = vst [vmem:[#allocation7_spill] sm:$0xff] %v5880_v34  ;;  %v659_v35 = vsel %vm658_vm1, %v5880_v34, 0.0 }
  0xa3   : > { %v574_v36 = vpop.f32.mrf.mxu3  ;;  %660 = vadd.xlane.f32.xlu0 %v659_v35  ;;  %v627_v35 = vld [vmem:[%s8378_s3 + $0x88] sm:$0xff] }
  0xa4   : > { %v575_v38 = vadd.f32 %v5874_v30, %v574_v36 }
  0xa5   : > { %v541_v39 = vpop.f32.mrf.mxu0 }
  0xa6   : > { %v5891_v41 = vadd.f32 %v622_v37, %v575_v38  ;;  %v542_v42 = vadd.f32 %v5874_v30, %v541_v39 }
  0xa8   : > { %8427 = vst [vmem:[#allocation8_spill] sm:$0xff] %v5891_v41  ;;  %v5894_v43 = vadd.f32 %v611_v40, %v542_v42  ;;  %v695_v44 = vsel %vm658_vm1, %v5891_v41, 0.0  ;;  %v629_v40 = vld [vmem:[%s8378_s3 + $0x98] sm:$0xff] }
  0xa9   : > { %696 = vadd.xlane.f32.xlu1 %v695_v44 }
  0xaa   : > { %8428 = vst [vmem:[#allocation9_spill] sm:$0xff] %v5894_v43  ;;  %v662_v45 = vsel %vm658_vm1, %v5894_v43, 0.0 }
  0xab   : > { %v577_v46 = vpop.f32.mrf.mxu3  ;;  %663 = vadd.xlane.f32.xlu0 %v662_v45  ;;  %v618_v45 = vld [vmem:[%s8378_s3 + $0x40] sm:$0xff] }
  0xac   : > { %v578_v48 = vadd.f32 %v5874_v30, %v577_v46 }
  0xad   : > { %v544_v49 = vpop.f32.mrf.mxu0 }
  0xae   : > { %v5907_v51 = vadd.f32 %v623_v47, %v578_v48  ;;  %v545_v52 = vadd.f32 %v5874_v30, %v544_v49 }
  0xb0   : > { %8429 = vst [vmem:[#allocation10_spill] sm:$0xff] %v5907_v51  ;;  %v5910_v53 = vadd.f32 %v612_v50, %v545_v52  ;;  %v698_v54 = vsel %vm658_vm1, %v5907_v51, 0.0  ;;  %v628_v50 = vld [vmem:[%s8378_s3 + $0x90] sm:$0xff] }
  0xb1   : > { %699 = vadd.xlane.f32.xlu2 %v698_v54 }
  0xb2   : > { %8430 = vst [vmem:[#allocation11_spill] sm:$0xff] %v5910_v53  ;;  %v665_v55 = vsel %vm658_vm1, %v5910_v53, 0.0 }
  0xb3   : > { %v580_v56 = vpop.f32.mrf.mxu3  ;;  %666 = vadd.xlane.f32.xlu1 %v665_v55 }
  0xb4   : > { %v581_v58 = vadd.f32 %v5874_v30, %v580_v56 }
  0xb5   : > { %v547_v59 = vpop.f32.mrf.mxu0 }
  0xb6   : > { %v5923_v61 = vadd.f32 %v624_v57, %v581_v58  ;;  %v548_v62 = vadd.f32 %v5874_v30, %v547_v59  ;;  %v630_v58 = vld [vmem:[%s8378_s3 + $0xa0] sm:$0xff] }
  0xb8   : > { %8431 = vst [vmem:[#allocation12_spill] sm:$0xff] %v5923_v61  ;;  %v5926_v63 = vadd.f32 %v613_v60, %v548_v62  ;;  %v701_v0 = vsel %vm658_vm1, %v5923_v61, 0.0  ;;  %v619_v62 = vld [vmem:[%s8378_s3 + $0x48] sm:$0xff] }
  0xb9   : > { %702 = vadd.xlane.f32.xlu2 %v701_v0 }
  0xba   : > { %8432 = vst [vmem:[#allocation13_spill] sm:$0xff] %v5926_v63  ;;  %v668_v1 = vsel %vm658_vm1, %v5926_v63, 0.0 }
  0xbb   : > { %v583_v2 = vpop.f32.mrf.mxu3  ;;  %669 = vadd.xlane.f32.xlu1 %v668_v1 }
  0xbc   : > { %v584_v4 = vadd.f32 %v5874_v30, %v583_v2 }
  0xbd   : > { %v550_v5 = vpop.f32.mrf.mxu0 }
  0xbe   : > { %v5936_v6 = vadd.f32 %v625_v3, %v584_v4  ;;  %v551_v7 = vadd.f32 %v5874_v30, %v550_v5 }
  0xc0   : > { %8433 = vst [vmem:[#allocation14_spill] sm:$0xff] %v5936_v6  ;;  %v704_v9 = vsel %vm658_vm1, %v5936_v6, 0.0  ;;  %v5944_v10 = vadd.f32 %v614_v8, %v551_v7  ;;  %v631_v8 = vld [vmem:[%s8378_s3 + $0xa8] sm:$0xff] }
  0xc1   : > { %705 = vadd.xlane.f32.xlu2 %v704_v9 }
  0xc2   : > { %8434 = vst [vmem:[#allocation15_spill] sm:$0xff] %v5944_v10  ;;  %v671_v14 = vsel %vm658_vm1, %v5944_v10, 0.0 }
  0xc3   : > { %v586_v11 = vpop.f32.mrf.mxu3 }
  0xc4   : > { %v587_v13 = vadd.f32 %v5874_v30, %v586_v11 }
  0xc5   : > { %v553_v12 = vpop.f32.mrf.mxu0 }
  0xc6   : > { %v5952_v16 = vadd.f32 %v626_v15, %v587_v13  ;;  %v554_v20 = vadd.f32 %v5874_v30, %v553_v12  ;;  %v620_v12 = vld [vmem:[%s8378_s3 + $0x50] sm:$0xff] }
  0xc8   : > { %8435 = vst [vmem:[#allocation16_spill] sm:$0xff] %v5952_v16  ;;  %v707_v22 = vsel %vm658_vm1, %v5952_v16, 0.0  ;;  %v5966_v25 = vadd.f32 %v615_v23, %v554_v20  ;;  %v632_v20 = vld [vmem:[%s8378_s3 + $0xb0] sm:$0xff]  ;;  %v621_v23 = vld [vmem:[%s8378_s3 + $0x58] sm:$0xff] }
  0xc9   : > { %672 = vadd.xlane.f32.xlu2 %v671_v14 }
  0xca   : > { %8437 = vst [vmem:[#allocation18_spill] sm:$0xff] %v5966_v25  ;;  %v674_v33 = vsel %vm658_vm1, %v5966_v25, 0.0 }
  0xcb   : > { %v589_v17 = vpop.f32.mrf.mxu3 }
  0xcc   : > { %v590_v31 = vadd.f32 %v5874_v30, %v589_v17 }
  0xcd   : > { %v556_v18 = vpop.f32.mrf.mxu0 }
  0xce   : > { %v557_v21 = vadd.f32 %v5874_v30, %v556_v18  ;;  %v5982_v37 = vadd.f32 %v627_v35, %v590_v31  ;;  %v5678_v35 = vmov 8.0  }
  0xcf   : > { %5270 = vrcp.f32 %v5678_v35 }
  0xd0   : > { %v5964_v24 = vadd.f32 %v616_v19, %v557_v21  ;;  %8439 = vst [vmem:[#allocation20_spill] sm:$0xff] %v5982_v37  ;;  %v710_v49 = vsel %vm658_vm1, %v5982_v37, 0.0 }
  0xd1   : > { %708 = vadd.xlane.f32.xlu2 %v707_v22 }
  0xd2   : > { %8436 = vst [vmem:[#allocation17_spill] sm:$0xff] %v5964_v24  ;;  %v677_v26 = vsel %vm658_vm1, %v5964_v24, 0.0 }
  0xd3   : > { %v592_v27 = vpop.f32.mrf.mxu3  ;;  %678 = vadd.xlane.f32.xlu1 %v677_v26 }
  0xd4   : > { %v593_v46 = vadd.f32 %v5874_v30, %v592_v27 }
  0xd5   : > { %v559_v28 = vpop.f32.mrf.mxu0 }
  0xd6   : > { %v560_v32 = vadd.f32 %v5874_v30, %v559_v28  ;;  %v6006_v55 = vadd.f32 %v628_v50, %v593_v46 }
  0xd8   : > { %v5980_v36 = vadd.f32 %v617_v29, %v560_v32  ;;  %8442 = vst [vmem:[#allocation23_spill] sm:$0xff] %v6006_v55  ;;  %v713_v2 = vsel %vm658_vm1, %v6006_v55, 0.0 }
  0xd9   : > { %675 = vadd.xlane.f32.xlu2 %v674_v33  ;;  %v633_v33 = vld [vmem:[%s8378_s3 + $0xb8] sm:$0xff] }
  0xda   : > { %8438 = vst [vmem:[#allocation19_spill] sm:$0xff] %v5980_v36  ;;  %v680_v38 = vsel %vm658_vm1, %v5980_v36, 0.0 }
  0xdb   : > { %v595_v39 = vpop.f32.mrf.mxu3  ;;  %681 = vadd.xlane.f32.xlu1 %v680_v38 }
  0xdc   : > { %v596_v42 = vadd.f32 %v5874_v30, %v595_v39 }
  0xdd   : > { %v562_v44 = vpop.f32.mrf.mxu0 }
  0xde   : > { %v5994_v47 = vadd.f32 %v629_v40, %v596_v42  ;;  %v563_v48 = vadd.f32 %v5874_v30, %v562_v44  ;;  %v5271_v42 = vpop.eup %5270 }
  0xdf   : > { %v732_v44 = vmul.f32 8.0, %v5271_v42  ;;  %vm736_vm2 = vweird.f32 %v5271_v42 }
  0xe0   : > { %8440 = vst [vmem:[#allocation21_spill] sm:$0xff] %v5994_v47  ;;  %v6002_v52 = vadd.f32 %v618_v45, %v563_v48  ;;  %v716_v54 = vsel %vm658_vm1, %v5994_v47, 0.0 }
  0xe1   : > { %711 = vadd.xlane.f32.xlu2 %v710_v49  ;;  %717 = vadd.xlane.f32.xlu0 %v716_v54  ;;  %v733_v45 = vsub.f32 1.0, %v732_v44 }
  0xe2   : > { %8441 = vst [vmem:[#allocation22_spill] sm:$0xff] %v6002_v52  ;;  %v683_v56 = vsel %vm658_vm1, %v6002_v52, 0.0 }
  0xe3   : > { %v598_v57 = vpop.f32.mrf.mxu3  ;;  %684 = vadd.xlane.f32.xlu1 %v683_v56  ;;  %v734_v46 = vmul.f32 %v5271_v42, %v733_v45 }
  0xe4   : > { %v599_v59 = vadd.f32 %v5874_v30, %v598_v57 }
  0xe5   : > { %v565_v60 = vpop.f32.mrf.mxu0  ;;  %v735_v48 = vadd.f32 %v5271_v42, %v734_v46 }
  0xe6   : > { %v6017_v0 = vadd.f32 %v630_v58, %v599_v59  ;;  %v566_v1 = vadd.f32 %v5874_v30, %v565_v60 }
  0xe7   : > { %v6068_v49 = vsel %vm736_vm2, %v5271_v42, %v735_v48 }
  0xe8   : > { %8443 = vst [vmem:[#allocation24_spill] sm:$0xff] %v6017_v0  ;;  %v6022_v3 = vadd.f32 %v619_v62, %v566_v1  ;;  %v719_v4 = vsel %vm658_vm1, %v6017_v0, 0.0 }
  0xe9   : > { %714 = vadd.xlane.f32.xlu2 %v713_v2  ;;  %720 = vadd.xlane.f32.xlu0 %v719_v4  ;;  %8450 = vst [vmem:[#allocation31_spill] sm:$0xff] %v6068_v49 }
  0xea   : > { %8444 = vst [vmem:[#allocation25_spill] sm:$0xff] %v6022_v3  ;;  %v686_v5 = vsel %vm658_vm1, %v6022_v3, 0.0 }
  0xeb   : > { %v601_v7 = vpop.f32.mrf.mxu3  ;;  %687 = vadd.xlane.f32.xlu1 %v686_v5 }
  0xec   : > { %v602_v9 = vadd.f32 %v5874_v30, %v601_v7 }
  0xed   : > { %v568_v11 = vpop.f32.mrf.mxu0 }
  0xee   : > { %v6035_v13 = vadd.f32 %v631_v8, %v602_v9  ;;  %v569_v14 = vadd.f32 %v5874_v30, %v568_v11 }
  0xf0   : > { %8445 = vst [vmem:[#allocation26_spill] sm:$0xff] %v6035_v13  ;;  %v6038_v15 = vadd.f32 %v620_v12, %v569_v14  ;;  %v722_v17 = vsel %vm658_vm1, %v6035_v13, 0.0 }
  0xf1   : > { %723 = vadd.xlane.f32.xlu0 %v722_v17 }
  0xf2   : > { %8446 = vst [vmem:[#allocation27_spill] sm:$0xff] %v6038_v15  ;;  %v689_v18 = vsel %vm658_vm1, %v6038_v15, 0.0 }
  0xf3   : > { %v604_v19 = vpop.f32.mrf.mxu3  ;;  %690 = vadd.xlane.f32.xlu1 %v689_v18 }
  0xf4   : > { %v605_v21 = vadd.f32 %v5874_v30, %v604_v19 }
  0xf5   : > { %v571_v22 = vpop.f32.mrf.mxu0 }
  0xf6   : > { %v6051_v26 = vadd.f32 %v632_v20, %v605_v21  ;;  %v572_v27 = vadd.f32 %v5874_v30, %v571_v22 }
  0xf8   : > { %8447 = vst [vmem:[#allocation28_spill] sm:$0xff] %v6051_v26  ;;  %v6054_v28 = vadd.f32 %v621_v23, %v572_v27  ;;  %v725_v29 = vsel %vm658_vm1, %v6051_v26, 0.0 }
  0xf9   : > { %726 = vadd.xlane.f32.xlu0 %v725_v29 }
  0xfa   : > { %8448 = vst [vmem:[#allocation29_spill] sm:$0xff] %v6054_v28  ;;  %v692_v31 = vsel %vm658_vm1, %v6054_v28, 0.0 }
  0xfb   : > { %v607_v32 = vpop.f32.mrf.mxu3  ;;  %693 = vadd.xlane.f32.xlu1 %v692_v31 }
  0xfc   : > { %v608_v38 = vadd.f32 %v5874_v30, %v607_v32 }
  0xfe   : > { %v6064_v39 = vadd.f32 %v633_v33, %v608_v38 }
 0x100   : > { %8449 = vst [vmem:[#allocation30_spill] sm:$0xff] %v6064_v39  ;;  %v728_v40 = vsel %vm658_vm1, %v6064_v39, 0.0 }
 0x101   : > { %729 = vadd.xlane.f32.xlu0 %v728_v40 }
 0x116   : > { %v661_v50 = vpop.xlane.xlu0 %660 }
 0x117   : > { %v738_v54 = vmul.f32 %v6068_v49, %v661_v50 }
 0x119   : > { %v6072_v56 = vsub.f32 %v5880_v34, %v738_v54 }
 0x11b   : > { %v786_v30 = vmul.f32 %v6072_v56, %v6072_v56 }
 0x11c   : > { %v697_v57 = vpop.xlane.xlu1 %696 }
 0x11d   : > { %v750_v58 = vmul.f32 %v6068_v49, %v697_v57  ;;  %v810_v59 = vsel %vm658_vm1, %v786_v30, 0.0 }
 0x11e   : > { %811 = vadd.xlane.f32.xlu0 %v810_v59  ;;  %v664_v60 = vpop.xlane.xlu0 %663 }
 0x11f   : > { %v6079_v62 = vsub.f32 %v5891_v41, %v750_v58  ;;  %v739_v1 = vmul.f32 %v6068_v49, %v664_v60 }
 0x121   : > { %v798_v2 = vmul.f32 %v6079_v62, %v6079_v62  ;;  %v6085_v5 = vsub.f32 %v5894_v43, %v739_v1 }
 0x123   : > { %v846_v8 = vsel %vm658_vm1, %v798_v2, 0.0  ;;  %v787_v17 = vmul.f32 %v6085_v5, %v6085_v5 }
 0x124   : > { %v700_v4 = vpop.xlane.xlu2 %699 }
 0x125   : > { %v751_v7 = vmul.f32 %v6068_v49, %v700_v4  ;;  %v813_v22 = vsel %vm658_vm1, %v787_v17, 0.0 }
 0x126   : > { %v667_v9 = vpop.xlane.xlu1 %666  ;;  %847 = vadd.xlane.f32.xlu0 %v846_v8 }
 0x127   : > { %v6090_v11 = vsub.f32 %v5907_v51, %v751_v7  ;;  %v740_v12 = vmul.f32 %v6068_v49, %v667_v9 }
 0x129   : > { %v799_v14 = vmul.f32 %v6090_v11, %v6090_v11  ;;  %v6099_v20 = vsub.f32 %v5910_v53, %v740_v12 }
 0x12b   : > { %v849_v18 = vsel %vm658_vm1, %v799_v14, 0.0  ;;  %v788_v32 = vmul.f32 %v6099_v20, %v6099_v20 }
 0x12c   : > { %v703_v19 = vpop.xlane.xlu2 %702  ;;  %850 = vadd.xlane.f32.xlu2 %v849_v18 }
 0x12d   : > { %v752_v21 = vmul.f32 %v6068_v49, %v703_v19  ;;  %v816_v42 = vsel %vm658_vm1, %v788_v32, 0.0 }
 0x12e   : > { %v670_v23 = vpop.xlane.xlu1 %669  ;;  %814 = vadd.xlane.f32.xlu0 %v813_v22 }
 0x12f   : > { %v6104_v27 = vsub.f32 %v5923_v61, %v752_v21  ;;  %v741_v29 = vmul.f32 %v6068_v49, %v670_v23 }
 0x131   : > { %v800_v31 = vmul.f32 %v6104_v27, %v6104_v27  ;;  %v6113_v38 = vsub.f32 %v5926_v63, %v741_v29  ;;  %v5684_v63 = vmov -1e+30  }
 0x133   : > { %v852_v33 = vsel %vm658_vm1, %v800_v31, 0.0  ;;  %v789_v46 = vmul.f32 %v6113_v38, %v6113_v38 }
 0x134   : > { %v706_v35 = vpop.xlane.xlu2 %705  ;;  %853 = vadd.xlane.f32.xlu2 %v852_v33 }
 0x135   : > { %v753_v40 = vmul.f32 %v6068_v49, %v706_v35  ;;  %v819_v30 = vsel %vm658_vm1, %v789_v46, 0.0 }
 0x136   : > { %817 = vadd.xlane.f32.xlu0 %v816_v42 }
 0x137   : > { %v6118_v44 = vsub.f32 %v5936_v6, %v753_v40 }
 0x139   : > { %v801_v45 = vmul.f32 %v6118_v44, %v6118_v44 }
 0x13b   : > { %v855_v48 = vsel %vm658_vm1, %v801_v45, 0.0 }
 0x13c   : > { %856 = vadd.xlane.f32.xlu2 %v855_v48  ;;  %v673_v50 = vpop.xlane.xlu2 %672 }
 0x13d   : > { %v742_v54 = vmul.f32 %v6068_v49, %v673_v50 }
 0x13e   : > { %820 = vadd.xlane.f32.xlu0 %v819_v30 }
 0x13f   : > { %v6128_v57 = vsub.f32 %v5944_v10, %v742_v54 }
 0x141   : > { %v790_v58 = vmul.f32 %v6128_v57, %v6128_v57 }
 0x143   : > { %v822_v1 = vsel %vm658_vm1, %v790_v58, 0.0 }
 0x144   : > { %v709_v59 = vpop.xlane.xlu2 %708 }
 0x145   : > { %v754_v60 = vmul.f32 %v6068_v49, %v709_v59 }
 0x146   : > { %v679_v2 = vpop.xlane.xlu1 %678  ;;  %823 = vadd.xlane.f32.xlu0 %v822_v1 }
 0x147   : > { %v6135_v4 = vsub.f32 %v5952_v16, %v754_v60  ;;  %v744_v17 = vmul.f32 %v6068_v49, %v679_v2 }
 0x149   : > { %v802_v7 = vmul.f32 %v6135_v4, %v6135_v4  ;;  %v6152_v23 = vsub.f32 %v5964_v24, %v744_v17  ;;  %v1360_v24 = vlaneseq }
 0x14b   : > { %v858_v8 = vsel %vm658_vm1, %v802_v7, 0.0  ;;  %v792_v50 = vmul.f32 %v6152_v23, %v6152_v23  ;;  %v1361_v41 = vand.u32 127, %v1360_v24 }
 0x14c   : > { %859 = vadd.xlane.f32.xlu2 %v858_v8  ;;  %v676_v9 = vpop.xlane.xlu2 %675 }
 0x14d   : > { %v743_v12 = vmul.f32 %v6068_v49, %v676_v9  ;;  %v828_v60 = vsel %vm658_vm1, %v792_v50, 0.0 }
 0x14e   : > { %v682_v14 = vpop.xlane.xlu1 %681 }
 0x14f   : > { %v6143_v18 = vsub.f32 %v5966_v25, %v743_v12  ;;  %v745_v19 = vmul.f32 %v6068_v49, %v682_v14 }
 0x151   : > { %v6147_v21 = vsub.f32 %v5980_v36, %v745_v19  ;;  %v791_v22 = vmul.f32 %v6143_v18, %v6143_v18 }
 0x153   : > { %v825_v29 = vsel %vm658_vm1, %v791_v22, 0.0  ;;  %v793_v31 = vmul.f32 %v6147_v21, %v6147_v21 }
 0x154   : > { %v712_v32 = vpop.xlane.xlu2 %711  ;;  %826 = vadd.xlane.f32.xlu0 %v825_v29  ;;  %v718_v33 = vpop.xlane.xlu0 %717 }
 0x155   : > { %v755_v35 = vmul.f32 %v6068_v49, %v712_v32  ;;  %v757_v40 = vmul.f32 %v6068_v49, %v718_v33  ;;  %v831_v42 = vsel %vm658_vm1, %v793_v31, 0.0 }
 0x156   : > { %832 = vadd.xlane.f32.xlu1 %v831_v42  ;;  %v685_v45 = vpop.xlane.xlu1 %684 }
 0x157   : > { %v6161_v46 = vsub.f32 %v5982_v37, %v755_v35  ;;  %v6164_v48 = vsub.f32 %v5994_v47, %v757_v40  ;;  %v746_v54 = vmul.f32 %v6068_v49, %v685_v45 }
 0x159   : > { %v803_v30 = vmul.f32 %v6161_v46, %v6161_v46  ;;  %v805_v58 = vmul.f32 %v6164_v48, %v6164_v48  ;;  %v6176_v7 = vsub.f32 %v6002_v52, %v746_v54 }
 0x15b   : > { %v861_v59 = vsel %vm658_vm1, %v803_v30, 0.0  ;;  %v867_v9 = vsel %vm658_vm1, %v805_v58, 0.0  ;;  %v794_v29 = vmul.f32 %v6176_v7, %v6176_v7 }
 0x15c   : > { %862 = vadd.xlane.f32.xlu2 %v861_v59  ;;  %v715_v1 = vpop.xlane.xlu2 %714  ;;  %829 = vadd.xlane.f32.xlu0 %v828_v60  ;;  %v721_v2 = vpop.xlane.xlu0 %720 }
 0x15d   : > { %v756_v8 = vmul.f32 %v6068_v49, %v715_v1  ;;  %v758_v17 = vmul.f32 %v6068_v49, %v721_v2  ;;  %v834_v42 = vsel %vm658_vm1, %v794_v29, 0.0 }
 0x15e   : > { %v688_v12 = vpop.xlane.xlu1 %687  ;;  %868 = vadd.xlane.f32.xlu1 %v867_v9 }
 0x15f   : > { %v6181_v14 = vsub.f32 %v6006_v55, %v756_v8  ;;  %v747_v19 = vmul.f32 %v6068_v49, %v688_v12  ;;  %v6190_v31 = vsub.f32 %v6017_v0, %v758_v17 }
 0x161   : > { %v804_v22 = vmul.f32 %v6181_v14, %v6181_v14  ;;  %v6194_v35 = vsub.f32 %v6022_v3, %v747_v19  ;;  %v806_v54 = vmul.f32 %v6190_v31, %v6190_v31 }
 0x163   : > { %v864_v32 = vsel %vm658_vm1, %v804_v22, 0.0  ;;  %v795_v59 = vmul.f32 %v6194_v35, %v6194_v35  ;;  %v870_v60 = vsel %vm658_vm1, %v806_v54, 0.0 }
 0x164   : > { %865 = vadd.xlane.f32.xlu2 %v864_v32  ;;  %v724_v33 = vpop.xlane.xlu0 %723 }
 0x165   : > { %v759_v40 = vmul.f32 %v6068_v49, %v724_v33  ;;  %v837_v9 = vsel %vm658_vm1, %v795_v59, 0.0 }
 0x166   : > { %v691_v45 = vpop.xlane.xlu1 %690  ;;  %835 = vadd.xlane.f32.xlu1 %v834_v42 }
 0x167   : > { %v6199_v50 = vsub.f32 %v6035_v13, %v759_v40  ;;  %v748_v30 = vmul.f32 %v6068_v49, %v691_v45 }
 0x169   : > { %v807_v58 = vmul.f32 %v6199_v50, %v6199_v50  ;;  %v6211_v8 = vsub.f32 %v6038_v15, %v748_v30 }
 0x16b   : > { %v873_v1 = vsel %vm658_vm1, %v807_v58, 0.0  ;;  %v796_v17 = vmul.f32 %v6211_v8, %v6211_v8 }
 0x16c   : > { %871 = vadd.xlane.f32.xlu2 %v870_v60  ;;  %874 = vadd.xlane.f32.xlu0 %v873_v1  ;;  %v727_v2 = vpop.xlane.xlu0 %726 }
 0x16d   : > { %v760_v12 = vmul.f32 %v6068_v49, %v727_v2  ;;  %v840_v32 = vsel %vm658_vm1, %v796_v17, 0.0  ;;  %v1194_v2 = vld [vmem:[%s8379_s4] sm:$0xff] }
 0x16e   : > { %838 = vadd.xlane.f32.xlu1 %v837_v9  ;;  %v694_v33 = vpop.xlane.xlu1 %693  ;;  %1286 = vmatpush.msra.mxu1 %v1194_v2 }
 0x16f   : > { %v6218_v22 = vsub.f32 %v6051_v26, %v760_v12  ;;  %v749_v42 = vmul.f32 %v6068_v49, %v694_v33  ;;  %5097 = vmatpush.msra.mxu2 %v1194_v2 }
 0x171   : > { %v808_v54 = vmul.f32 %v6218_v22, %v6218_v22  ;;  %v6232_v58 = vsub.f32 %v6054_v28, %v749_v42 }
 0x173   : > { %v876_v59 = vsel %vm658_vm1, %v808_v54, 0.0  ;;  %v797_v60 = vmul.f32 %v6232_v58, %v6232_v58 }
 0x174   : > { %v730_v19 = vpop.xlane.xlu0 %729 }
 0x175   : > { %v761_v29 = vmul.f32 %v6068_v49, %v730_v19  ;;  %v843_v1 = vsel %vm658_vm1, %v797_v60, 0.0 }
 0x176   : > { %841 = vadd.xlane.f32.xlu1 %v840_v32 }
 0x177   : > { %v6223_v40 = vsub.f32 %v6064_v39, %v761_v29 }
 0x179   : > { %v809_v45 = vmul.f32 %v6223_v40, %v6223_v40 }
 0x17b   : > { %v879_v30 = vsel %vm658_vm1, %v809_v45, 0.0 }
 0x17c   : > { %880 = vadd.xlane.f32.xlu2 %v879_v30 }
 0x17e   : > { %877 = vadd.xlane.f32.xlu1 %v876_v59 }
 0x186   : > { %844 = vadd.xlane.f32.xlu1 %v843_v1 }
 0x191   : > { %v812_v9 = vpop.xlane.xlu0 %811 }
 0x192   : > { %v882_v12 = vmul.f32 %v812_v9, %v6068_v49 }
 0x194   : > { %v906_v17 = vadd.f32 1e-05, %v882_v12 }
 0x196   : > { %5272 = vrsqrt.f32 %v906_v17  ;;  %vm936_vm4 = vweird.f32 %v906_v17 }
 0x199   : > { %v6242_v19 = vpop.xlane.xlu0 %847 }
 0x19c   : > { %v5273_v29 = vpop.eup %5272 }
 0x19d   : > { %v931_v32 = vmul.f32 %v5273_v29, %v906_v17  ;;  %vm937_vm3 = vweird.f32 %v5273_v29 }
 0x19e   : > { %vm938_vm5 = vmor %vm936_vm4, %vm937_vm3 }
 0x19f   : > { %v932_v33 = vmul.f32 %v5273_v29, %v931_v32  ;;  %v851_v42 = vpop.xlane.xlu2 %850 }
 0x1a0   : > { %v895_v45 = vmul.f32 %v851_v42, %v6068_v49 }
 0x1a1   : > { %v933_v54 = vmul.f32 0.5, %v932_v33  ;;  %v815_v30 = vpop.xlane.xlu0 %814 }
 0x1a2   : > { %v919_v59 = vadd.f32 1e-05, %v895_v45  ;;  %v883_v60 = vmul.f32 %v815_v30, %v6068_v49 }
 0x1a3   : > { %v934_v1 = vsub.f32 1.5, %v933_v54 }
 0x1a4   : > { %5274 = vrsqrt.f32 %v919_v59  ;;  %v907_v2 = vadd.f32 1e-05, %v883_v60  ;;  %vm1066_vm7 = vweird.f32 %v919_v59 }
 0x1a5   : > { %v935_v9 = vmul.f32 %v5273_v29, %v934_v1 }
 0x1a6   : > { %5276 = vrsqrt.f32 %v907_v2  ;;  %vm946_vm9 = vweird.f32 %v907_v2 }
 0x1a7   : > { %v854_v12 = vpop.xlane.xlu2 %853  ;;  %v939_v39 = vsel %vm938_vm5, %v5273_v29, %v935_v9 }
 0x1a8   : > { %v896_v32 = vmul.f32 %v854_v12, %v6068_v49  ;;  %v1170_v26 = vmul.f32 %v939_v39, %v6072_v56 }
 0x1a9   : > { %v818_v42 = vpop.xlane.xlu0 %817 }
 0x1aa   : > { %v5275_v33 = vpop.eup %5274  ;;  %v920_v0 = vadd.f32 1e-05, %v896_v32  ;;  %v884_v45 = vmul.f32 %v818_v42, %v6068_v49  ;;  %4870 = vmatmul.msk.f32.vlgmr.msra.gmra.mxu1 %vm658_vm1, %v1170_v26 }
 0x1ab   : > { %v1061_v54 = vmul.f32 %v5275_v33, %v919_v59  ;;  %vm1067_vm6 = vweird.f32 %v5275_v33 }
 0x1ac   : > { %v5277_v30 = vpop.eup %5276  ;;  %5278 = vrsqrt.f32 %v920_v0  ;;  %v908_v17 = vadd.f32 1e-05, %v884_v45  ;;  %vm1068_vm10 = vmor %vm1066_vm7, %vm1067_vm6  ;;  %vm1076_vm13 = vweird.f32 %v920_v0 }
 0x1ad   : > { %v1062_v60 = vmul.f32 %v5275_v33, %v1061_v54  ;;  %v941_v1 = vmul.f32 %v5277_v30, %v907_v2  ;;  %vm947_vm8 = vweird.f32 %v5277_v30 }
 0x1ae   : > { %5280 = vrsqrt.f32 %v908_v17  ;;  %vm948_vm11 = vmor %vm946_vm9, %vm947_vm8  ;;  %vm956_vm15 = vweird.f32 %v908_v17 }
 0x1af   : > { %v1063_v55 = vmul.f32 0.5, %v1062_v60  ;;  %v942_v29 = vmul.f32 %v5277_v30, %v941_v1  ;;  %v857_v9 = vpop.xlane.xlu2 %856 }
 0x1b0   : > { %v897_v12 = vmul.f32 %v857_v9, %v6068_v49 }
 0x1b1   : > { %v1064_v39 = vsub.f32 1.5, %v1063_v55  ;;  %v943_v56 = vmul.f32 0.5, %v942_v29  ;;  %v821_v6 = vpop.xlane.xlu0 %820 }
 0x1b2   : > { %v5279_v32 = vpop.eup %5278  ;;  %v6251_v42 = vadd.f32 1e-05, %v897_v12  ;;  %v885_v26 = vmul.f32 %v821_v6, %v6068_v49 }
 0x1b3   : > { %v944_v47 = vsub.f32 1.5, %v943_v56  ;;  %v1071_v45 = vmul.f32 %v5279_v32, %v920_v0  ;;  %v1065_v54 = vmul.f32 %v5275_v33, %v1064_v39  ;;  %vm1077_vm12 = vweird.f32 %v5279_v32 }
 0x1b4   : > { %v5281_v13 = vpop.eup %5280  ;;  %5282 = vrsqrt.f32 %v6251_v42  ;;  %v909_v60 = vadd.f32 1e-05, %v885_v26  ;;  %vm1078_vm0 = vmor %vm1076_vm13, %vm1077_vm12  ;;  %vm1086_vm4 = vweird.f32 %v6251_v42 }
 0x1b5   : > { %v1072_v55 = vmul.f32 %v5279_v32, %v1071_v45  ;;  %v951_v1 = vmul.f32 %v5281_v13, %v908_v17  ;;  %v1069_v29 = vsel %vm1068_vm10, %v5275_v33, %v1065_v54  ;;  %v945_v9 = vmul.f32 %v5277_v30, %v944_v47 }
 0x1b6   : > { %5284 = vrsqrt.f32 %v909_v60  ;;  %v1183_v59 = vmul.f32 %v1069_v29, %v6090_v11  ;;  %vm957_vm14 = vweird.f32 %v5281_v13  ;;  %vm966_vm7 = vweird.f32 %v909_v60 }
 0x1b7   : > { %v1073_v12 = vmul.f32 0.5, %v1072_v55  ;;  %v952_v6 = vmul.f32 %v5281_v13, %v951_v1  ;;  %v949_v56 = vsel %vm948_vm11, %v5277_v30, %v945_v9  ;;  %vm958_vm2 = vmor %vm956_vm15, %vm957_vm14 }
 0x1b8   : > { %4883 = vmatmul.msk.f32.vlgmr.msra.gmra.mxu2 %vm658_vm1, %v1183_v59  ;;  %v1171_v39 = vmul.f32 %v949_v56, %v6085_v5 }
 0x1b9   : > { %v1074_v2 = vsub.f32 1.5, %v1073_v12  ;;  %v953_v37 = vmul.f32 0.5, %v952_v6  ;;  %v824_v16 = vpop.xlane.xlu0 %823 }
 0x1ba   : > { %v5283_v26 = vpop.eup %5282  ;;  %v886_v33 = vmul.f32 %v824_v16, %v6068_v49  ;;  %4871 = vmatmul.msk.f32.gmra.mxu1 %vm658_vm1, %v1171_v39 }
 0x1bb   : > { %v954_v47 = vsub.f32 1.5, %v953_v37  ;;  %v1081_v11 = vmul.f32 %v5283_v26, %v6251_v42  ;;  %v1075_v45 = vmul.f32 %v5279_v32, %v1074_v2  ;;  %vm1087_vm3 = vweird.f32 %v5283_v26 }
 0x1bc   : > { %v5285_v30 = vpop.eup %5284  ;;  %v910_v54 = vadd.f32 1e-05, %v886_v33  ;;  %vm1088_vm6 = vmor %vm1086_vm4, %vm1087_vm3 }
 0x1bd   : > { %v1082_v5 = vmul.f32 %v5283_v26, %v1081_v11  ;;  %v961_v55 = vmul.f32 %v5285_v30, %v909_v60  ;;  %v1079_v1 = vsel %vm1078_vm0, %v5279_v32, %v1075_v45  ;;  %v955_v29 = vmul.f32 %v5281_v13, %v954_v47 }
 0x1be   : > { %5286 = vrsqrt.f32 %v910_v54  ;;  %v1184_v0 = vmul.f32 %v1079_v1, %v6104_v27  ;;  %vm967_vm5 = vweird.f32 %v5285_v30  ;;  %vm976_vm10 = vweird.f32 %v910_v54 }
 0x1bf   : > { %v1083_v16 = vmul.f32 0.5, %v1082_v5  ;;  %v962_v9 = vmul.f32 %v5285_v30, %v961_v55  ;;  %v860_v59 = vpop.xlane.xlu2 %859  ;;  %v959_v37 = vsel %vm958_vm2, %v5281_v13, %v955_v29  ;;  %vm968_vm8 = vmor %vm966_vm7, %vm967_vm5 }
 0x1c0   : > { %v898_v12 = vmul.f32 %v860_v59, %v6068_v49  ;;  %4884 = vmatmul.msk.f32.gmra.mxu2 %vm658_vm1, %v1184_v0  ;;  %v1172_v17 = vmul.f32 %v959_v37, %v6099_v20 }
 0x1c1   : > { %v1084_v6 = vsub.f32 1.5, %v1083_v16  ;;  %v963_v56 = vmul.f32 0.5, %v962_v9 }
 0x1c2   : > { %v922_v39 = vadd.f32 1e-05, %v898_v12  ;;  %4872 = vmatmul.msk.f32.gmra.mxu1 %vm658_vm1, %v1172_v17 }
 0x1c3   : > { %v964_v27 = vsub.f32 1.5, %v963_v56  ;;  %v1085_v32 = vmul.f32 %v5283_v26, %v1084_v6 }
 0x1c4   : > { %v5287_v2 = vpop.eup %5286  ;;  %5288 = vrsqrt.f32 %v922_v39  ;;  %vm1096_vm13 = vweird.f32 %v922_v39 }
 0x1c5   : > { %v971_v13 = vmul.f32 %v5287_v2, %v910_v54  ;;  %v1089_v33 = vsel %vm1088_vm6, %v5283_v26, %v1085_v32  ;;  %v965_v47 = vmul.f32 %v5285_v30, %v964_v27  ;;  %vm977_vm9 = vweird.f32 %v5287_v2 }
 0x1c6   : > { %v1185_v20 = vmul.f32 %v1089_v33, %v6118_v44  ;;  %vm978_vm11 = vmor %vm976_vm10, %vm977_vm9 }
 0x1c7   : > { %v972_v11 = vmul.f32 %v5287_v2, %v971_v13  ;;  %v827_v45 = vpop.xlane.xlu0 %826  ;;  %v969_v5 = vsel %vm968_vm8, %v5285_v30, %v965_v47 }
 0x1c8   : > { %v887_v55 = vmul.f32 %v827_v45, %v6068_v49  ;;  %4885 = vmatmul.msk.f32.gmra.mxu2 %vm658_vm1, %v1185_v20  ;;  %v1173_v42 = vmul.f32 %v969_v5, %v6113_v38 }
 0x1c9   : > { %v973_v1 = vmul.f32 0.5, %v972_v11  ;;  %v833_v29 = vpop.xlane.xlu1 %832 }
 0x1ca   : > { %v5289_v0 = vpop.eup %5288  ;;  %v911_v16 = vadd.f32 1e-05, %v887_v55  ;;  %v889_v60 = vmul.f32 %v833_v29, %v6068_v49  ;;  %4873 = vmatmul.msk.f32.gmra.mxu1 %vm658_vm1, %v1173_v42 }
 0x1cb   : > { %v974_v26 = vsub.f32 1.5, %v973_v1  ;;  %v1091_v44 = vmul.f32 %v5289_v0, %v922_v39  ;;  %vm1097_vm12 = vweird.f32 %v5289_v0 }
 0x1cc   : > { %5290 = vrsqrt.f32 %v911_v16  ;;  %v6273_v9 = vadd.f32 1e-05, %v889_v60  ;;  %vm1098_vm14 = vmor %vm1096_vm13, %vm1097_vm12  ;;  %vm986_vm0 = vweird.f32 %v911_v16 }
 0x1cd   : > { %v1092_v30 = vmul.f32 %v5289_v0, %v1091_v44  ;;  %v975_v59 = vmul.f32 %v5287_v2, %v974_v26 }
 0x1ce   : > { %5292 = vrsqrt.f32 %v6273_v9 }
 0x1cf   : > { %v1093_v38 = vmul.f32 0.5, %v1092_v30  ;;  %v863_v37 = vpop.xlane.xlu2 %862  ;;  %v830_v12 = vpop.xlane.xlu0 %829  ;;  %v979_v17 = vsel %vm978_vm11, %v5287_v2, %v975_v59  ;;  %vm1006_vm11 = vweird.f32 %v6273_v9 }
 0x1d0   : > { %v899_v6 = vmul.f32 %v863_v37, %v6068_v49  ;;  %v888_v56 = vmul.f32 %v830_v12, %v6068_v49  ;;  %v1174_v27 = vmul.f32 %v979_v17, %v6128_v57 }
 0x1d1   : > { %v1094_v32 = vsub.f32 1.5, %v1093_v38  ;;  %v869_v13 = vpop.xlane.xlu1 %868 }
 0x1d2   : > { %v5291_v33 = vpop.eup %5290  ;;  %v6279_v54 = vadd.f32 1e-05, %v899_v6  ;;  %v6281_v47 = vadd.f32 1e-05, %v888_v56  ;;  %v901_v20 = vmul.f32 %v869_v13, %v6068_v49  ;;  %4874 = vmatmul.msk.f32.gmra.mxu1 %vm658_vm1, %v1174_v27 }
 0x1d3   : > { %v981_v2 = vmul.f32 %v5291_v33, %v911_v16  ;;  %v1095_v11 = vmul.f32 %v5289_v0, %v1094_v32  ;;  %vm987_vm15 = vweird.f32 %v5291_v33 }
 0x1d4   : > { %v6285_v45 = vpop.eup %5292  ;;  %5294 = vrsqrt.f32 %v6279_v54  ;;  %v6288_v57 = vadd.f32 1e-05, %v901_v20  ;;  %vm988_vm2 = vmor %vm986_vm0, %vm987_vm15  ;;  %vm1106_vm3 = vweird.f32 %v6279_v54  ;;  %vm996_vm5 = vweird.f32 %v6281_v47 }
 0x1d5   : > { %v982_v5 = vmul.f32 %v5291_v33, %v981_v2  ;;  %5296 = vrsqrt.f32 %v6281_v47  ;;  %v1099_v55 = vsel %vm1098_vm14, %v5289_v0, %v1095_v11  ;;  %v1001_v29 = vmul.f32 %v6285_v45, %v6273_v9 }
 0x1d6   : > { %v1186_v42 = vmul.f32 %v1099_v55, %v6135_v4  ;;  %5298 = vrsqrt.f32 %v6288_v57  ;;  %vm1007_vm9 = vweird.f32 %v6285_v45  ;;  %v894_v9 = vmul.f32 %v6242_v19, %v6068_v49 }
 0x1d7   : > { %v983_v1 = vmul.f32 0.5, %v982_v5  ;;  %v866_v39 = vpop.xlane.xlu2 %865  ;;  %v1002_v38 = vmul.f32 %v6285_v45, %v1001_v29  ;;  %vm6354_vm13 = vmor %vm1006_vm11, %vm1007_vm9 }
 0x1d8   : > { %v900_v60 = vmul.f32 %v866_v39, %v6068_v49  ;;  %4886 = vmatmul.msk.f32.gmra.mxu2 %vm658_vm1, %v1186_v42 }
 0x1d9   : > { %v984_v26 = vsub.f32 1.5, %v983_v1  ;;  %v836_v44 = vpop.xlane.xlu1 %835  ;;  %v1003_v20 = vmul.f32 0.5, %v1002_v38 }
 0x1da   : > { %v5295_v30 = vpop.eup %5294  ;;  %v6297_v59 = vadd.f32 1e-05, %v900_v60  ;;  %v890_v0 = vmul.f32 %v836_v44, %v6068_v49 }
 0x1db   : > { %v5297_v4 = vpop.eup %5296  ;;  %v1101_v37 = vmul.f32 %v5295_v30, %v6279_v54  ;;  %v985_v12 = vmul.f32 %v5291_v33, %v984_v26  ;;  %vm1107_vm4 = vweird.f32 %v5295_v30 }
 0x1dc   : > { %v991_v17 = vmul.f32 %v5297_v4, %v6281_v47  ;;  %5300 = vrsqrt.f32 %v6297_v59  ;;  %v6304_v6 = vadd.f32 1e-05, %v890_v0  ;;  %v6306_v56 = vpop.eup %5298  ;;  %vm997_vm6 = vweird.f32 %v5297_v4  ;;  %vm1108_vm7 = vmor %vm1106_vm3, %vm1107_vm4 }
 0x1dd   : > { %v1102_v27 = vmul.f32 %v5295_v30, %v1101_v37  ;;  %v989_v32 = vsel %vm988_vm2, %v5291_v33, %v985_v12  ;;  %v1121_v42 = vmul.f32 %v6306_v56, %v6288_v57  ;;  %vm998_vm8 = vmor %vm996_vm5, %vm997_vm6  ;;  %vm1116_vm12 = vweird.f32 %v6297_v59 }
 0x1de   : > { %v992_v13 = vmul.f32 %v5297_v4, %v991_v17  ;;  %5302 = vrsqrt.f32 %v6304_v6  ;;  %v1175_v16 = vmul.f32 %v989_v32, %v6143_v18  ;;  %v1004_v17 = vsub.f32 1.5, %v1003_v20 }
 0x1df   : > { %v1103_v2 = vmul.f32 0.5, %v1102_v27  ;;  %v872_v11 = vpop.xlane.xlu2 %871  ;;  %v875_v5 = vpop.xlane.xlu0 %874  ;;  %v1122_v27 = vmul.f32 %v6306_v56, %v1121_v42  ;;  %vm1127_vm15 = vweird.f32 %v6306_v56  ;;  %vm1126_vm2 = vweird.f32 %v6288_v57 }
 0x1e0   : > { %v993_v55 = vmul.f32 0.5, %v992_v13  ;;  %v902_v1 = vmul.f32 %v872_v11, %v6068_v49  ;;  %v903_v29 = vmul.f32 %v875_v5, %v6068_v49  ;;  %4875 = vmatmul.msk.f32.gmra.mxu1 %vm658_vm1, %v1175_v16  ;;  %vm1016_vm3 = vweird.f32 %v6304_v6  ;;  %vm1128_vm4 = vmor %vm1126_vm2, %vm1127_vm15 }
 0x1e1   : > { %v1104_v33 = vsub.f32 1.5, %v1103_v2  ;;  %v839_v39 = vpop.xlane.xlu1 %838 }
 0x1e2   : > { %v5301_v18 = vpop.eup %5300  ;;  %v994_v60 = vsub.f32 1.5, %v993_v55  ;;  %v6316_v26 = vadd.f32 1e-05, %v902_v1  ;;  %v6318_v44 = vadd.f32 1e-05, %v903_v29  ;;  %v891_v0 = vmul.f32 %v839_v39, %v6068_v49 }
 0x1e3   : > { %v1111_v38 = vmul.f32 %v5301_v18, %v6297_v59  ;;  %v1105_v37 = vmul.f32 %v5295_v30, %v1104_v33  ;;  %v1123_v1 = vmul.f32 0.5, %v1122_v27  ;;  %v1005_v33 = vmul.f32 %v6285_v45, %v1004_v17 }
 0x1e4   : > { %v6323_v12 = vpop.eup %5302  ;;  %5304 = vrsqrt.f32 %v6316_v26  ;;  %v6327_v32 = vadd.f32 1e-05, %v891_v0  ;;  %v995_v2 = vmul.f32 %v5297_v4, %v994_v60  ;;  %vm1117_vm10 = vweird.f32 %v5301_v18 }
 0x1e5   : > { %v1112_v13 = vmul.f32 %v5301_v18, %v1111_v38  ;;  %v1011_v16 = vmul.f32 %v6323_v12, %v6304_v6  ;;  %5306 = vrsqrt.f32 %v6318_v44  ;;  %v1109_v20 = vsel %vm1108_vm7, %v5295_v30, %v1105_v37  ;;  %vm1118_vm14 = vmor %vm1116_vm12, %vm1117_vm10 }
 0x1e6   : > { %5308 = vrsqrt.f32 %v6327_v32  ;;  %v999_v55 = vsel %vm998_vm8, %v5297_v4, %v995_v2  ;;  %v1187_v42 = vmul.f32 %v1109_v20, %v6161_v46  ;;  %v1124_v37 = vsub.f32 1.5, %v1123_v1 }
 0x1e7   : > { %v1113_v11 = vmul.f32 0.5, %v1112_v13  ;;  %v1012_v5 = vmul.f32 %v6323_v12, %v1011_v16  ;;  %v1176_v29 = vmul.f32 %v999_v55, %v6152_v23  ;;  %v1009_v59 = vsel %vm6354_vm13, %v6285_v45, %v1005_v33 }
 0x1e8   : > { %4887 = vmatmul.msk.f32.gmra.mxu2 %vm658_vm1, %v1187_v42  ;;  %v1125_v1 = vmul.f32 %v6306_v56, %v1124_v37  ;;  %vm1017_vm0 = vweird.f32 %v6323_v12  ;;  %vm1136_vm8 = vweird.f32 %v6316_v26  ;;  %vm1026_vm9 = vweird.f32 %v6327_v32 }
 0x1e9   : > { %v1114_v54 = vsub.f32 1.5, %v1113_v11  ;;  %v1013_v39 = vmul.f32 0.5, %v1012_v5  ;;  %v842_v47 = vpop.xlane.xlu1 %841  ;;  %4876 = vmatmul.msk.f32.gmra.mxu1 %vm658_vm1, %v1176_v29  ;;  %v1177_v5 = vmul.f32 %v1009_v59, %v6147_v21  ;;  %vm1018_vm5 = vmor %vm1016_vm3, %vm1017_vm0 }
 0x1ea   : > { %v6344_v30 = vpop.eup %5304  ;;  %v892_v46 = vmul.f32 %v842_v47, %v6068_v49  ;;  %v1129_v57 = vsel %vm1128_vm4, %v6306_v56, %v1125_v1 }
 0x1eb   : > { %v6349_v4 = vpop.eup %5306  ;;  %v1131_v23 = vmul.f32 %v6344_v30, %v6316_v26  ;;  %v1115_v0 = vmul.f32 %v5301_v18, %v1114_v54  ;;  %v1014_v27 = vsub.f32 1.5, %v1013_v39  ;;  %v1189_v37 = vmul.f32 %v1129_v57, %v6164_v48 }
 0x1ec   : > { %v6358_v38 = vpop.eup %5308  ;;  %v6362_v17 = vadd.f32 1e-05, %v892_v46  ;;  %v1141_v55 = vmul.f32 %v6349_v4, %v6318_v44  ;;  %vm1137_vm6 = vweird.f32 %v6344_v30  ;;  %vm1147_vm12 = vweird.f32 %v6349_v4 }
 0x1ed   : > { %v1132_v13 = vmul.f32 %v6344_v30, %v1131_v23  ;;  %v1021_v16 = vmul.f32 %v6358_v38, %v6327_v32  ;;  %v1119_v2 = vsel %vm1118_vm14, %v5301_v18, %v1115_v0  ;;  %v6380_v18 = vadd.f32 1e-05, %v894_v9  ;;  %vm1138_vm10 = vmor %vm1136_vm8, %vm1137_vm6 }
 0x1ee   : > { %5310 = vrsqrt.f32 %v6362_v17  ;;  %v1188_v19 = vmul.f32 %v1119_v2, %v6181_v14  ;;  %v1015_v33 = vmul.f32 %v6323_v12, %v1014_v27  ;;  %v1142_v46 = vmul.f32 %v6349_v4, %v1141_v55 }
 0x1ef   : > { %v1022_v20 = vmul.f32 %v6358_v38, %v1021_v16  ;;  %v881_v11 = vpop.xlane.xlu2 %880  ;;  %v1133_v45 = vmul.f32 0.5, %v1132_v13  ;;  %5312 = vrsqrt.f32 %v6380_v18  ;;  %vm1027_vm7 = vweird.f32 %v6358_v38 }
 0x1f0   : > { %v905_v42 = vmul.f32 %v881_v11, %v6068_v49  ;;  %4888 = vmatmul.msk.f32.gmra.mxu2 %vm658_vm1, %v1188_v19  ;;  %v1019_v0 = vsel %vm1018_vm5, %v6323_v12, %v1015_v33  ;;  %v1143_v59 = vmul.f32 0.5, %v1142_v46  ;;  %vm1028_vm11 = vmor %vm1026_vm9, %vm1027_vm7  ;;  %vm1146_vm14 = vweird.f32 %v6318_v44 }
 0x1f1   : > { %v1023_v29 = vmul.f32 0.5, %v1022_v20  ;;  %v878_v14 = vpop.xlane.xlu1 %877  ;;  %4877 = vmatmul.msk.f32.gmra.mxu1 %vm658_vm1, %v1177_v5  ;;  %v1134_v47 = vsub.f32 1.5, %v1133_v45  ;;  %v1178_v27 = vmul.f32 %v1019_v0, %v6176_v7  ;;  %vm1036_vm15 = vweird.f32 %v6362_v17  ;;  %vm1148_vm0 = vmor %vm1146_vm14, %vm1147_vm12 }
 0x1f2   : > { %v904_v21 = vmul.f32 %v878_v14, %v6068_v49  ;;  %v6389_v54 = vadd.f32 1e-05, %v905_v42  ;;  %v1144_v19 = vsub.f32 1.5, %v1143_v59  ;;  %vm1056_vm12 = vweird.f32 %v6380_v18 }
 0x1f3   : > { %v1024_v60 = vsub.f32 1.5, %v1023_v29  ;;  %v1135_v56 = vmul.f32 %v6344_v30, %v1134_v47 }
 0x1f4   : > { %v6393_v39 = vpop.eup %5310  ;;  %v6396_v23 = vadd.f32 1e-05, %v904_v21  ;;  %v1145_v14 = vmul.f32 %v6349_v4, %v1144_v19 }
 0x1f5   : > { %v1031_v6 = vmul.f32 %v6393_v39, %v6362_v17  ;;  %v1025_v12 = vmul.f32 %v6358_v38, %v1024_v60  ;;  %v6416_v2 = vpop.eup %5312  ;;  %v1139_v11 = vsel %vm1138_vm10, %v6344_v30, %v1135_v56  ;;  %vm1037_vm13 = vweird.f32 %v6393_v39 }
 0x1f6   : > { %5314 = vrsqrt.f32 %v6396_v23  ;;  %v1190_v1 = vmul.f32 %v1139_v11, %v6190_v31  ;;  %v1051_v30 = vmul.f32 %v6416_v2, %v6380_v18  ;;  %vm1038_vm2 = vmor %vm1036_vm15, %vm1037_vm13  ;;  %v1149_v47 = vsel %vm1148_vm0, %v6349_v4, %v1145_v14 }
 0x1f7   : > { %v1032_v9 = vmul.f32 %v6393_v39, %v1031_v6  ;;  %5316 = vrsqrt.f32 %v6389_v54  ;;  %v1029_v55 = vsel %vm1028_vm11, %v6358_v38, %v1025_v12  ;;  %v1191_v44 = vmul.f32 %v1149_v47, %v6199_v50 }
 0x1f8   : > { %4889 = vmatmul.msk.f32.gmra.mxu2 %vm658_vm1, %v1189_v37  ;;  %v1179_v29 = vmul.f32 %v1029_v55, %v6194_v35  ;;  %v1052_v46 = vmul.f32 %v6416_v2, %v1051_v30  ;;  %vm1156_vm4 = vweird.f32 %v6396_v23  ;;  %vm1057_vm10 = vweird.f32 %v6416_v2 }
 0x1f9   : > { %v1033_v13 = vmul.f32 0.5, %v1032_v9  ;;  %v845_v16 = vpop.xlane.xlu1 %844  ;;  %4878 = vmatmul.msk.f32.gmra.mxu1 %vm658_vm1, %v1178_v27  ;;  %vm1166_vm11 = vweird.f32 %v6389_v54  ;;  %vm1058_vm14 = vmor %vm1056_vm12, %vm1057_vm10  ;;  %vm1373_vm15 = vcmask 31744   ;;  %vm1362_vm0 = vcmp.lt.s32.totalorder %v1361_v41, 17 }
 0x1fa   : > { %v893_v48 = vmul.f32 %v845_v16, %v6068_v49  ;;  %v1053_v37 = vmul.f32 0.5, %v1052_v46  ;;  %v6863_v34 = vsel %vm1362_vm0, 0.0, %v5684_v63 }
 0x1fb   : > { %v1034_v45 = vsub.f32 1.5, %v1033_v13 }
 0x1fc   : > { %v5315_v7 = vpop.eup %5314  ;;  %v917_v20 = vadd.f32 1e-05, %v893_v48  ;;  %v1054_v56 = vsub.f32 1.5, %v1053_v37 }
 0x1fd   : > { %v6420_v5 = vpop.eup %5316  ;;  %v1151_v26 = vmul.f32 %v5315_v7, %v6396_v23  ;;  %v1035_v38 = vmul.f32 %v6393_v39, %v1034_v45  ;;  %vm1157_vm3 = vweird.f32 %v5315_v7 }
 0x1fe   : > { %5318 = vrsqrt.f32 %v917_v20  ;;  %v1161_v32 = vmul.f32 %v6420_v5, %v6389_v54  ;;  %vm1158_vm5 = vmor %vm1156_vm4, %vm1157_vm3  ;;  %vm1046_vm7 = vweird.f32 %v917_v20  ;;  %vm1167_vm9 = vweird.f32 %v6420_v5  ;;  %v6466_v54 = vld [vmem:[%s8380_s5] ss:$0 sm:$0xff] }
 0x1ff   : > { %v1152_v42 = vmul.f32 %v5315_v7, %v1151_v26  ;;  %v1039_v60 = vsel %vm1038_vm2, %v6393_v39, %v1035_v38  ;;  %v1055_v23 = vmul.f32 %v6416_v2, %v1054_v56  ;;  %vm1168_vm13 = vmor %vm1166_vm11, %vm1167_vm9  ;;  %vm1789_vm2 = vcmask 195584  }
 0x200   : > { %4890 = vmatmul.msk.f32.gmra.mxu2 %vm658_vm1, %v1190_v1  ;;  %v1162_v35 = vmul.f32 %v6420_v5, %v1161_v32  ;;  %v1180_v9 = vmul.f32 %v1039_v60, %v6211_v8 }
 0x201   : > { %v1153_v33 = vmul.f32 0.5, %v1152_v42  ;;  %4879 = vmatmul.msk.f32.gmra.mxu1 %vm658_vm1, %v1179_v29 }
 0x202   : > { %v1163_v0 = vmul.f32 0.5, %v1162_v35 }
 0x203   : > { %v1154_v21 = vsub.f32 1.5, %v1153_v33 }
 0x204   : > { %v5319_v31 = vpop.eup %5318  ;;  %v1164_v39 = vsub.f32 1.5, %v1163_v0 }
 0x205   : > { %v1041_v57 = vmul.f32 %v5319_v31, %v917_v20  ;;  %v1155_v17 = vmul.f32 %v5315_v7, %v1154_v21  ;;  %vm1047_vm6 = vweird.f32 %v5319_v31 }
 0x206   : > { %vm1048_vm8 = vmor %vm1046_vm7, %vm1047_vm6  ;;  %v1165_v12 = vmul.f32 %v6420_v5, %v1164_v39 }
 0x207   : > { %v1042_v6 = vmul.f32 %v5319_v31, %v1041_v57  ;;  %v1159_v27 = vsel %vm1158_vm5, %v5315_v7, %v1155_v17 }
 0x208   : > { %4891 = vmatmul.msk.f32.gmra.mxu2 %vm658_vm1, %v1191_v44  ;;  %v1192_v8 = vmul.f32 %v1159_v27, %v6218_v22  ;;  %v1169_v22 = vsel %vm1168_vm13, %v6420_v5, %v1165_v12 }
 0x209   : > { %v1043_v59 = vmul.f32 0.5, %v1042_v6  ;;  %4880 = vmatmul.msk.f32.gmra.mxu1 %vm658_vm1, %v1180_v9  ;;  %v1193_v48 = vmul.f32 %v1169_v22, %v6223_v40 }
 0x20b   : > { %v1044_v4 = vsub.f32 1.5, %v1043_v59 }
 0x20d   : > { %v1045_v50 = vmul.f32 %v5319_v31, %v1044_v4 }
 0x20f   : > { %v1049_v13 = vsel %vm1048_vm8, %v5319_v31, %v1045_v50 }
 0x210   : > { %v1181_v16 = vmul.f32 %v1049_v13, %v6232_v58  ;;  %4892 = vmatmul.msk.f32.gmra.mxu2 %vm658_vm1, %v1192_v8  ;;  %v1059_v58 = vsel %vm1058_vm14, %v6416_v2, %v1055_v23 }
 0x211   : > { %v1182_v7 = vmul.f32 %v1059_v58, %v6079_v62 }
 0x212   : > { %4881 = vmatmul.msk.f32.gmra.mxu1 %vm658_vm1, %v1181_v16 }
 0x218   : > { %4893 = vmatmul.msk.f32.gmra.mxu2 %vm658_vm1, %v1193_v48 }
 0x21a   : > { %4882 = vmatmul.msk.f32.gmra.mxu1 %vm658_vm1, %v1182_v7 }
 0x227   : > { %v1288_v18 = vpop.f32.mrf.mxu1 }
 0x228   : > { %v6469_v19 = vadd.f32 %v6466_v54, %v1288_v18 }
 0x22a   : > { %2406 = vrot.lane.b32.xlu0 %v6469_v19, %s5679_s26  ;;  %1367 = vrot.lane.b32.xlu2 %v6469_v19, %s5680_s23 }
 0x232   : > { %2412 = vrot.lane.b32.xlu2 %v6469_v19, %s5681_s30 }
 0x237   : > { %v1291_v62 = vpop.f32.mrf.mxu1 }
 0x238   : > { %v6478_v40 = vadd.f32 %v6466_v54, %v1291_v62 }
 0x23a   : > { %2408 = vrot.lane.b32.xlu0 %v6478_v40, %s5679_s26  ;;  %1369 = vrot.lane.b32.xlu1 %v6478_v40, %s5680_s23 }
 0x23b   : > { %v1327_v11 = vpop.f32.mrf.mxu2 }
 0x23c   : > { %v6492_v45 = vadd.f32 %v6466_v54, %v1327_v11 }
 0x23f   : > { %v1294_v2 = vpop.f32.mrf.mxu1 }
 0x240   : > { %v6485_v20 = vadd.f32 %v6466_v54, %v1294_v2 }
 0x242   : > { %2414 = vrot.lane.b32.xlu1 %v6478_v40, %s5681_s30  ;;  %1371 = vrot.lane.b32.xlu0 %v6485_v20, %s5680_s23  ;;  %v6499_v55 = vpack.i.bf16 %v6478_v40, %v6485_v20 }
 0x243   : > { %v1330_v42 = vpop.f32.mrf.mxu2 }
 0x244   : > { %v6508_v1 = vadd.f32 %v6466_v54, %v1330_v42 }
 0x247   : > { %v1297_v5 = vpop.f32.mrf.mxu1 }
 0x248   : > { %v6495_v26 = vadd.f32 %v6466_v54, %v1297_v5 }
 0x24a   : > { %5146 = vrot.lane.b32.xlu1 %v6499_v55, %s5682_s19  ;;  %1558 = vrot.lane.b32.xlu0 %v6492_v45, %s5680_s23 }
 0x24b   : > { %1415 = vrot.lane.b32.xlu2 %v6495_v26, %s5680_s23  ;;  %v1333_v14 = vpop.f32.mrf.mxu2 }
 0x24c   : > { %v6526_v30 = vadd.f32 %v6466_v54, %v1333_v14 }
 0x24e   : > { %8453 = vst [vmem:[#allocation32_spill] sm:$0xff] %v6526_v30 }
 0x24f   : > { %v1300_v32 = vpop.f32.mrf.mxu1 }
 0x250   : > { %v6517_v29 = vadd.f32 %v6466_v54, %v1300_v32 }
 0x252   : > { %2416 = vrot.lane.b32.xlu1 %v6485_v20, %s5681_s30  ;;  %2614 = vrot.lane.b32.xlu0 %v6492_v45, %s5681_s30 }
 0x253   : > { %1560 = vrot.lane.b32.xlu2 %v6508_v1, %s5680_s23 }
 0x25a   : > { %2410 = vrot.lane.b32.xlu1 %v6485_v20, %s5679_s26  ;;  %2610 = vrot.lane.b32.xlu0 %v6508_v1, %s5679_s26 }
 0x25b   : > { %2458 = vrot.lane.b32.xlu2 %v6517_v29, %s5679_s26  ;;  %v1336_v21 = vpop.f32.mrf.mxu2 }
 0x25c   : > { %v6569_v60 = vadd.f32 %v6466_v54, %v1336_v21 }
 0x25d   : > { %v1303_v33 = vpop.f32.mrf.mxu1 }
 0x25e   : > { %v6541_v38 = vadd.f32 %v6466_v54, %v1303_v33  ;;  %8454 = vst [vmem:[#allocation33_spill] sm:$0xff] %v6569_v60 }
 0x260   : > { %v6545_v31 = vpack.i.bf16 %v6541_v38, %v6469_v19 }
 0x262   : > { %2608 = vrot.lane.b32.xlu1 %v6492_v45, %s5679_s26  ;;  %2464 = vrot.lane.b32.xlu0 %v6517_v29, %s5681_s30 }
 0x263   : > { %1603 = vrot.lane.b32.xlu2 %v6526_v30, %s5680_s23 }
 0x266   : > { %v1306_v35 = vpop.f32.mrf.mxu1 }
 0x267   : > { %v6560_v47 = vadd.f32 %v6466_v54, %v1306_v35 }
 0x26a   : > { %2462 = vrot.lane.b32.xlu1 %v6495_v26, %s5681_s30  ;;  %2656 = vrot.lane.b32.xlu0 %v6526_v30, %s5679_s26 }
 0x26b   : > { %2662 = vrot.lane.b32.xlu2 %v6526_v30, %s5681_s30  ;;  %v1339_v57 = vpop.f32.mrf.mxu2 }
 0x26c   : > { %v6572_v6 = vadd.f32 %v6466_v54, %v1339_v57 }
 0x26e   : > { %v1309_v46 = vpop.f32.mrf.mxu1 }
 0x26f   : > { %v6581_v9 = vadd.f32 %v6466_v54, %v1309_v46 }
 0x271   : > { %v5155_v50 = vpack.i.bf16 %v6495_v26, %v6581_v9 }
 0x272   : > { %2456 = vrot.lane.b32.xlu1 %v6495_v26, %s5679_s26  ;;  %1419 = vrot.lane.b32.xlu0 %v6541_v38, %s5680_s23 }
 0x273   : > { %5151 = vrot.lane.b32.xlu2 %v6545_v31, %s5682_s19  ;;  %v1342_v0 = vpop.f32.mrf.mxu2 }
 0x274   : > { %v6624_v62 = vadd.f32 %v6466_v54, %v1342_v0 }
 0x276   : > { %v1312_v44 = vpop.f32.mrf.mxu1 }
 0x277   : > { %v6584_v17 = vadd.f32 %v6466_v54, %v1312_v44 }
 0x279   : > { %v5160_v56 = vpack.i.bf16 %v6517_v29, %v6584_v17 }
 0x27a   : > { %2616 = vrot.lane.b32.xlu1 %v6508_v1, %s5681_s30  ;;  %2460 = vrot.lane.b32.xlu0 %v6541_v38, %s5679_s26 }
 0x27b   : > { %2466 = vrot.lane.b32.xlu2 %v6541_v38, %s5681_s30  ;;  %v1345_v4 = vpop.f32.mrf.mxu2 }
 0x27c   : > { %v6627_v2 = vadd.f32 %v6466_v54, %v1345_v4 }
 0x27e   : > { %v1315_v59 = vpop.f32.mrf.mxu1  ;;  %8456 = vst [vmem:[#allocation35_spill] sm:$0xff] %v6627_v2  ;;  %v5165_v33 = vpack.i.bf16 %v6526_v30, %v6627_v2 }
 0x27f   : > { %v6593_v39 = vadd.f32 %v6466_v54, %v1315_v59 }
 0x281   : > { %v5170_v13 = vpack.i.bf16 %v6593_v39, %v6492_v45 }
 0x282   : > { %1417 = vrot.lane.b32.xlu1 %v6517_v29, %s5680_s23  ;;  %2512 = vrot.lane.b32.xlu0 %v6560_v47, %s5681_s30 }
 0x283   : > { %2506 = vrot.lane.b32.xlu2 %v6560_v47, %s5679_s26  ;;  %v1348_v8 = vpop.f32.mrf.mxu2 }
 0x284   : > { %v1368_v37 = vpop.permute.xlu2 %1367  ;;  %v6613_v23 = vadd.f32 %v6466_v54, %v1348_v8 }
 0x286   : > { %8455 = vst [vmem:[#allocation34_spill] sm:$0xff] %v6613_v23  ;;  %v1318_v18 = vpop.f32.mrf.mxu1  ;;  %v5175_v44 = vpack.i.bf16 %v6569_v60, %v6613_v23 }
 0x287   : > { %v6630_v11 = vadd.f32 %v6466_v54, %v1318_v18 }
 0x289   : > { %v5180_v8 = vpack.i.bf16 %v6630_v11, %v6508_v1 }
 0x28a   : > { %1605 = vrot.lane.b32.xlu1 %v6569_v60, %s5680_s23  ;;  %1607 = vrot.lane.b32.xlu0 %v6572_v6, %s5680_s23 }
 0x28b   : > { %2666 = vrot.lane.b32.xlu2 %v6572_v6, %s5681_s30  ;;  %v1351_v22 = vpop.f32.mrf.mxu2 }
 0x28c   : > { %v2413_v27 = vpop.permute.xlu2 %2412 }
 0x292   : > { %2664 = vrot.lane.b32.xlu1 %v6569_v60, %s5681_s30  ;;  %1464 = vrot.lane.b32.xlu0 %v6581_v9, %s5680_s23 }
 0x293   : > { %1466 = vrot.lane.b32.xlu2 %v6584_v17, %s5680_s23  ;;  %v1354_v14 = vpop.f32.mrf.mxu2 }
 0x294   : > { %v6644_v35 = vadd.f32 %v6466_v54, %v1354_v14 }
 0x29a   : > { %2508 = vrot.lane.b32.xlu0 %v6581_v9, %s5679_s26  ;;  %1462 = vrot.lane.b32.xlu1 %v6560_v47, %s5680_s23 }
 0x29b   : > { %1509 = vrot.lane.b32.xlu2 %v6593_v39, %s5680_s23 }
 0x29c   : > { %v2407_v16 = vpop.permute.xlu0 %2406 }
 0x2a2   : > { %5161 = vrot.lane.b32.xlu0 %v5160_v56, %s5682_s19  ;;  %5156 = vrot.lane.b32.xlu1 %v5155_v50, %s5682_s19  ;;  %v1321_v56 = vpop.f32.mrf.mxu1 }
 0x2a3   : > { %5171 = vrot.lane.b32.xlu2 %v5170_v13, %s5682_s19  ;;  %v6694_v13 = vadd.f32 %v6466_v54, %v1351_v22  ;;  %v1357_v22 = vpop.f32.mrf.mxu2 }
 0x2a5   : > { %v6610_v12 = vpop.permute.xlu2 %1415 }
 0x2aa   : > { %2510 = vrot.lane.b32.xlu0 %v6584_v17, %s5679_s26  ;;  %2514 = vrot.lane.b32.xlu1 %v6581_v9, %s5681_s30 }
 0x2ab   : > { %1654 = vrot.lane.b32.xlu2 %v6613_v23, %s5680_s23 }
 0x2ac   : > { %v1370_v58 = vpop.permute.xlu1 %1369  ;;  %v2409_v48 = vpop.permute.xlu0 %2408 }
 0x2ad   : > { %v6621_v7 = vpop.permute.xlu2 %1560 }
 0x2b2   : > { %1652 = vrot.lane.b32.xlu0 %v6627_v2, %s5680_s23  ;;  %1650 = vrot.lane.b32.xlu1 %v6624_v62, %s5680_s23 }
 0x2b3   : > { %2558 = vrot.lane.b32.xlu2 %v6630_v11, %s5679_s26 }
 0x2b4   : > { %v2415_v5 = vpop.permute.xlu1 %2414  ;;  %v1372_v42 = vpop.permute.xlu0 %1371 }
 0x2b5   : > { %v6638_v32 = vpop.permute.xlu2 %2458  ;;  %4894 = vmatpush.xpose.msk.msrb.mxu2 %vm1373_vm15, %v1372_v42 }
 0x2b9   : > { %4895 = vmatpush.xpose.msk.msrb.mxu2 %vm1373_vm15, %v1370_v58 }
 0x2ba   : > { %5166 = vrot.lane.b32.xlu0 %v5165_v33, %s5682_s19  ;;  %2516 = vrot.lane.b32.xlu1 %v6584_v17, %s5681_s30 }
 0x2bb   : > { %1699 = vrot.lane.b32.xlu2 %v6644_v35, %s5680_s23 }
 0x2bc   : > { %v6652_v21 = vpop.permute.xlu1 %5146  ;;  %v6654_v46 = vpop.permute.xlu0 %1558 }
 0x2bd   : > { %v6656_v57 = vpop.permute.xlu2 %1603  ;;  %4896 = vmatpush.xpose.msk.msrb.mxu2 %vm1373_vm15, %v1368_v37 }
 0x2c0   : > { %4897 = vmatmul.msk.f32.vlgmr.msrb.gmra.mxu2 %vm1373_vm15, %v6469_v19 }
 0x2c2   : > { %2562 = vrot.lane.b32.xlu0 %v6593_v39, %s5681_s30  ;;  %5176 = vrot.lane.b32.xlu1 %v5175_v44, %s5682_s19 }
 0x2c3   : > { %2714 = vrot.lane.b32.xlu2 %v6627_v2, %s5681_s30 }
 0x2c4   : > { %v2417_v0 = vpop.permute.xlu1 %2416  ;;  %v2615_v59 = vpop.permute.xlu0 %2614 }
 0x2c5   : > { %v6668_v4 = vpop.permute.xlu2 %2662  ;;  %4966 = vmatpush.xpose.msk.msrb.mxu1 %vm1373_vm15, %v2417_v0  ;;  %v6738_v0 = vpack.i.bf16 %v6694_v13, %v6644_v35 }
 0x2c7   : > { %8459 = vst [vmem:[#allocation38_spill] sm:$0xff] %v6738_v0 }
 0x2c8   : > { %4898 = vmatmul.msk.f32.gmra.mxu2 %vm1373_vm15, %v6478_v40  ;;  %v6686_v40 = vadd.f32 %v6466_v54, %v1321_v56 }
 0x2c9   : > { %4967 = vmatpush.xpose.msk.msrb.mxu1 %vm1373_vm15, %v2415_v5 }
 0x2ca   : > { %2556 = vrot.lane.b32.xlu0 %v6593_v39, %s5679_s26  ;;  %1511 = vrot.lane.b32.xlu1 %v6630_v11, %s5680_s23 }
 0x2cb   : > { %2706 = vrot.lane.b32.xlu2 %v6624_v62, %s5679_s26 }
 0x2cc   : > { %v2411_v19 = vpop.permute.xlu1 %2410  ;;  %v6680_v37 = vpop.permute.xlu0 %2610 }
 0x2cd   : > { %v6682_v50 = vpop.permute.xlu2 %5151  ;;  %4968 = vmatpush.xpose.msk.msrb.mxu1 %vm1373_vm15, %v2413_v27 }
 0x2d0   : > { %4899 = vmatmul.msk.f32.gmra.mxu2 %vm1373_vm15, %v6485_v20  ;;  %4969 = vmatmul.msk.f32.vlgmr.msrb.gmra.mxu1 %vm1373_vm15, %v2407_v16  ;;  %v6707_v16 = vpack.i.bf16 %v6686_v40, %v6560_v47 }
 0x2d2   : > { %1513 = vrot.lane.b32.xlu0 %v6686_v40, %s5680_s23  ;;  %5181 = vrot.lane.b32.xlu1 %v5180_v8, %s5682_s19 }
 0x2d3   : > { %2762 = vrot.lane.b32.xlu2 %v6694_v13, %s5681_s30 }
 0x2d4   : > { %v6701_v27 = vpop.permute.xlu1 %2608  ;;  %v2465_v58 = vpop.permute.xlu0 %2464 }
 0x2d5   : > { %v2467_v20 = vpop.permute.xlu2 %2466 }
 0x2d6   : > { %4972 = vmatpush.xpose.msk.msrb.mxu0 %vm1373_vm15, %v2467_v20 }
 0x2d8   : > { %4970 = vmatmul.msk.f32.gmra.mxu1 %vm1373_vm15, %v2409_v48  ;;  %v6717_v48 = vadd.f32 %v6466_v54, %v1357_v22 }
 0x2da   : > { %4973 = vmatpush.xpose.msk.msrb.mxu0 %vm1373_vm15, %v2465_v58  ;;  %5186 = vrot.lane.b32.xlu0 %v6707_v16, %s5682_s19  ;;  %v6725_v14 = vpack.i.bf16 %v6717_v48, %v6624_v62  ;;  %v1324_v58 = vpop.f32.mrf.mxu1 }
 0x2db   : > { %2564 = vrot.lane.b32.xlu1 %v6630_v11, %s5681_s30  ;;  %5201 = vrot.lane.b32.xlu2 %v6545_v31, %s5683_s28  ;;  %v6751_v20 = vadd.f32 %v6466_v54, %v1324_v58 }
 0x2dc   : > { %v2463_v18 = vpop.permute.xlu1 %2462  ;;  %v2657_v5 = vpop.permute.xlu0 %2656  ;;  %8458 = vst [vmem:[#allocation37_spill] sm:$0xff] %v6725_v14 }
 0x2dd   : > { %v6719_v42 = vpop.permute.xlu2 %2506 }
 0x2de   : > { %8457 = vst [vmem:[#allocation36_spill] sm:$0xff] %v6719_v42  ;;  %4974 = vmatpush.xpose.msk.msrb.mxu0 %vm1373_vm15, %v2463_v18 }
 0x2e0   : > { %4971 = vmatmul.msk.f32.gmra.mxu1 %vm1373_vm15, %v2411_v19 }
 0x2e2   : > { %2566 = vrot.lane.b32.xlu0 %v6686_v40, %s5681_s30 }
 0x2e3   : > { %5211 = vrot.lane.b32.xlu2 %v6725_v14, %s5682_s19  ;;  %1697 = vrot.lane.b32.xlu1 %v6694_v13, %s5680_s23 }
 0x2e4   : > { %v2457_v31 = vpop.permute.xlu1 %2456  ;;  %v1420_v33 = vpop.permute.xlu0 %1419 }
 0x2e5   : > { %v2667_v44 = vpop.permute.xlu2 %2666  ;;  %4900 = vmatpush.xpose.msk.msrb.mxu3 %vm1373_vm15, %v1420_v33  ;;  %4975 = vmatmul.msk.f32.vlgmr.msrb.gmra.mxu0 %vm1373_vm15, %v2457_v31 }
 0x2e6   : > { %4996 = vmatpush.xpose.msk.msra.mxu0 %vm1373_vm15, %v2667_v44 }
 0x2ea   : > { %2560 = vrot.lane.b32.xlu0 %v6686_v40, %s5679_s26 }
 0x2eb   : > { %2766 = vrot.lane.b32.xlu2 %v6717_v48, %s5681_s30  ;;  %5191 = vrot.lane.b32.xlu1 %v6738_v0, %s5682_s19 }
 0x2ec   : > { %v2617_v19 = vpop.permute.xlu1 %2616  ;;  %v2461_v56 = vpop.permute.xlu0 %2460 }
 0x2ed   : > { %v1467_v8 = vpop.permute.xlu2 %1466  ;;  %4976 = vmatmul.msk.f32.gmra.mxu0 %vm1373_vm15, %v6638_v32  ;;  %4990 = vmatpush.xpose.msk.msra.mxu1 %vm1373_vm15, %v2617_v19 }
 0x2ee   : > { %4906 = vmatpush.xpose.msk.msra.mxu2 %vm1373_vm15, %v1467_v8 }
 0x2f1   : > { %4991 = vmatpush.xpose.msk.msra.mxu1 %vm1373_vm15, %v2615_v59 }
 0x2f2   : > { %2658 = vrot.lane.b32.xlu0 %v6569_v60, %s5679_s26 }
 0x2f3   : > { %1556 = vrot.lane.b32.xlu1 %v6751_v20, %s5680_s23 }
 0x2f4   : > { %v1418_v22 = vpop.permute.xlu1 %1417  ;;  %v6758_v18 = vpop.permute.xlu0 %2512 }
 0x2f5   : > { %8460 = vst [vmem:[#allocation39_spill] sm:$0xff] %v6758_v18  ;;  %v6760_v32 = vpop.permute.xlu2 %1509  ;;  %4901 = vmatpush.xpose.msk.msrb.mxu3 %vm1373_vm15, %v1418_v22  ;;  %4977 = vmatmul.msk.f32.gmra.mxu0 %vm1373_vm15, %v2461_v56 }
 0x2f9   : > { %4902 = vmatpush.xpose.msk.msrb.mxu3 %vm1373_vm15, %v6610_v12 }
 0x2fa   : > { %2660 = vrot.lane.b32.xlu0 %v6572_v6, %s5679_s26 }
 0x2fb   : > { %2716 = vrot.lane.b32.xlu1 %v6613_v23, %s5681_s30 }
 0x2fc   : > { %v6770_v54 = vpop.permute.xlu1 %1605  ;;  %4903 = vmatmul.msk.f32.vlgmr.msrb.gmra.mxu3 %vm1373_vm15, %v6495_v26  ;;  %v6774_v59 = vpop.permute.xlu0 %1607 }
 0x2fd   : > { %v6776_v31 = vpop.permute.xlu2 %5171 }
 0x302   : > { %2710 = vrot.lane.b32.xlu0 %v6613_v23, %s5679_s26 }
 0x303   : > { %2712 = vrot.lane.b32.xlu1 %v6624_v62, %s5681_s30 }
 0x304   : > { %v2665_v12 = vpop.permute.xlu1 %2664  ;;  %4904 = vmatmul.msk.f32.gmra.mxu3 %vm1373_vm15, %v6517_v29  ;;  %v1465_v33 = vpop.permute.xlu0 %1464 }
 0x305   : > { %v6784_v44 = vpop.permute.xlu2 %1654  ;;  %4907 = vmatpush.xpose.msk.msra.mxu2 %vm1373_vm15, %v1465_v33  ;;  %4997 = vmatpush.xpose.msk.msra.mxu0 %vm1373_vm15, %v2665_v12 }
 0x309   : > { %4998 = vmatpush.xpose.msk.msra.mxu0 %vm1373_vm15, %v6668_v4  ;;  %v6808_v4 = vpack.i.bf16 %v6572_v6, %v6751_v20 }
 0x30a   : > { %2756 = vrot.lane.b32.xlu0 %v6694_v13, %s5679_s26 }
 0x30b   : > { %2708 = vrot.lane.b32.xlu1 %v6627_v2, %s5679_s26 }
 0x30c   : > { %v1463_v19 = vpop.permute.xlu1 %1462  ;;  %4905 = vmatmul.msk.f32.gmra.mxu3 %vm1373_vm15, %v6541_v38  ;;  %4999 = vmatmul.msk.f32.vlgmr.msra.gmra.mxu0 %vm1373_vm15, %v2657_v5  ;;  %v6797_v56 = vpop.permute.xlu0 %2508 }
 0x30d   : > { %8461 = vst [vmem:[#allocation40_spill] sm:$0xff] %v6797_v56  ;;  %v6799_v8 = vpop.permute.xlu2 %2558  ;;  %4908 = vmatpush.xpose.msk.msra.mxu2 %vm1373_vm15, %v1463_v19 }
 0x30e   : > { %8462 = vst [vmem:[#allocation41_spill] sm:$0xff] %v6799_v8 }
 0x310   : > { %4909 = vmatmul.msk.f32.vlgmr.msra.gmra.mxu2 %vm1373_vm15, %v6560_v47 }
 0x311   : > { %4918 = vmatpush.xpose.msk.msrb.mxu2 %vm1373_vm15, %v6621_v7 }
 0x312   : > { %5206 = vrot.lane.b32.xlu0 %v6808_v4, %s5682_s19 }
 0x313   : > { %2764 = vrot.lane.b32.xlu1 %v6644_v35, %s5681_s30 }
 0x314   : > { %v6816_v38 = vpop.permute.xlu1 %5156  ;;  %v6818_v5 = vpop.permute.xlu0 %5161 }
 0x315   : > { %4919 = vmatpush.xpose.msk.msrb.mxu2 %vm1373_vm15, %v6654_v46  ;;  %v6820_v7 = vpop.permute.xlu2 %1699 }
 0x318   : > { %4910 = vmatmul.msk.f32.gmra.mxu2 %vm1373_vm15, %v6581_v9 }
 0x31a   : > { %2606 = vrot.lane.b32.xlu0 %v6751_v20, %s5679_s26 }
 0x31b   : > { %5196 = vrot.lane.b32.xlu1 %v6499_v55, %s5683_s28 }
 0x31c   : > { %v6828_v47 = vpop.permute.xlu1 %2514  ;;  %v6830_v46 = vpop.permute.xlu0 %2510 }
 0x31d   : > { %8463 = vst [vmem:[#allocation42_spill] sm:$0xff] %v6828_v47  ;;  %v6832_v58 = vpop.permute.xlu2 %2714 }
 0x31e   : > { %8464 = vst [vmem:[#allocation43_spill] sm:$0xff] %v6830_v46 }
 0x31f   : > { %8465 = vst [vmem:[#allocation44_spill] sm:$0xff] %v6832_v58 }
 0x320   : > { %4911 = vmatmul.msk.f32.gmra.mxu2 %vm1373_vm15, %v6584_v17 }
 0x322   : > { %1701 = vrot.lane.b32.xlu0 %v6717_v48, %s5680_s23  ;;  %s407_s23 = scalar_lea.vmem [#allocation2], %s4844_s18  ;;  %s5634_s18 = scalar_lea.hbm %s8387_s12, 16 }
 0x323   : > { %2612 = vrot.lane.b32.xlu1 %v6751_v20, %s5681_s30  ;;  %s4778_s30 = sshll.u32 %s407_s23, 4  ;;  %s4779_s30 = int_to_ptr.vmem [resolvable:$true] %s4778_s30 }
 0x324   : > { %v6840_v22 = vpop.permute.xlu1 %1650  ;;  %v6842_v12 = vpop.permute.xlu0 %1652 }
 0x325   : > { %v6844_v55 = vpop.permute.xlu2 %2706 }
 0x326   : > { %8466 = vst [vmem:[#allocation45_spill] sm:$0xff] %v6844_v55 }
 0x32c   : > { %v6846_v33 = vpop.permute.xlu1 %2516  ;;  %v6848_v19 = vpop.permute.xlu0 %5166 }
 0x32d   : > { %v6850_v28 = vpop.permute.xlu2 %2762 }
 0x32e   : > { %8467 = vst [vmem:[#allocation46_spill] sm:$0xff] %v6850_v28 }
 0x334   : > { %v6852_v3 = vpop.permute.xlu1 %5176  ;;  %v6854_v52 = vpop.permute.xlu0 %2562 }
 0x335   : > { %8468 = vst [vmem:[#allocation47_spill] sm:$0xff] %v6854_v52  ;;  %v6856_v15 = vpop.permute.xlu2 %5201 }
 0x336   : > { %v5204_v61 = vunpack.i.h.bf16 %v6856_v15 }
 0x338   : > { %3193 = vmatpush.msrb.mxu0 %v5204_v61 }
 0x33c   : > { %v1512_v51 = vpop.permute.xlu1 %1511  ;;  %v6859_v36 = vpop.permute.xlu0 %2556 }
 0x33d   : > { %8469 = vst [vmem:[#allocation48_spill] sm:$0xff] %v6859_v36 }
 0x343   : > { %v1403_v49 = vpop.f32.mrf.mxu2 }
 0x344   : > { %v1741_v25 = vmul.f32 0.5, %v1403_v49  ;;  %v6861_v43 = vpop.permute.xlu1 %5181  ;;  %v1514_v10 = vpop.permute.xlu0 %1513 }
 0x345   : > { %4912 = vmatpush.xpose.msk.msra.mxu3 %vm1373_vm15, %v1514_v10 }
 0x346   : > { %v6867_v53 = vadd.f32 %v1741_v25, %v6863_v34 }
 0x348   : > { %v1790_v41 = vsel %vm1789_vm2, %v6867_v53, -inf }
 0x349   : > { %4913 = vmatpush.xpose.msk.msra.mxu3 %vm1373_vm15, %v1512_v51 }
 0x34b   : > { %v1406_v61 = vpop.f32.mrf.mxu2 }
 0x34c   : > { %1791 = vmax.xlane.f32.xlu0 %v1790_v41  ;;  %v6872_v24 = vpop.permute.xlu0 %5186 }
 0x34d   : > { %v6874_v49 = vpop.permute.xlu1 %2564  ;;  %4914 = vmatpush.xpose.msk.msra.mxu3 %vm1373_vm15, %v6760_v32  ;;  %v2447_v63 = vpop.f32.mrf.mxu1 }
 0x34e   : > { %8470 = vst [vmem:[#allocation49_spill] sm:$0xff] %v6874_v49  ;;  %v2806_v10 = vmul.f32 0.5, %v2447_v63 }
 0x350   : > { %4915 = vmatmul.msk.f32.vlgmr.msra.gmra.mxu3 %vm1373_vm15, %v6593_v39  ;;  %v6883_v51 = vadd.f32 %v2806_v10, %v6863_v34 }
 0x351   : > { %4924 = vmatpush.xpose.msk.msrb.mxu3 %vm1373_vm15, %v6774_v59 }
 0x352   : > { %v2854_v25 = vsel %vm1789_vm2, %v6883_v51, -inf }
 0x353   : > { %2855 = vmax.xlane.f32.xlu1 %v2854_v25  ;;  %v1409_v41 = vpop.f32.mrf.mxu2  ;;  %v1742_v25 = vmul.f32 0.5, %v1406_v61 }
 0x354   : > { %v1743_v32 = vmul.f32 0.5, %v1409_v41  ;;  %v6889_v14 = vpop.permute.xlu0 %2566 }
 0x355   : > { %4925 = vmatpush.xpose.msk.msrb.mxu3 %vm1373_vm15, %v6770_v54  ;;  %8471 = vst [vmem:[#allocation50_spill] sm:$0xff] %v6889_v14  ;;  %v6891_v63 = vpop.permute.xlu1 %1697  ;;  %v2450_v59 = vpop.f32.mrf.mxu1  ;;  %v6912_v28 = vadd.f32 %v1742_v25, %v6863_v34 }
 0x356   : > { %v2807_v0 = vmul.f32 0.5, %v2450_v59  ;;  %v6896_v10 = vadd.f32 %v1743_v32, %v6863_v34 }
 0x358   : > { %4916 = vmatmul.msk.f32.gmra.mxu3 %vm1373_vm15, %v6630_v11  ;;  %v6901_v54 = vadd.f32 %v2807_v0, %v6863_v34  ;;  %v1796_v8 = vsel %vm1789_vm2, %v6896_v10, -inf }
 0x359   : > { %4926 = vmatpush.xpose.msk.msrb.mxu3 %vm1373_vm15, %v6656_v57 }
 0x35a   : > { %v2857_v41 = vsel %vm1789_vm2, %v6901_v54, -inf }
 0x35b   : > { %2858 = vmax.xlane.f32.xlu2 %v2857_v41  ;;  %1797 = vmax.xlane.f32.xlu1 %v1796_v8  ;;  %v1793_v8 = vsel %vm1789_vm2, %v6912_v28, -inf }
 0x35c   : > { %v6907_v59 = vpop.permute.xlu0 %2560 }
 0x35d   : > { %8472 = vst [vmem:[#allocation51_spill] sm:$0xff] %v6907_v59  ;;  %v6909_v57 = vpop.permute.xlu1 %5191  ;;  %v2453_v32 = vpop.f32.mrf.mxu1 }
 0x35e   : > { %v2808_v36 = vmul.f32 0.5, %v2453_v32 }
 0x360   : > { %4917 = vmatmul.msk.f32.gmra.mxu3 %vm1373_vm15, %v6686_v40  ;;  %v6917_v0 = vadd.f32 %v2808_v36, %v6863_v34 }
 0x362   : > { %v2497_v61 = vpop.f32.mrf.mxu0  ;;  %v2860_v41 = vsel %vm1789_vm2, %v6917_v0, -inf }
 0x363   : > { %v2809_v59 = vmul.f32 0.5, %v2497_v61  ;;  %2861 = vmax.xlane.f32.xlu0 %v2860_v41  ;;  %1794 = vmax.xlane.f32.xlu2 %v1793_v8  ;;  %v5148_v41 = vunpack.i.l.bf16 %v6652_v21  ;;  %v5149_v8 = vunpack.i.h.bf16 %v6652_v21 }
 0x364   : > { %v2659_v32 = vpop.permute.xlu0 %2658 }
 0x365   : > { %v1557_v55 = vpop.permute.xlu1 %1556  ;;  %5000 = vmatmul.msk.f32.gmra.mxu0 %vm1373_vm15, %v2659_v32  ;;  %v6925_v25 = vadd.f32 %v2809_v59, %v6863_v34 }
 0x366   : > { %4920 = vmatpush.xpose.msk.msrb.mxu2 %vm1373_vm15, %v1557_v55 }
 0x367   : > { %v2863_v36 = vsel %vm1789_vm2, %v6925_v25, -inf }
 0x368   : > { %2864 = vmax.xlane.f32.xlu1 %v2863_v36  ;;  %4927 = vmatmul.msk.f32.vlgmr.msrb.gmra.mxu3 %vm1373_vm15, %v6526_v30 }
 0x369   : > { %4921 = vmatmul.msk.f32.vlgmr.msrb.gmra.mxu2 %vm1373_vm15, %v6751_v20 }
 0x36a   : > { %4930 = vmatpush.xpose.msk.msra.mxu2 %vm1373_vm15, %v6784_v44  ;;  %v2500_v40 = vpop.f32.mrf.mxu0 }
 0x36b   : > { %v2810_v59 = vmul.f32 0.5, %v2500_v40 }
 0x36c   : > { %v2661_v61 = vpop.permute.xlu0 %2660 }
 0x36d   : > { %v6938_v55 = vpop.permute.xlu1 %2716  ;;  %5001 = vmatmul.msk.f32.gmra.mxu0 %vm1373_vm15, %v2661_v61  ;;  %v6942_v44 = vadd.f32 %v2810_v59, %v6863_v34  ;;  %v5163_v59 = vunpack.i.l.bf16 %v6818_v5 }
 0x36e   : > { %4931 = vmatpush.xpose.msk.msra.mxu2 %vm1373_vm15, %v6842_v12  ;;  %8473 = vst [vmem:[#allocation52_spill] sm:$0xff] %v6938_v55  ;;  %v5153_v12 = vunpack.i.l.bf16 %v6682_v50 }
 0x36f   : > { %v2866_v20 = vsel %vm1789_vm2, %v6942_v44, -inf }
 0x370   : > { %2867 = vmax.xlane.f32.xlu2 %v2866_v20  ;;  %4928 = vmatmul.msk.f32.gmra.mxu3 %vm1373_vm15, %v6569_v60  ;;  %v5158_v20 = vunpack.i.l.bf16 %v6816_v38 }
 0x371   : > { %4922 = vmatmul.msk.f32.gmra.mxu2 %vm1373_vm15, %v6492_v45 }
 0x372   : > { %4932 = vmatpush.xpose.msk.msra.mxu2 %vm1373_vm15, %v6840_v22 }
 0x374   : > { %v6955_v32 = vpop.permute.xlu0 %2710 }
 0x375   : > { %8474 = vst [vmem:[#allocation53_spill] sm:$0xff] %v6955_v32  ;;  %v6957_v22 = vpop.permute.xlu1 %2712 }
 0x376   : > { %2085 = vmatpush.msrb.mxu2 %v5148_v41  ;;  %8475 = vst [vmem:[#allocation54_spill] sm:$0xff] %v6957_v22  ;;  %v2503_v41 = vpop.f32.mrf.mxu0 }
 0x378   : > { %2086 = vmatpush.msrb.mxu2 %v5149_v8  ;;  %4929 = vmatmul.msk.f32.gmra.mxu3 %vm1373_vm15, %v6572_v6  ;;  %v5188_v6 = vunpack.i.l.bf16 %v6872_v24 }
 0x379   : > { %4923 = vmatmul.msk.f32.gmra.mxu2 %vm1373_vm15, %v6508_v1 }
 0x37a   : > { %2087 = vmatpush.msrb.mxu2 %v5153_v12  ;;  %v2811_v12 = vmul.f32 0.5, %v2503_v41 }
 0x37c   : > { %v6963_v21 = vpop.permute.xlu0 %2756 }
 0x37d   : > { %8476 = vst [vmem:[#allocation55_spill] sm:$0xff] %v6963_v21  ;;  %v6965_v36 = vpop.permute.xlu1 %2708 }
 0x37e   : > { %8477 = vst [vmem:[#allocation56_spill] sm:$0xff] %v6965_v36 }
 0x37f   : > { %v1450_v40 = vpop.f32.mrf.mxu3 }
 0x380   : > { %v1744_v61 = vmul.f32 0.5, %v1450_v40 }
 0x381   : > { %4933 = vmatmul.msk.f32.vlgmr.msra.gmra.mxu2 %vm1373_vm15, %v6624_v62 }
 0x382   : > { %2173 = vmatpush.msra.mxu2 %v5163_v59  ;;  %v6972_v8 = vadd.f32 %v1744_v61, %v6863_v34  ;;  %v6982_v59 = vadd.f32 %v2811_v12, %v6863_v34 }
 0x384   : > { %2174 = vmatpush.msra.mxu2 %v5158_v20  ;;  %v6975_v21 = vpop.permute.xlu0 %5206  ;;  %v1799_v32 = vsel %vm1789_vm2, %v6972_v8, -inf }
 0x385   : > { %v6979_v40 = vpop.permute.xlu1 %2764  ;;  %1800 = vmax.xlane.f32.xlu0 %v1799_v32 }
 0x386   : > { %8478 = vst [vmem:[#allocation57_spill] sm:$0xff] %v6979_v40  ;;  %2175 = vmatpush.msra.mxu2 %v5188_v6  ;;  %v2869_v40 = vsel %vm1789_vm2, %v6982_v59, -inf }
 0x387   : > { %v1453_v62 = vpop.f32.mrf.mxu3 }
 0x388   : > { %v1745_v36 = vmul.f32 0.5, %v1453_v62 }
 0x389   : > { %4934 = vmatmul.msk.f32.gmra.mxu2 %vm1373_vm15, %v6627_v2 }
 0x38a   : > { %v6987_v61 = vadd.f32 %v1745_v36, %v6863_v34 }
 0x38c   : > { %v2607_v41 = vpop.permute.xlu0 %2606  ;;  %v1802_v20 = vsel %vm1789_vm2, %v6987_v61, -inf }
 0x38d   : > { %v5197_v32 = vpop.permute.xlu1 %5196  ;;  %1803 = vmax.xlane.f32.xlu1 %v1802_v20  ;;  %2870 = vmax.xlane.f32.xlu0 %v2869_v40 }
 0x38e   : > { %v5198_v46 = vunpack.i.l.bf16 %v5197_v32  ;;  %v5199_v40 = vunpack.i.h.bf16 %v5197_v32 }
 0x38f   : > { %v1456_v6 = vpop.f32.mrf.mxu3 }
 0x390   : > { %v1746_v62 = vmul.f32 0.5, %v1456_v6  ;;  %v5203_v6 = vunpack.i.l.bf16 %v6856_v15 }
 0x391   : > { %4935 = vmatmul.msk.f32.gmra.mxu2 %vm1373_vm15, %v6613_v23 }
 0x392   : > { %v6996_v12 = vadd.f32 %v1746_v62, %v6863_v34 }
 0x393   : > { %v1497_v36 = vpop.f32.mrf.mxu2 }
 0x394   : > { %v1747_v2 = vmul.f32 0.5, %v1497_v36  ;;  %v1702_v30 = vpop.permute.xlu0 %1701  ;;  %v1805_v60 = vsel %vm1789_vm2, %v6996_v12, -inf }
 0x395   : > { %v2613_v56 = vpop.permute.xlu1 %2612  ;;  %1806 = vmax.xlane.f32.xlu2 %v1805_v60  ;;  %4936 = vmatpush.xpose.msk.msra.mxu3 %vm1373_vm15, %v1702_v30  ;;  %v5154_v60 = vunpack.i.h.bf16 %v6682_v50  ;;  %v5159_v50 = vunpack.i.h.bf16 %v6816_v38 }
 0x396   : > { %4992 = vmatpush.xpose.msk.msra.mxu1 %vm1373_vm15, %v2613_v56  ;;  %v7003_v20 = vadd.f32 %v1747_v2, %v6863_v34 }
 0x398   : > { %v1808_v56 = vsel %vm1789_vm2, %v7003_v20, -inf }
 0x399   : > { %4993 = vmatmul.msk.f32.vlgmr.msra.gmra.mxu1 %vm1373_vm15, %v2607_v41  ;;  %4937 = vmatpush.xpose.msk.msra.mxu3 %vm1373_vm15, %v6820_v7  ;;  %v5164_v7 = vunpack.i.h.bf16 %v6818_v5  ;;  %v5184_v41 = vunpack.i.h.bf16 %v6861_v43 }
 0x39a   : > { %3149 = vmatpush.msrb.mxu1 %v5198_v46  ;;  %v5189_v46 = vunpack.i.h.bf16 %v6872_v24 }
 0x39b   : > { %v1500_v62 = vpop.f32.mrf.mxu2 }
 0x39c   : > { %3150 = vmatpush.msrb.mxu1 %v5199_v40  ;;  %v1748_v30 = vmul.f32 0.5, %v1500_v62 }
 0x39d   : > { %1809 = vmax.xlane.f32.xlu2 %v1808_v56  ;;  %4938 = vmatpush.xpose.msk.msra.mxu3 %vm1373_vm15, %v6891_v63 }
 0x39e   : > { %3151 = vmatpush.msrb.mxu1 %v5203_v6  ;;  %v7015_v2 = vadd.f32 %v1748_v30, %v6863_v34 }
 0x3a0   : > { %4939 = vmatmul.msk.f32.vlgmr.msra.gmra.mxu3 %vm1373_vm15, %v6694_v13  ;;  %v1811_v15 = vsel %vm1789_vm2, %v7015_v2, -inf  ;;  %v5174_v13 = vunpack.i.h.bf16 %v6776_v31 }
 0x3a1   : > { %2129 = vmatpush.msrb.mxu3 %v5154_v60  ;;  %4994 = vmatmul.msk.f32.gmra.mxu1 %vm1373_vm15, %v6701_v27 }
 0x3a2   : > { %1812 = vmax.xlane.f32.xlu0 %v1811_v15 }
 0x3a3   : > { %2130 = vmatpush.msrb.mxu3 %v5164_v7  ;;  %v1503_v63 = vpop.f32.mrf.mxu2 }
 0x3a4   : > { %v1749_v5 = vmul.f32 0.5, %v1503_v63 }
 0x3a5   : > { %2131 = vmatpush.msrb.mxu3 %v5159_v50 }
 0x3a6   : > { %v7029_v32 = vadd.f32 %v1749_v5, %v6863_v34 }
 0x3a7   : > { %2217 = vmatpush.msra.mxu3 %v5189_v46 }
 0x3a8   : > { %v1814_v38 = vsel %vm1789_vm2, %v7029_v32, -inf  ;;  %4940 = vmatmul.msk.f32.gmra.mxu3 %vm1373_vm15, %v6644_v35 }
 0x3a9   : > { %2218 = vmatpush.msra.mxu3 %v5184_v41  ;;  %4995 = vmatmul.msk.f32.gmra.mxu1 %vm1373_vm15, %v6680_v37 }
 0x3aa   : > { %1815 = vmax.xlane.f32.xlu1 %v1814_v38 }
 0x3ab   : > { %2219 = vmatpush.msra.mxu3 %v5174_v13 }
 0x3b0   : > { %4941 = vmatmul.msk.f32.gmra.mxu3 %vm1373_vm15, %v6717_v48 }
 0x3d3   : > { %v1544_v27 = vpop.f32.mrf.mxu3 }
 0x3d4   : > { %v1750_v24 = vmul.f32 0.5, %v1544_v27 }
 0x3d6   : > { %v7040_v36 = vadd.f32 %v1750_v24, %v6863_v34 }
 0x3d8   : > { %v1817_v40 = vsel %vm1789_vm2, %v7040_v36, -inf }
 0x3d9   : > { %1818 = vmax.xlane.f32.xlu0 %v1817_v40 }
 0x3db   : > { %v1547_v6 = vpop.f32.mrf.mxu3 }
 0x3dc   : > { %v1751_v62 = vmul.f32 0.5, %v1547_v6 }
 0x3de   : > { %v7045_v60 = vadd.f32 %v1751_v62, %v6863_v34 }
 0x3e0   : > { %v1820_v37 = vsel %vm1789_vm2, %v7045_v60, -inf }
 0x3e1   : > { %1821 = vmax.xlane.f32.xlu0 %v1820_v37 }
 0x3e3   : > { %v1550_v30 = vpop.f32.mrf.mxu3 }
 0x3e4   : > { %v1752_v56 = vmul.f32 0.5, %v1550_v30  ;;  %v7067_v30 = vpop.permute.xlu2 %5211 }
 0x3e6   : > { %v7050_v7 = vadd.f32 %v1752_v56, %v6863_v34 }
 0x3e8   : > { %v1823_v15 = vsel %vm1789_vm2, %v7050_v7, -inf }
 0x3e9   : > { %1824 = vmax.xlane.f32.xlu0 %v1823_v15 }
 0x3eb   : > { %v1638_v5 = vpop.f32.mrf.mxu3 }
 0x3ec   : > { %v1591_v50 = vpop.f32.mrf.mxu2  ;;  %v1756_v56 = vmul.f32 0.5, %v1638_v5 }
 0x3ed   : > { %v1753_v46 = vmul.f32 0.5, %v1591_v50  ;;  %v1792_v50 = vpop.xlane.xlu0 %1791 }
 0x3ef   : > { %v7055_v63 = vadd.f32 %v1753_v46, %v6863_v34 }
 0x3f1   : > { %v1826_v41 = vsel %vm1789_vm2, %v7055_v63, -inf }
 0x3f2   : > { %1827 = vmax.xlane.f32.xlu2 %v1826_v41 }
 0x3f3   : > { %v1641_v40 = vpop.f32.mrf.mxu3 }
 0x3f4   : > { %v1594_v13 = vpop.f32.mrf.mxu2 }
 0x3f5   : > { %v1754_v38 = vmul.f32 0.5, %v1594_v13  ;;  %v7072_v13 = vadd.f32 %v1756_v56, %v6863_v34  ;;  %v2862_v42 = vpop.xlane.xlu0 %2861 }
 0x3f7   : > { %v7060_v27 = vadd.f32 %v1754_v38, %v6863_v34  ;;  %v1835_v5 = vsel %vm1789_vm2, %v7072_v13, -inf }
 0x3f9   : > { %v1829_v24 = vsel %vm1789_vm2, %v7060_v27, -inf }
 0x3fa   : > { %1830 = vmax.xlane.f32.xlu2 %v1829_v24 }
 0x3fb   : > { %v1644_v38 = vpop.f32.mrf.mxu3 }
 0x3fc   : > { %v1597_v6 = vpop.f32.mrf.mxu2 }
 0x3fd   : > { %v1755_v62 = vmul.f32 0.5, %v1597_v6  ;;  %v1757_v6 = vmul.f32 0.5, %v1641_v40  ;;  %v1862_v40 = vsub.f32 %v6867_v53, %v1792_v50  ;;  %v7095_v49 = vpop.xlane.xlu0 %1800 }
 0x3ff   : > { %v7065_v37 = vadd.f32 %v1755_v62, %v6863_v34  ;;  %v1758_v62 = vmul.f32 0.5, %v1644_v38  ;;  %v7084_v22 = vadd.f32 %v1757_v6, %v6863_v34 }
 0x401   : > { %v1832_v15 = vsel %vm1789_vm2, %v7065_v37, -inf }
 0x402   : > { %1833 = vmax.xlane.f32.xlu0 %v1832_v15  ;;  %v7081_v15 = vpop.permute.xlu2 %2766 }
 0x403   : > { %8479 = vst [vmem:[#allocation58_spill] sm:$0xff] %v7081_v15  ;;  %v1886_v15 = vmul.f32 1.442695, %v1862_v40 }
 0x404   : > { %v1685_v46 = vpop.f32.mrf.mxu2 }
 0x405   : > { %v1759_v41 = vmul.f32 0.5, %v1685_v46  ;;  %v2856_v46 = vpop.xlane.xlu1 %2855  ;;  %5320 = vpow2.f32 %v1886_v15 }
 0x406   : > { %v2926_v38 = vsub.f32 %v6883_v51, %v2856_v46 }
 0x407   : > { %v7075_v24 = vadd.f32 %v1759_v41, %v6863_v34  ;;  %v7087_v41 = vadd.f32 %v1758_v62, %v6863_v34 }
 0x408   : > { %v2950_v6 = vmul.f32 1.442695, %v2926_v38 }
 0x409   : > { %v1844_v23 = vsel %vm1789_vm2, %v7075_v24, -inf }
 0x40a   : > { %1845 = vmax.xlane.f32.xlu2 %v1844_v23  ;;  %1836 = vmax.xlane.f32.xlu0 %v1835_v5  ;;  %v1838_v23 = vsel %vm1789_vm2, %v7084_v22, -inf  ;;  %v1841_v5 = vsel %vm1789_vm2, %v7087_v41, -inf  ;;  %v2859_v58 = vpop.xlane.xlu2 %2858  ;;  %5322 = vpow2.f32 %v2950_v6 }
 0x40b   : > { %v2927_v51 = vsub.f32 %v6901_v54, %v2859_v58 }
 0x40c   : > { %v1688_v56 = vpop.f32.mrf.mxu2 }
 0x40d   : > { %v1760_v52 = vmul.f32 0.5, %v1688_v56  ;;  %v1798_v55 = vpop.xlane.xlu1 %1797  ;;  %v2952_v38 = vmul.f32 1.442695, %v2927_v51 }
 0x40e   : > { %v1864_v46 = vsub.f32 %v6896_v10, %v1798_v55 }
 0x40f   : > { %v7098_v53 = vadd.f32 %v1760_v52, %v6863_v34  ;;  %5324 = vpow2.f32 %v2952_v38 }
 0x410   : > { %v1890_v52 = vmul.f32 1.442695, %v1864_v46 }
 0x411   : > { %v1847_v40 = vsel %vm1789_vm2, %v7098_v53, -inf }
 0x412   : > { %1839 = vmax.xlane.f32.xlu0 %v1838_v23  ;;  %1842 = vmax.xlane.f32.xlu2 %v1841_v5  ;;  %v7109_v23 = vpop.eup %5320  ;;  %v1795_v15 = vpop.xlane.xlu2 %1794  ;;  %5326 = vpow2.f32 %v1890_v52 }
 0x413   : > { %v7111_v58 = vpop.eup %5322  ;;  %v1863_v10 = vsub.f32 %v6912_v28, %v1795_v15  ;;  %v1934_v5 = vsel %vm1789_vm2, %v7109_v23, 0.0 }
 0x414   : > { %v1691_v62 = vpop.f32.mrf.mxu2  ;;  %v2998_v55 = vsel %vm1789_vm2, %v7111_v58, 0.0 }
 0x415   : > { %v1761_v14 = vmul.f32 0.5, %v1691_v62  ;;  %v1888_v62 = vmul.f32 1.442695, %v1863_v10  ;;  %v7119_v46 = vpop.eup %5324 }
 0x416   : > { %v3001_v15 = vsel %vm1789_vm2, %v7119_v46, 0.0 }
 0x417   : > { %v7102_v50 = vadd.f32 %v1761_v14, %v6863_v34  ;;  %v2871_v14 = vpop.xlane.xlu0 %2870  ;;  %5328 = vpow2.f32 %v1888_v62 }
 0x418   : > { %v2931_v54 = vsub.f32 %v6982_v59, %v2871_v14  ;;  %v7121_v38 = vpop.eup %5326  ;;  %v2928_v59 = vsub.f32 %v6917_v0, %v2862_v42 }
 0x419   : > { %v1850_v56 = vsel %vm1789_vm2, %v7102_v50, -inf  ;;  %v1940_v14 = vsel %vm1789_vm2, %v7121_v38, 0.0 }
 0x41a   : > { %1851 = vmax.xlane.f32.xlu1 %v1850_v56  ;;  %1848 = vmax.xlane.f32.xlu0 %v1847_v40  ;;  %v2865_v56 = vpop.xlane.xlu1 %2864  ;;  %v2960_v40 = vmul.f32 1.442695, %v2931_v54  ;;  %v2954_v10 = vmul.f32 1.442695, %v2928_v59 }
 0x41b   : > { %v2929_v0 = vsub.f32 %v6925_v25, %v2865_v56 }
 0x41c   : > { %5330 = vpow2.f32 %v2960_v40 }
 0x41d   : > { %5332 = vpow2.f32 %v2954_v10 }
 0x422   : > { %2999 = vadd.xlane.f32.xlu0 %v2998_v55  ;;  %1935 = vadd.xlane.f32.xlu1 %v1934_v5  ;;  %v1804_v55 = vpop.xlane.xlu1 %1803 }
 0x423   : > { %v1732_v6 = vpop.f32.mrf.mxu3 }
 0x424   : > { %v1762_v51 = vmul.f32 0.5, %v1732_v6  ;;  %v7133_v6 = vpop.eup %5328 }
 0x425   : > { %v7135_v42 = vpop.eup %5330  ;;  %v1937_v40 = vsel %vm1789_vm2, %v7133_v6, 0.0 }
 0x426   : > { %v7124_v28 = vadd.f32 %v1762_v51, %v6863_v34  ;;  %v1866_v51 = vsub.f32 %v6987_v61, %v1804_v55  ;;  %v1865_v55 = vsub.f32 %v6972_v8, %v7095_v49 }
 0x428   : > { %v1853_v52 = vsel %vm1789_vm2, %v7124_v28, -inf  ;;  %v1894_v25 = vmul.f32 1.442695, %v1866_v51 }
 0x429   : > { %1854 = vmax.xlane.f32.xlu2 %v1853_v52  ;;  %v3013_v52 = vsel %vm1789_vm2, %v7135_v42, 0.0 }
 0x42a   : > { %3002 = vadd.xlane.f32.xlu0 %v3001_v15  ;;  %1941 = vadd.xlane.f32.xlu1 %v1940_v14  ;;  %v2956_v15 = vmul.f32 1.442695, %v2929_v0  ;;  %v7148_v14 = vpop.xlane.xlu2 %2867 }
 0x42b   : > { %v1735_v54 = vpop.f32.mrf.mxu3 }
 0x42c   : > { %v1763_v5 = vmul.f32 0.5, %v1735_v54  ;;  %v7150_v54 = vpop.eup %5332  ;;  %5334 = vpow2.f32 %v2956_v15  ;;  %v2647_v15 = vpop.f32.mrf.mxu1 }
 0x42d   : > { %5336 = vpow2.f32 %v1894_v25  ;;  %v3004_v0 = vsel %vm1789_vm2, %v7150_v54, 0.0  ;;  %v2818_v49 = vmul.f32 0.5, %v2647_v15  ;;  %v5220_v15 = vpack.i.bf16 %v6581_v9, %v6584_v17 }
 0x42e   : > { %v7139_v62 = vadd.f32 %v1763_v5, %v6863_v34  ;;  %v5215_v17 = vpack.i.bf16 %v6495_v26, %v6517_v29 }
 0x430   : > { %v1856_v59 = vsel %vm1789_vm2, %v7139_v62, -inf }
 0x431   : > { %1857 = vmax.xlane.f32.xlu2 %v1856_v59 }
 0x432   : > { %1938 = vadd.xlane.f32.xlu0 %v1937_v40  ;;  %3014 = vadd.xlane.f32.xlu1 %v3013_v52  ;;  %v1807_v51 = vpop.xlane.xlu2 %1806  ;;  %v1892_v40 = vmul.f32 1.442695, %v1865_v55  ;;  %v7161_v59 = vpop.eup %5334  ;;  %v7171_v55 = vadd.f32 %v2818_v49, %v6863_v34 }
 0x433   : > { %v1738_v56 = vpop.f32.mrf.mxu3  ;;  %v7163_v52 = vpop.eup %5336  ;;  %v3007_v25 = vsel %vm1789_vm2, %v7161_v59, 0.0 }
 0x434   : > { %v1764_v10 = vmul.f32 0.5, %v1738_v56  ;;  %5338 = vpow2.f32 %v1892_v40  ;;  %v1867_v56 = vsub.f32 %v6996_v12, %v1807_v51  ;;  %v1946_v8 = vsel %vm1789_vm2, %v7163_v52, 0.0 }
 0x435   : > { %v2890_v12 = vsel %vm1789_vm2, %v7171_v55, -inf }
 0x436   : > { %v7153_v61 = vadd.f32 %v1764_v10, %v6863_v34  ;;  %v1896_v10 = vmul.f32 1.442695, %v1867_v56 }
 0x438   : > { %8480 = vst [vmem:[#allocation59_spill] sm:$0xff] %v7153_v61  ;;  %v1859_v5 = vsel %vm1789_vm2, %v7153_v61, -inf  ;;  %5340 = vpow2.f32 %v1896_v10  ;;  %v1816_v61 = vpop.xlane.xlu1 %1815 }
 0x439   : > { %1860 = vmax.xlane.f32.xlu2 %v1859_v5  ;;  %v1870_v29 = vsub.f32 %v7029_v32, %v1816_v61 }
 0x43a   : > { %3005 = vadd.xlane.f32.xlu0 %v3004_v0  ;;  %v1810_v5 = vpop.xlane.xlu2 %1809  ;;  %v7173_v0 = vpop.eup %5338 }
 0x43b   : > { %v1868_v40 = vsub.f32 %v7003_v20, %v1810_v5  ;;  %v1943_v51 = vsel %vm1789_vm2, %v7173_v0, 0.0 }
 0x43d   : > { %v1898_v56 = vmul.f32 1.442695, %v1868_v40 }
 0x43e   : > { %v7183_v49 = vpop.eup %5340 }
 0x43f   : > { %5342 = vpow2.f32 %v1898_v56  ;;  %v1949_v20 = vsel %vm1789_vm2, %v7183_v49, 0.0 }
 0x441   : > { %1947 = vadd.xlane.f32.xlu2 %v1946_v8  ;;  %v1813_v8 = vpop.xlane.xlu0 %1812 }
 0x442   : > { %3008 = vadd.xlane.f32.xlu0 %v3007_v25  ;;  %v1869_v56 = vsub.f32 %v7015_v2, %v1813_v8  ;;  %v2930_v8 = vsub.f32 %v6942_v44, %v7148_v14 }
 0x445   : > { %v7187_v25 = vpop.eup %5342 }
 0x446   : > { %v1952_v5 = vsel %vm1789_vm2, %v7187_v25, 0.0 }
 0x449   : > { %2891 = vmax.xlane.f32.xlu2 %v2890_v12 }
 0x44a   : > { %1944 = vadd.xlane.f32.xlu0 %v1943_v51 }
 0x44b   : > { %5221 = vrot.lane.b32.xlu1 %v5220_v15, %s5683_s28 }
 0x44c   : > { %v1819_v10 = vpop.xlane.xlu0 %1818 }
 0x44d   : > { %v1871_v32 = vsub.f32 %v7040_v36, %v1819_v10 }
 0x44f   : > { %v1904_v44 = vmul.f32 1.442695, %v1871_v32 }
 0x452   : > { %1950 = vadd.xlane.f32.xlu0 %v1949_v20  ;;  %v1900_v20 = vmul.f32 1.442695, %v1869_v56  ;;  %v2958_v56 = vmul.f32 1.442695, %v2930_v8 }
 0x454   : > { %v1822_v9 = vpop.xlane.xlu0 %1821 }
 0x45a   : > { %1953 = vadd.xlane.f32.xlu0 %v1952_v5 }
 0x45c   : > { %v7195_v40 = vpop.xlane.xlu0 %1824 }
 0x461   : > { %5226 = vrot.lane.b32.xlu2 %v6707_v16, %s5683_s28 }
 0x465   : > { %v1828_v18 = vpop.xlane.xlu2 %1827 }
 0x46d   : > { %v1831_v61 = vpop.xlane.xlu2 %1830 }
 0x46e   : > { %5216 = vrot.lane.b32.xlu0 %v5215_v17, %s5683_s28 }
 0x475   : > { %v1834_v12 = vpop.xlane.xlu0 %1833 }
 0x476   : > { %v1876_v51 = vsub.f32 %v7065_v37, %v1834_v12  ;;  %v1902_v37 = vmul.f32 1.442695, %v1870_v29  ;;  %v1874_v29 = vsub.f32 %v7055_v63, %v1828_v18 }
 0x478   : > { %v1914_v15 = vmul.f32 1.442695, %v1876_v51 }
 0x47a   : > { %5344 = vpow2.f32 %v1914_v15 }
 0x47b   : > { %5346 = vpow2.f32 %v1900_v20 }
 0x47d   : > { %v1837_v5 = vpop.xlane.xlu0 %1836 }
 0x47e   : > { %v1877_v16 = vsub.f32 %v7072_v13, %v1837_v5 }
 0x480   : > { %v7201_v47 = vpop.eup %5344  ;;  %v1916_v26 = vmul.f32 1.442695, %v1877_v16 }
 0x481   : > { %v1976_v17 = vsel %vm1789_vm2, %v7201_v47, 0.0  ;;  %v7209_v13 = vpop.eup %5346 }
 0x482   : > { %1977 = vadd.xlane.f32.xlu1 %v1976_v17  ;;  %5348 = vpow2.f32 %v1916_v26  ;;  %v1955_v5 = vsel %vm1789_vm2, %v7209_v13, 0.0  ;;  %v1846_v17 = vpop.xlane.xlu2 %1845 }
 0x483   : > { %5350 = vpow2.f32 %v1902_v37  ;;  %v1880_v63 = vsub.f32 %v7075_v24, %v1846_v17  ;;  %v1873_v17 = vsub.f32 %v7050_v7, %v7195_v40 }
 0x485   : > { %v1840_v2 = vpop.xlane.xlu0 %1839  ;;  %v1908_v40 = vmul.f32 1.442695, %v1873_v17 }
 0x486   : > { %v1878_v12 = vsub.f32 %v7084_v22, %v1840_v2  ;;  %v1872_v22 = vsub.f32 %v7045_v60, %v1822_v9  ;;  %v1910_v2 = vmul.f32 1.442695, %v1874_v29 }
 0x488   : > { %v1918_v51 = vmul.f32 1.442695, %v1878_v12  ;;  %v7211_v15 = vpop.eup %5348  ;;  %v1906_v26 = vmul.f32 1.442695, %v1872_v22  ;;  %v1922_v22 = vmul.f32 1.442695, %v1880_v63 }
 0x489   : > { %v1979_v20 = vsel %vm1789_vm2, %v7211_v15, 0.0  ;;  %v7223_v36 = vpop.eup %5350 }
 0x48a   : > { %5352 = vpow2.f32 %v1918_v51  ;;  %1980 = vadd.xlane.f32.xlu1 %v1979_v20  ;;  %1956 = vadd.xlane.f32.xlu2 %v1955_v5  ;;  %v1958_v60 = vsel %vm1789_vm2, %v7223_v36, 0.0  ;;  %v1875_v51 = vsub.f32 %v7060_v27, %v1831_v61 }
 0x48b   : > { %5354 = vpow2.f32 %v2958_v56 }
 0x48c   : > { %5356 = vpow2.f32 %v1904_v44  ;;  %v1912_v56 = vmul.f32 1.442695, %v1875_v51  ;;  %v1843_v44 = vpop.xlane.xlu2 %1842  ;;  %v2650_v51 = vpop.f32.mrf.mxu1 }
 0x48d   : > { %v7219_v14 = vpop.xlane.xlu1 %1851  ;;  %v7221_v16 = vpop.xlane.xlu0 %1848  ;;  %5358 = vpow2.f32 %v1906_v26 }
 0x48e   : > { %v1881_v17 = vsub.f32 %v7098_v53, %v7221_v16 }
 0x490   : > { %v7225_v10 = vpop.eup %5352 }
 0x491   : > { %v1982_v37 = vsel %vm1789_vm2, %v7225_v10, 0.0  ;;  %v7232_v9 = vpop.eup %5354 }
 0x492   : > { %1983 = vadd.xlane.f32.xlu1 %v1982_v37  ;;  %1959 = vadd.xlane.f32.xlu2 %v1958_v60  ;;  %v7235_v32 = vpop.eup %5356  ;;  %v3010_v18 = vsel %vm1789_vm2, %v7232_v9, 0.0  ;;  %v5183_v37 = vunpack.i.l.bf16 %v6861_v43  ;;  %v1879_v43 = vsub.f32 %v7087_v41, %v1843_v44 }
 0x493   : > { %v1961_v20 = vsel %vm1789_vm2, %v7235_v32, 0.0  ;;  %v7242_v5 = vpop.eup %5358 }
 0x495   : > { %v1936_v8 = vpop.xlane.xlu1 %1935  ;;  %v3000_v12 = vpop.xlane.xlu0 %2999 }
 0x496   : > { %5360 = vrcp.f32 %v1936_v8 }
 0x497   : > { %5362 = vrcp.f32 %v3000_v12 }
 0x498   : > { %3011 = vadd.xlane.f32.xlu0 %v3010_v18  ;;  %5364 = vpow2.f32 %v1910_v2  ;;  %v5173_v2 = vunpack.i.l.bf16 %v6776_v31  ;;  %v1920_v18 = vmul.f32 1.442695, %v1879_v43 }
 0x499   : > { %5366 = vpow2.f32 %v1912_v56 }
 0x49a   : > { %1962 = vadd.xlane.f32.xlu2 %v1961_v20 }
 0x49c   : > { %v5361_v27 = vpop.eup %5360  ;;  %v7260_v8 = vpop.xlane.xlu2 %1854 }
 0x49d   : > { %v5363_v61 = vpop.eup %5362  ;;  %v2030_v26 = vmul.f32 %v5361_v27, %v7109_v23  ;;  %v3003_v29 = vpop.xlane.xlu0 %3002  ;;  %v1964_v23 = vsel %vm1789_vm2, %v7242_v5, 0.0 }
 0x49e   : > { %v3094_v60 = vmul.f32 %v5363_v61, %v7111_v58  ;;  %v7247_v24 = vpop.eup %5364  ;;  %5368 = vrcp.f32 %v3003_v29  ;;  %v5208_v58 = vunpack.i.l.bf16 %v6975_v21  ;;  %v1942_v44 = vpop.xlane.xlu1 %1941 }
 0x49f   : > { %4942 = vmatmul.msk.f32.vlgmr.msrb.gmra.mxu2 %vm1789_vm2, %v2030_v26  ;;  %5370 = vpow2.f32 %v1922_v22  ;;  %v1970_v7 = vsel %vm1789_vm2, %v7247_v24, 0.0  ;;  %v7262_v31 = vpop.eup %5366 }
 0x4a0   : > { %2261 = vmatpush.msrb.mxu2 %v5183_v37  ;;  %5014 = vmatmul.msk.f32.vlgmr.msrb.gmra.mxu1 %vm1789_vm2, %v3094_v60  ;;  %v1973_v20 = vsel %vm1789_vm2, %v7262_v31, 0.0  ;;  %v2653_v60 = vpop.f32.mrf.mxu1 }
 0x4a1   : > { %1965 = vadd.xlane.f32.xlu0 %v1964_v23  ;;  %v2820_v43 = vmul.f32 0.5, %v2653_v60 }
 0x4a2   : > { %2262 = vmatpush.msrb.mxu2 %v5173_v2  ;;  %1971 = vadd.xlane.f32.xlu2 %v1970_v7  ;;  %v2819_v2 = vmul.f32 0.5, %v2650_v51 }
 0x4a3   : > { %v7294_v51 = vadd.f32 %v2820_v43, %v6863_v34  ;;  %v5209_v43 = vunpack.i.h.bf16 %v6975_v21 }
 0x4a4   : > { %2263 = vmatpush.msrb.mxu2 %v5208_v58  ;;  %v5369_v12 = vpop.eup %5368  ;;  %v1858_v22 = vpop.xlane.xlu2 %1857 }
 0x4a5   : > { %v1939_v63 = vpop.xlane.xlu0 %1938  ;;  %v3095_v41 = vmul.f32 %v5369_v12, %v7119_v46  ;;  %v7265_v56 = vpop.eup %5370  ;;  %v1884_v60 = vsub.f32 %v7139_v62, %v1858_v22  ;;  %v5169_v22 = vunpack.i.h.bf16 %v6848_v19 }
 0x4a6   : > { %5372 = vrcp.f32 %v1939_v63  ;;  %v1988_v27 = vsel %vm1789_vm2, %v7265_v56, 0.0  ;;  %v1882_v63 = vsub.f32 %v7102_v50, %v7219_v14 }
 0x4a7   : > { %5374 = vpow2.f32 %v1908_v40  ;;  %v7287_v40 = vadd.f32 %v2819_v2, %v6863_v34 }
 0x4a8   : > { %5015 = vmatmul.msk.f32.gmra.mxu1 %vm1789_vm2, %v3095_v41  ;;  %5376 = vpow2.f32 %v1920_v18  ;;  %v2697_v18 = vpop.f32.mrf.mxu0 }
 0x4a9   : > { %1974 = vadd.xlane.f32.xlu0 %v1973_v20  ;;  %5378 = vrcp.f32 %v1942_v44  ;;  %v2893_v20 = vsel %vm1789_vm2, %v7287_v40, -inf  ;;  %v1926_v44 = vmul.f32 1.442695, %v1882_v63 }
 0x4aa   : > { %1989 = vadd.xlane.f32.xlu2 %v1988_v27 }
 0x4ab   : > { %2760 = vrot.lane.b32.xlu1 %v6717_v48, %s5679_s26 }
 0x4ac   : > { %v5373_v61 = vpop.eup %5372  ;;  %v7298_v41 = vpop.xlane.xlu2 %1860 }
 0x4ad   : > { %v7274_v46 = vpop.eup %5374  ;;  %v3006_v26 = vpop.xlane.xlu0 %3005  ;;  %v2031_v29 = vmul.f32 %v5373_v61, %v7133_v6  ;;  %v1924_v6 = vmul.f32 1.442695, %v1881_v17 }
 0x4ae   : > { %5380 = vrcp.f32 %v3006_v26  ;;  %v7277_v37 = vpop.eup %5376  ;;  %v1967_v23 = vsel %vm1789_vm2, %v7274_v46, 0.0 }
 0x4af   : > { %4943 = vmatmul.msk.f32.gmra.mxu2 %vm1789_vm2, %v2031_v29  ;;  %v5379_v48 = vpop.eup %5378  ;;  %v1985_v58 = vsel %vm1789_vm2, %v7277_v37, 0.0  ;;  %5382 = vpow2.f32 %v1924_v6  ;;  %v5179_v6 = vunpack.i.h.bf16 %v6852_v3 }
 0x4b0   : > { %v2032_v53 = vmul.f32 %v5379_v48, %v7121_v38  ;;  %v2821_v38 = vmul.f32 0.5, %v2697_v18  ;;  %v2700_v18 = vpop.f32.mrf.mxu0 }
 0x4b1   : > { %1968 = vadd.xlane.f32.xlu0 %v1967_v23 }
 0x4b2   : > { %1986 = vadd.xlane.f32.xlu2 %v1985_v58  ;;  %v7309_v14 = vadd.f32 %v2821_v38, %v6863_v34  ;;  %v1930_v58 = vmul.f32 1.442695, %v1884_v60  ;;  %v1883_v60 = vsub.f32 %v7124_v28, %v7260_v8 }
 0x4b4   : > { %v5381_v7 = vpop.eup %5380  ;;  %v1948_v26 = vpop.xlane.xlu2 %1947  ;;  %v2899_v29 = vsel %vm1789_vm2, %v7309_v14, -inf }
 0x4b5   : > { %v7289_v12 = vpop.xlane.xlu0 %3008  ;;  %v3096_v16 = vmul.f32 %v5381_v7, %v7150_v54  ;;  %v2896_v54 = vsel %vm1789_vm2, %v7294_v51, -inf  ;;  %v7306_v27 = vpop.eup %5382 }
 0x4b6   : > { %v1991_v61 = vsel %vm1789_vm2, %v7306_v27, 0.0 }
 0x4b7   : > { %4944 = vmatmul.msk.f32.gmra.mxu2 %vm1789_vm2, %v2032_v53  ;;  %5016 = vmatmul.msk.f32.gmra.mxu1 %vm1789_vm2, %v3096_v16 }
 0x4b9   : > { %2894 = vmax.xlane.f32.xlu0 %v2893_v20  ;;  %v2822_v20 = vmul.f32 0.5, %v2700_v18 }
 0x4ba   : > { %2897 = vmax.xlane.f32.xlu2 %v2896_v54 }
 0x4bd   : > { %v1945_v50 = vpop.xlane.xlu0 %1944 }
 0x4be   : > { %5384 = vrcp.f32 %v1945_v50  ;;  %v5178_v50 = vunpack.i.l.bf16 %v6852_v3 }
 0x4bf   : > { %5386 = vpow2.f32 %v1926_v44 }
 0x4c0   : > { %5388 = vrcp.f32 %v1948_v26  ;;  %v5213_v26 = vunpack.i.l.bf16 %v7067_v30 }
 0x4c1   : > { %1992 = vadd.xlane.f32.xlu0 %v1991_v61  ;;  %5390 = vpow2.f32 %v1930_v58  ;;  %v5230_v61 = vpack.i.bf16 %v6593_v39, %v6630_v11 }
 0x4c2   : > { %2900 = vmax.xlane.f32.xlu2 %v2899_v29 }
 0x4c4   : > { %v5385_v17 = vpop.eup %5384 }
 0x4c5   : > { %v7316_v2 = vpop.eup %5386  ;;  %v2033_v23 = vmul.f32 %v5385_v17, %v7173_v0  ;;  %v1951_v48 = vpop.xlane.xlu0 %1950  ;;  %v1928_v17 = vmul.f32 1.442695, %v1883_v60 }
 0x4c6   : > { %v1994_v7 = vsel %vm1789_vm2, %v7316_v2, 0.0  ;;  %v5389_v62 = vpop.eup %5388  ;;  %5392 = vrcp.f32 %v1951_v48 }
 0x4c7   : > { %4945 = vmatmul.msk.f32.vlgmr.msrb.gmra.mxu3 %vm1789_vm2, %v2033_v23  ;;  %v2034_v21 = vmul.f32 %v5389_v62, %v7163_v52  ;;  %v7327_v53 = vpop.eup %5390  ;;  %v5168_v52 = vunpack.i.l.bf16 %v6848_v19  ;;  %v2703_v23 = vpop.f32.mrf.mxu0 }
 0x4c8   : > { %2305 = vmatpush.msrb.mxu3 %v5209_v43  ;;  %v2000_v54 = vsel %vm1789_vm2, %v7327_v53, 0.0  ;;  %v2823_v43 = vmul.f32 0.5, %v2703_v23 }
 0x4c9   : > { %1995 = vadd.xlane.f32.xlu0 %v1994_v7 }
 0x4ca   : > { %2306 = vmatpush.msrb.mxu3 %v5179_v6  ;;  %v7359_v7 = vadd.f32 %v2823_v43, %v6863_v34 }
 0x4cc   : > { %2307 = vmatpush.msrb.mxu3 %v5169_v22  ;;  %v5393_v16 = vpop.eup %5392  ;;  %v2905_v22 = vsel %vm1789_vm2, %v7359_v7, -inf }
 0x4cd   : > { %v1954_v0 = vpop.xlane.xlu0 %1953  ;;  %v2035_v44 = vmul.f32 %v5393_v16, %v7183_v49  ;;  %v3015_v16 = vpop.xlane.xlu1 %3014 }
 0x4ce   : > { %5394 = vrcp.f32 %v1954_v0 }
 0x4cf   : > { %4946 = vmatmul.msk.f32.gmra.mxu3 %vm1789_vm2, %v2034_v21  ;;  %5396 = vrcp.f32 %v7289_v12  ;;  %v2892_v12 = vpop.xlane.xlu2 %2891 }
 0x4d0   : > { %5398 = vpow2.f32 %v1928_v17  ;;  %v2938_v48 = vsub.f32 %v7171_v55, %v2892_v12 }
 0x4d4   : > { %v5395_v63 = vpop.eup %5394 }
 0x4d5   : > { %v2036_v38 = vmul.f32 %v5395_v63, %v7187_v25  ;;  %2001 = vadd.xlane.f32.xlu1 %v2000_v54  ;;  %v7340_v25 = vadd.f32 %v2822_v20, %v6863_v34  ;;  %v5397_v39 = vpop.eup %5396 }
 0x4d6   : > { %v3097_v29 = vmul.f32 %v5397_v39, %v7161_v59  ;;  %v7356_v6 = vpop.eup %5398  ;;  %v2974_v59 = vmul.f32 1.442695, %v2938_v48  ;;  %v5194_v39 = vunpack.i.h.bf16 %v6909_v57  ;;  %v8482_v48 = vld [vmem:[#allocation39_spill] sm:$0xff] }
 0x4d7   : > { %4947 = vmatmul.msk.f32.gmra.mxu3 %vm1789_vm2, %v2035_v44  ;;  %4948 = vmatmul.msk.f32.vlgmr.msra.gmra.mxu2 %vm1789_vm2, %v2036_v38  ;;  %v2902_v3 = vsel %vm1789_vm2, %v7340_v25, -inf  ;;  %v1997_v62 = vsel %vm1789_vm2, %v7356_v6, 0.0  ;;  %v7374_v44 = vpop.permute.xlu1 %5221 }
 0x4d8   : > { %2349 = vmatpush.msra.mxu2 %v5178_v50 }
 0x4da   : > { %2350 = vmatpush.msra.mxu2 %v5168_v52  ;;  %5231 = vrot.lane.b32.xlu2 %v5230_v61, %s5683_s28 }
 0x4dc   : > { %2351 = vmatpush.msra.mxu2 %v5213_v26 }
 0x4dd   : > { %2758 = vrot.lane.b32.xlu0 %v6644_v35, %s5679_s26  ;;  %2903 = vmax.xlane.f32.xlu1 %v2902_v3  ;;  %v7353_v35 = vpop.permute.xlu2 %5226  ;;  %v5214_v3 = vunpack.i.h.bf16 %v7067_v30 }
 0x4e0   : > { %v5217_v19 = vpop.permute.xlu0 %5216 }
 0x4e1   : > { %v5218_v11 = vunpack.i.l.bf16 %v5217_v19  ;;  %v5219_v49 = vunpack.i.h.bf16 %v5217_v19  ;;  %v5193_v19 = vunpack.i.l.bf16 %v6909_v57 }
 0x4e3   : > { %3194 = vmatpush.msrb.mxu0 %v5218_v11 }
 0x4e5   : > { %3195 = vmatpush.msrb.mxu0 %v5219_v49 }
 0x4e6   : > { %5017 = vmatmul.msk.f32.vlgmr.msrb.gmra.mxu0 %vm1789_vm2, %v3097_v29 }
 0x4f5   : > { %v1978_v49 = vpop.xlane.xlu1 %1977 }
 0x4fd   : > { %v1957_v58 = vpop.xlane.xlu2 %1956 }
 0x4fe   : > { %5400 = vrcp.f32 %v1957_v58 }
 0x4ff   : > { %5402 = vpow2.f32 %v2974_v59 }
 0x503   : > { %1998 = vadd.xlane.f32.xlu2 %v1997_v62 }
 0x504   : > { %v5401_v28 = vpop.eup %5400 }
 0x505   : > { %v1960_v8 = vpop.xlane.xlu2 %1959  ;;  %v2037_v55 = vmul.f32 %v5401_v28, %v7209_v13  ;;  %v7367_v0 = vpop.eup %5402 }
 0x506   : > { %5404 = vrcp.f32 %v1960_v8  ;;  %v3034_v20 = vsel %vm1789_vm2, %v7367_v0, 0.0 }
 0x507   : > { %2906 = vmax.xlane.f32.xlu0 %v2905_v22  ;;  %4949 = vmatmul.msk.f32.gmra.mxu2 %vm1789_vm2, %v2037_v55  ;;  %v8483_v55 = vld [vmem:[#allocation59_spill] sm:$0xff] }
 0x50b   : > { %v3012_v21 = vpop.xlane.xlu0 %3011 }
 0x50c   : > { %5406 = vrcp.f32 %v3012_v21  ;;  %v5405_v18 = vpop.eup %5404  ;;  %v1885_v21 = vsub.f32 %v8483_v55, %v7298_v41 }
 0x50d   : > { %v1963_v63 = vpop.xlane.xlu2 %1962  ;;  %v2038_v38 = vmul.f32 %v5405_v18, %v7223_v36 }
 0x50e   : > { %5408 = vrcp.f32 %v1963_v63  ;;  %v1932_v63 = vmul.f32 1.442695, %v1885_v21 }
 0x50f   : > { %3035 = vadd.xlane.f32.xlu0 %v3034_v20  ;;  %4950 = vmatmul.msk.f32.gmra.mxu2 %vm1789_vm2, %v2038_v38  ;;  %5410 = vrcp.f32 %v3015_v16  ;;  %v8484_v38 = vld [vmem:[#allocation50_spill] sm:$0xff] }
 0x512   : > { %v5407_v13 = vpop.eup %5406 }
 0x513   : > { %v3098_v54 = vmul.f32 %v5407_v13, %v7232_v9 }
 0x514   : > { %v1966_v50 = vpop.xlane.xlu0 %1965  ;;  %v5409_v52 = vpop.eup %5408 }
 0x515   : > { %5412 = vrcp.f32 %v1966_v50  ;;  %5018 = vmatmul.msk.f32.gmra.mxu0 %vm1789_vm2, %v3098_v54  ;;  %v2039_v61 = vmul.f32 %v5409_v52, %v7235_v32  ;;  %v1972_v26 = vpop.xlane.xlu2 %1971  ;;  %v5411_v36 = vpop.eup %5410  ;;  %v8485_v54 = vld [vmem:[#allocation52_spill] sm:$0xff]  ;;  %v8486_v52 = vld [vmem:[#allocation49_spill] sm:$0xff] }
 0x516   : > { %5414 = vrcp.f32 %v1972_v26  ;;  %v3099_v11 = vmul.f32 %v5411_v36, %v7135_v42 }
 0x517   : > { %4951 = vmatmul.msk.f32.vlgmr.msra.gmra.mxu3 %vm1789_vm2, %v2039_v61 }
 0x518   : > { %2393 = vmatpush.msra.mxu3 %v5214_v3  ;;  %v8487_v3 = vld [vmem:[#allocation44_spill] sm:$0xff] }
 0x51a   : > { %2394 = vmatpush.msra.mxu3 %v5193_v19  ;;  %v8488_v19 = vld [vmem:[#allocation47_spill] sm:$0xff] }
 0x51b   : > { %v5413_v9 = vpop.eup %5412  ;;  %5241 = vrot.lane.b32.xlu2 %v6808_v4, %s5683_s28  ;;  %v5235_v4 = vpack.i.bf16 %v6492_v45, %v6508_v1 }
 0x51c   : > { %v1975_v29 = vpop.xlane.xlu0 %1974  ;;  %v5415_v32 = vpop.eup %5414  ;;  %2395 = vmatpush.msra.mxu3 %v5194_v39  ;;  %v2040_v60 = vmul.f32 %v5413_v9, %v7242_v5 }
 0x51d   : > { %5416 = vrcp.f32 %v1975_v29  ;;  %5019 = vmatmul.msk.f32.gmra.mxu0 %vm1789_vm2, %v3099_v11  ;;  %v2042_v30 = vmul.f32 %v5415_v32, %v7247_v24  ;;  %v1990_v12 = vpop.xlane.xlu2 %1989  ;;  %v8481_v24 = vld [vmem:[#allocation42_spill] sm:$0xff]  ;;  %v1981_v5 = vpop.xlane.xlu1 %1980 }
 0x51e   : > { %5418 = vrcp.f32 %v1978_v49  ;;  %v8489_v49 = vld [vmem:[#allocation54_spill] sm:$0xff] }
 0x51f   : > { %4952 = vmatmul.msk.f32.gmra.mxu3 %vm1789_vm2, %v2040_v60  ;;  %4954 = vmatmul.msk.f32.vlgmr.msrb.gmra.mxu2 %vm1789_vm2, %v2042_v30 }
 0x520   : > { %4978 = vmatpush.xpose.msk.msrb.mxu2 %vm1373_vm15, %v6846_v33 }
 0x523   : > { %v5417_v57 = vpop.eup %5416  ;;  %5236 = vrot.lane.b32.xlu0 %v5235_v4, %s5683_s28 }
 0x524   : > { %v1969_v42 = vpop.xlane.xlu0 %1968  ;;  %4979 = vmatpush.xpose.msk.msrb.mxu2 %vm1373_vm15, %v8481_v24  ;;  %v2043_v23 = vmul.f32 %v5417_v57, %v7262_v31  ;;  %v5419_v33 = vpop.eup %5418  ;;  %v5223_v57 = vunpack.i.l.bf16 %v7374_v44 }
 0x525   : > { %5420 = vrcp.f32 %v1969_v42  ;;  %v1987_v17 = vpop.xlane.xlu2 %1986  ;;  %v2044_v62 = vmul.f32 %v5419_v33, %v7201_v47  ;;  %v1984_v8 = vpop.xlane.xlu1 %1983  ;;  %v8490_v42 = vld [vmem:[#allocation36_spill] sm:$0xff] }
 0x526   : > { %5422 = vrcp.f32 %v1981_v5 }
 0x527   : > { %4955 = vmatmul.msk.f32.gmra.mxu2 %vm1789_vm2, %v2043_v23  ;;  %5424 = vrcp.f32 %v1990_v12  ;;  %v8491_v23 = vld [vmem:[#allocation40_spill] sm:$0xff] }
 0x528   : > { %4980 = vmatpush.xpose.msk.msrb.mxu2 %vm1373_vm15, %v8482_v48 }
 0x52b   : > { %v5421_v45 = vpop.eup %5420 }
 0x52c   : > { %v2895_v1 = vpop.xlane.xlu0 %2894  ;;  %v2041_v43 = vmul.f32 %v5421_v45, %v7274_v46  ;;  %v5423_v22 = vpop.eup %5422  ;;  %v8493_v45 = vld [vmem:[#allocation33_spill] sm:$0xff] }
 0x52d   : > { %v2939_v58 = vsub.f32 %v7287_v40, %v2895_v1  ;;  %v2898_v59 = vpop.xlane.xlu2 %2897  ;;  %v5425_v46 = vpop.eup %5424  ;;  %v2045_v40 = vmul.f32 %v5423_v22, %v7211_v15  ;;  %v8497_v22 = vld [vmem:[#allocation53_spill] sm:$0xff] }
 0x52e   : > { %4953 = vmatmul.msk.f32.gmra.mxu3 %vm1789_vm2, %v2041_v43  ;;  %v2940_v28 = vsub.f32 %v7294_v51, %v2898_v59  ;;  %v2048_v47 = vmul.f32 %v5425_v46, %v7265_v56  ;;  %v7438_v11 = vpop.permute.xlu1 %2760  ;;  %v8495_v43 = vld [vmem:[#allocation45_spill] sm:$0xff] }
 0x52f   : > { %v2976_v31 = vmul.f32 1.442695, %v2939_v58  ;;  %4956 = vmatmul.msk.f32.gmra.mxu2 %vm1789_vm2, %v2044_v62  ;;  %v7471_v58 = vpop.f32.mrf.mxu2  ;;  %v8496_v62 = vld [vmem:[#allocation56_spill] sm:$0xff] }
 0x530   : > { %v2978_v16 = vmul.f32 1.442695, %v2940_v28 }
 0x531   : > { %5426 = vpow2.f32 %v2976_v31 }
 0x532   : > { %5428 = vrcp.f32 %v1984_v8 }
 0x534   : > { %v1993_v18 = vpop.xlane.xlu0 %1992 }
 0x535   : > { %5430 = vrcp.f32 %v1993_v18  ;;  %v2901_v51 = vpop.xlane.xlu2 %2900 }
 0x536   : > { %4957 = vmatmul.msk.f32.vlgmr.msrb.gmra.mxu3 %vm1789_vm2, %v2045_v40  ;;  %5432 = vpow2.f32 %v2978_v16  ;;  %v2941_v41 = vsub.f32 %v7309_v14, %v2901_v51  ;;  %v8498_v51 = vld [vmem:[#allocation58_spill] sm:$0xff] }
 0x537   : > { %v7412_v20 = vpop.eup %5426  ;;  %4984 = vmatpush.xpose.msk.msrb.mxu3 %vm1373_vm15, %v8484_v38  ;;  %4960 = vmatmul.msk.f32.vlgmr.msra.gmra.mxu2 %vm1789_vm2, %v2048_v47  ;;  %5434 = vpow2.f32 %v1932_v63  ;;  %v7479_v28 = vpop.f32.mrf.mxu2 }
 0x538   : > { %v3037_v13 = vsel %vm1789_vm2, %v7412_v20, 0.0  ;;  %v5429_v15 = vpop.eup %5428  ;;  %5002 = vmatpush.xpose.msk.msra.mxu2 %vm1373_vm15, %v8485_v54  ;;  %5436 = vrcp.f32 %v1987_v17  ;;  %v2980_v50 = vmul.f32 1.442695, %v2941_v41  ;;  %v8500_v54 = vld [vmem:[#allocation46_spill] sm:$0xff] }
 0x539   : > { %3038 = vadd.xlane.f32.xlu1 %v3037_v13  ;;  %v2046_v14 = vmul.f32 %v5429_v15, %v7225_v10 }
 0x53b   : > { %v5431_v56 = vpop.eup %5430  ;;  %4985 = vmatpush.xpose.msk.msrb.mxu3 %vm1373_vm15, %v8486_v52 }
 0x53c   : > { %v1996_v61 = vpop.xlane.xlu0 %1995  ;;  %v7425_v26 = vpop.eup %5432  ;;  %5003 = vmatpush.xpose.msk.msra.mxu2 %vm1373_vm15, %v8487_v3  ;;  %v2049_v36 = vmul.f32 %v5431_v56, %v7306_v27 }
 0x53d   : > { %5438 = vrcp.f32 %v1996_v61  ;;  %v7433_v9 = vpop.eup %5434  ;;  %v3040_v39 = vsel %vm1789_vm2, %v7425_v26, 0.0  ;;  %v7473_v59 = vpop.permute.xlu2 %5231 }
 0x53e   : > { %4958 = vmatmul.msk.f32.gmra.mxu3 %vm1789_vm2, %v2046_v14  ;;  %5440 = vpow2.f32 %v2980_v50  ;;  %v5437_v10 = vpop.eup %5436  ;;  %v2003_v27 = vsel %vm1789_vm2, %v7433_v9, 0.0 }
 0x53f   : > { %4986 = vmatpush.xpose.msk.msrb.mxu3 %vm1373_vm15, %v8488_v19  ;;  %4961 = vmatmul.msk.f32.gmra.mxu2 %vm1789_vm2, %v2049_v36  ;;  %v2047_v32 = vmul.f32 %v5437_v10, %v7277_v37  ;;  %v5224_v37 = vunpack.i.h.bf16 %v7374_v44  ;;  %v8492_v44 = vld [vmem:[#allocation43_spill] sm:$0xff]  ;;  %v7485_v47 = vpop.f32.mrf.mxu2  ;;  %v8501_v36 = vld [vmem:[#allocation34_spill] sm:$0xff] }
 0x540   : > { %5004 = vmatpush.xpose.msk.msra.mxu2 %vm1373_vm15, %v8489_v49  ;;  %v8502_v19 = vld [vmem:[#allocation35_spill] sm:$0xff] }
 0x541   : > { %3041 = vadd.xlane.f32.xlu1 %v3040_v39  ;;  %v5250_v39 = vpack.i.bf16 %v8502_v19, %v8501_v36 }
 0x543   : > { %v5439_v29 = vpop.eup %5438 }
 0x544   : > { %v7445_v30 = vpop.eup %5440  ;;  %2004 = vadd.xlane.f32.xlu2 %v2003_v27  ;;  %v2050_v12 = vmul.f32 %v5439_v29, %v7316_v2  ;;  %v5228_v2 = vunpack.i.l.bf16 %v7353_v35 }
 0x545   : > { %v3043_v60 = vsel %vm1789_vm2, %v7445_v30, 0.0 }
 0x546   : > { %4959 = vmatmul.msk.f32.gmra.mxu3 %vm1789_vm2, %v2047_v32 }
 0x547   : > { %4962 = vmatmul.msk.f32.gmra.mxu2 %vm1789_vm2, %v2050_v12 }
 0x548   : > { %v2002_v4 = vpop.xlane.xlu1 %2001 }
 0x549   : > { %3044 = vadd.xlane.f32.xlu1 %v3043_v60 }
 0x54f   : > { %4981 = vmatmul.msk.f32.vlgmr.msrb.gmra.mxu2 %vm1373_vm15, %v8490_v42  ;;  %v7477_v31 = vpop.permute.xlu0 %2758 }
 0x550   : > { %v2904_v24 = vpop.xlane.xlu1 %2903  ;;  %3237 = vmatpush.msrb.mxu2 %v5223_v57 }
 0x551   : > { %v2942_v5 = vsub.f32 %v7340_v25, %v2904_v24  ;;  %v8494_v25 = vld [vmem:[#allocation32_spill] sm:$0xff] }
 0x552   : > { %3238 = vmatpush.msrb.mxu2 %v5224_v37  ;;  %v5245_v1 = vpack.i.bf16 %v8494_v25, %v8493_v45  ;;  %v5234_v45 = vunpack.i.h.bf16 %v7473_v59 }
 0x553   : > { %v2982_v17 = vmul.f32 1.442695, %v2942_v5 }
 0x554   : > { %3239 = vmatpush.msrb.mxu2 %v5228_v2 }
 0x555   : > { %5442 = vpow2.f32 %v2982_v17 }
 0x557   : > { %4982 = vmatmul.msk.f32.gmra.mxu2 %vm1373_vm15, %v8491_v23  ;;  %v8503_v23 = vld [vmem:[#allocation48_spill] sm:$0xff] }
 0x55a   : > { %v7497_v15 = vpop.f32.mrf.mxu2 }
 0x55b   : > { %v7460_v48 = vpop.eup %5442 }
 0x55c   : > { %v3046_v33 = vsel %vm1789_vm2, %v7460_v48, 0.0 }
 0x55d   : > { %3047 = vadd.xlane.f32.xlu2 %v3046_v33  ;;  %v5233_v33 = vunpack.i.l.bf16 %v7473_v59 }
 0x55f   : > { %4983 = vmatmul.msk.f32.gmra.mxu2 %vm1373_vm15, %v8492_v44 }
 0x562   : > { %5246 = vrot.lane.b32.xlu1 %v5245_v1, %s5683_s28 }
 0x567   : > { %5005 = vmatmul.msk.f32.vlgmr.msra.gmra.mxu2 %vm1373_vm15, %v8495_v43 }
 0x56f   : > { %5006 = vmatmul.msk.f32.gmra.mxu2 %vm1373_vm15, %v8496_v62 }
 0x576   : > { %v1999_v8 = vpop.xlane.xlu2 %1998 }
 0x577   : > { %5444 = vrcp.f32 %v1999_v8  ;;  %5007 = vmatmul.msk.f32.gmra.mxu2 %vm1373_vm15, %v8497_v22 }
 0x578   : > { %5446 = vrcp.f32 %v2002_v4 }
 0x57a   : > { %v2907_v55 = vpop.xlane.xlu0 %2906 }
 0x57b   : > { %v2943_v21 = vsub.f32 %v7359_v7, %v2907_v55  ;;  %v8499_v7 = vld [vmem:[#allocation57_spill] sm:$0xff] }
 0x57d   : > { %v2984_v46 = vmul.f32 1.442695, %v2943_v21  ;;  %v5445_v16 = vpop.eup %5444 }
 0x57e   : > { %v2051_v40 = vmul.f32 %v5445_v16, %v7356_v6  ;;  %v5242_v18 = vpop.permute.xlu2 %5241  ;;  %v5447_v38 = vpop.eup %5446 }
 0x57f   : > { %5448 = vpow2.f32 %v2984_v46  ;;  %v5244_v63 = vunpack.i.h.bf16 %v5242_v18  ;;  %v2052_v13 = vmul.f32 %v5447_v38, %v7327_v53  ;;  %v5243_v53 = vunpack.i.l.bf16 %v5242_v18  ;;  %v8505_v46 = vld [vmem:[#allocation51_spill] sm:$0xff] }
 0x580   : > { %4963 = vmatmul.msk.f32.vlgmr.msra.gmra.mxu3 %vm1789_vm2, %v2051_v40 }
 0x581   : > { %5008 = vmatpush.xpose.msk.msra.mxu3 %vm1373_vm15, %v8498_v51  ;;  %3369 = vmatpush.msra.mxu0 %v5244_v63  ;;  %v7548_v51 = vpop.f32.mrf.mxu3 }
 0x582   : > { %v3036_v56 = vpop.xlane.xlu0 %3035 }
 0x583   : > { %5450 = vrcp.f32 %v3036_v56  ;;  %v3153_v56 = vpop.f32.mrf.mxu1 }
 0x585   : > { %v7490_v41 = vpop.eup %5448  ;;  %5009 = vmatpush.xpose.msk.msra.mxu3 %vm1373_vm15, %v8499_v7  ;;  %v8506_v7 = vld [vmem:[#allocation55_spill] sm:$0xff] }
 0x586   : > { %v3049_v6 = vsel %vm1789_vm2, %v7490_v41, 0.0 }
 0x587   : > { %3050 = vadd.xlane.f32.xlu0 %v3049_v6 }
 0x588   : > { %4964 = vmatmul.msk.f32.gmra.mxu3 %vm1789_vm2, %v2052_v13 }
 0x589   : > { %5010 = vmatpush.xpose.msk.msra.mxu3 %vm1373_vm15, %v8500_v54  ;;  %v5451_v14 = vpop.eup %5450 }
 0x58a   : > { %v7502_v50 = vpop.f32.mrf.mxu2  ;;  %v3106_v10 = vmul.f32 %v5451_v14, %v7367_v0 }
 0x592   : > { %v7507_v49 = vpop.f32.mrf.mxu2 }
 0x595   : > { %v5237_v52 = vpop.permute.xlu0 %5236 }
 0x596   : > { %v5238_v61 = vunpack.i.l.bf16 %v5237_v52  ;;  %v5239_v3 = vunpack.i.h.bf16 %v5237_v52 }
 0x598   : > { %3325 = vmatpush.msra.mxu1 %v5238_v61  ;;  %v7561_v61 = vpop.f32.mrf.mxu3 }
 0x59a   : > { %3326 = vmatpush.msra.mxu1 %v5239_v3 }
 0x59b   : > { %5251 = vrot.lane.b32.xlu0 %v5250_v39, %s5683_s28 }
 0x59c   : > { %3327 = vmatpush.msra.mxu1 %v5243_v53  ;;  %v8507_v53 = vld [vmem:[#allocation38_spill] sm:$0xff] }
 0x59d   : > { %5026 = vmatmul.msk.f32.vlgmr.msra.gmra.mxu1 %vm1789_vm2, %v3106_v10 }
 0x5a0   : > { %v7568_v14 = vpop.f32.mrf.mxu3 }
 0x5a2   : > { %v7511_v29 = vpop.f32.mrf.mxu2 }
 0x5a8   : > { %v7571_v19 = vpop.f32.mrf.mxu3 }
 0x5aa   : > { %v7513_v27 = vpop.f32.mrf.mxu2 }
 0x5ac   : > { %v3039_v32 = vpop.xlane.xlu1 %3038 }
 0x5ad   : > { %5452 = vrcp.f32 %v3039_v32 }
 0x5b2   : > { %v7515_v60 = vpop.f32.mrf.mxu2 }
 0x5b3   : > { %v5453_v12 = vpop.eup %5452 }
 0x5b4   : > { %v3042_v4 = vpop.xlane.xlu1 %3041  ;;  %v3107_v57 = vmul.f32 %v5453_v12, %v7412_v20  ;;  %v5229_v20 = vunpack.i.h.bf16 %v7353_v35 }
 0x5b5   : > { %5454 = vrcp.f32 %v3042_v4  ;;  %v3197_v4 = vpop.f32.mrf.mxu0 }
 0x5b6   : > { %5027 = vmatmul.msk.f32.gmra.mxu1 %vm1789_vm2, %v3107_v57 }
 0x5b7   : > { %v2005_v0 = vpop.xlane.xlu2 %2004 }
 0x5b8   : > { %5456 = vrcp.f32 %v2005_v0 }
 0x5ba   : > { %v7519_v37 = vpop.f32.mrf.mxu2 }
 0x5bb   : > { %v5455_v42 = vpop.eup %5454 }
 0x5bc   : > { %v3108_v24 = vmul.f32 %v5455_v42, %v7425_v26  ;;  %v3045_v26 = vpop.xlane.xlu1 %3044 }
 0x5bd   : > { %5458 = vrcp.f32 %v3045_v26 }
 0x5be   : > { %5028 = vmatmul.msk.f32.gmra.mxu1 %vm1789_vm2, %v3108_v24  ;;  %v5457_v5 = vpop.eup %5456 }
 0x5bf   : > { %v2053_v2 = vmul.f32 %v5457_v5, %v7433_v9  ;;  %v8504_v9 = vld [vmem:[#allocation41_spill] sm:$0xff] }
 0x5c1   : > { %4965 = vmatmul.msk.f32.gmra.mxu3 %vm1789_vm2, %v2053_v2 }
 0x5c2   : > { %v7525_v17 = vpop.f32.mrf.mxu2 }
 0x5c3   : > { %v5459_v62 = vpop.eup %5458 }
 0x5c4   : > { %v3109_v59 = vmul.f32 %v5459_v62, %v7445_v30 }
 0x5c9   : > { %4987 = vmatmul.msk.f32.vlgmr.msrb.gmra.mxu3 %vm1373_vm15, %v8503_v23 }
 0x5ca   : > { %3281 = vmatpush.msrb.mxu3 %v5229_v20  ;;  %v7531_v44 = vpop.f32.mrf.mxu2 }
 0x5cc   : > { %3282 = vmatpush.msrb.mxu3 %v5233_v33 }
 0x5ce   : > { %3283 = vmatpush.msrb.mxu3 %v5234_v45 }
 0x5d0   : > { %v3048_v1 = vpop.xlane.xlu2 %3047 }
 0x5d1   : > { %4988 = vmatmul.msk.f32.gmra.mxu3 %vm1373_vm15, %v8504_v9  ;;  %5460 = vrcp.f32 %v3048_v1 }
 0x5d2   : > { %v2547_v25 = vpop.f32.mrf.mxu2 }
 0x5d3   : > { %v2812_v43 = vmul.f32 0.5, %v2547_v25 }
 0x5d4   : > { %v5247_v35 = vpop.permute.xlu1 %5246 }
 0x5d5   : > { %v5248_v8 = vunpack.i.l.bf16 %v5247_v35  ;;  %v7537_v22 = vadd.f32 %v2812_v43, %v6863_v34  ;;  %v5249_v55 = vunpack.i.h.bf16 %v5247_v35 }
 0x5d7   : > { %3370 = vmatpush.msra.mxu0 %v5248_v8  ;;  %v2872_v21 = vsel %vm1789_vm2, %v7537_v22, -inf  ;;  %v5461_v18 = vpop.eup %5460 }
 0x5d8   : > { %2873 = vmax.xlane.f32.xlu1 %v2872_v21  ;;  %v3110_v30 = vmul.f32 %v5461_v18, %v7460_v48  ;;  %v3156_v48 = vpop.f32.mrf.mxu1 }
 0x5d9   : > { %3371 = vmatpush.msra.mxu0 %v5249_v55  ;;  %4989 = vmatmul.msk.f32.gmra.mxu3 %vm1373_vm15, %v8505_v46 }
 0x5da   : > { %5029 = vmatmul.msk.f32.vlgmr.msra.gmra.mxu0 %vm1789_vm2, %v3109_v59  ;;  %v2550_v16 = vpop.f32.mrf.mxu2 }
 0x5db   : > { %v2813_v40 = vmul.f32 0.5, %v2550_v16 }
 0x5dd   : > { %v7546_v63 = vadd.f32 %v2813_v40, %v6863_v34 }
 0x5df   : > { %v2875_v38 = vsel %vm1789_vm2, %v7546_v63, -inf }
 0x5e0   : > { %2876 = vmax.xlane.f32.xlu2 %v2875_v38  ;;  %v3159_v3 = vpop.f32.mrf.mxu1 }
 0x5e1   : > { %5011 = vmatmul.msk.f32.vlgmr.msra.gmra.mxu3 %vm1373_vm15, %v8506_v7 }
 0x5e2   : > { %5030 = vmatmul.msk.f32.gmra.mxu0 %vm1789_vm2, %v3110_v30  ;;  %v2553_v6 = vpop.f32.mrf.mxu2 }
 0x5e3   : > { %v2814_v13 = vmul.f32 0.5, %v2553_v6 }
 0x5e5   : > { %v7557_v54 = vadd.f32 %v2814_v13, %v6863_v34 }
 0x5e7   : > { %v2878_v52 = vsel %vm1789_vm2, %v7557_v54, -inf }
 0x5e8   : > { %2879 = vmax.xlane.f32.xlu2 %v2878_v52 }
 0x5e9   : > { %5012 = vmatmul.msk.f32.gmra.mxu3 %vm1373_vm15, %v7477_v31 }
 0x5ea   : > { %v2747_v24 = vpop.f32.mrf.mxu2 }
 0x5eb   : > { %v2824_v5 = vmul.f32 0.5, %v2747_v24 }
 0x5ed   : > { %v7592_v20 = vadd.f32 %v2824_v5, %v6863_v34 }
 0x5ef   : > { %v2908_v23 = vsel %vm1789_vm2, %v7592_v20, -inf }
 0x5f1   : > { %5013 = vmatmul.msk.f32.gmra.mxu3 %vm1373_vm15, %v7438_v11  ;;  %3494 = vrot.lane.b32.xlu1 %v3153_v56, %s5685_s29  ;;  %v7577_v11 = vpop.f32.mrf.mxu3 }
 0x5f2   : > { %v2750_v45 = vpop.f32.mrf.mxu2 }
 0x5f3   : > { %v2825_v24 = vmul.f32 0.5, %v2750_v45 }
 0x5f5   : > { %v7639_v5 = vadd.f32 %v2825_v24, %v6863_v34 }
 0x5f9   : > { %3498 = vrot.lane.b32.xlu1 %v3159_v3, %s5685_s29  ;;  %v7580_v10 = vpop.f32.mrf.mxu3 }
 0x5fa   : > { %v3051_v36 = vpop.xlane.xlu0 %3050  ;;  %v2753_v59 = vpop.f32.mrf.mxu2 }
 0x5fb   : > { %5462 = vrcp.f32 %v3051_v36  ;;  %v2826_v40 = vmul.f32 0.5, %v2753_v59 }
 0x5fd   : > { %v7613_v6 = vadd.f32 %v2826_v40, %v6863_v34 }
 0x600   : > { %5261 = vrot.lane.b32.xlu2 %v8507_v53, %s5683_s28  ;;  %v8508_v53 = vld [vmem:[#allocation37_spill] sm:$0xff] }
 0x601   : > { %v5463_v39 = vpop.eup %5462  ;;  %v7583_v0 = vpop.f32.mrf.mxu3 }
 0x602   : > { %v3111_v31 = vmul.f32 %v5463_v39, %v7490_v41 }
 0x604   : > { %5031 = vmatmul.msk.f32.gmra.mxu0 %vm1789_vm2, %v3111_v31 }
 0x608   : > { %3496 = vrot.lane.b32.xlu2 %v3156_v48, %s5685_s29  ;;  %v2914_v48 = vsel %vm1789_vm2, %v7613_v6, -inf }
 0x609   : > { %v7585_v42 = vpop.f32.mrf.mxu3 }
 0x60d   : > { %v5252_v32 = vpop.permute.xlu0 %5251 }
 0x60e   : > { %v5253_v12 = vunpack.i.l.bf16 %v5252_v32  ;;  %v5254_v57 = vunpack.i.h.bf16 %v5252_v32 }
 0x610   : > { %3413 = vmatpush.msra.mxu2 %v5253_v12  ;;  %3500 = vrot.lane.b32.xlu2 %v3197_v4, %s5685_s29  ;;  %v3200_v4 = vpop.f32.mrf.mxu0 }
 0x611   : > { %v7587_v41 = vpop.f32.mrf.mxu3 }
 0x612   : > { %3414 = vmatpush.msra.mxu2 %v5254_v57 }
 0x618   : > { %v3203_v57 = vpop.f32.mrf.mxu0 }
 0x619   : > { %v7589_v2 = vpop.f32.mrf.mxu3 }
 0x621   : > { %v7596_v33 = vpop.f32.mrf.mxu3 }
 0x639   : > { %2909 = vmax.xlane.f32.xlu2 %v2908_v23 }
 0x644   : > { %v7598_v26 = vpop.f32.mrf.mxu3 }
 0x64b   : > { %v2874_v62 = vpop.xlane.xlu1 %2873 }
 0x64c   : > { %v2597_v9 = vpop.f32.mrf.mxu3  ;;  %v2932_v21 = vsub.f32 %v7537_v22, %v2874_v62 }
 0x64d   : > { %v2815_v25 = vmul.f32 0.5, %v2597_v9 }
 0x64e   : > { %v2962_v30 = vmul.f32 1.442695, %v2932_v21 }
 0x64f   : > { %v7601_v1 = vadd.f32 %v2815_v25, %v6863_v34  ;;  %v2911_v25 = vsel %vm1789_vm2, %v7639_v5, -inf }
 0x650   : > { %5464 = vpow2.f32 %v2962_v30 }
 0x651   : > { %v2881_v35 = vsel %vm1789_vm2, %v7601_v1, -inf }
 0x652   : > { %2882 = vmax.xlane.f32.xlu0 %v2881_v35 }
 0x653   : > { %v2877_v43 = vpop.xlane.xlu2 %2876 }
 0x654   : > { %v2600_v8 = vpop.f32.mrf.mxu3  ;;  %v2933_v16 = vsub.f32 %v7546_v63, %v2877_v43 }
 0x655   : > { %v2816_v55 = vmul.f32 0.5, %v2600_v8 }
 0x656   : > { %v2964_v38 = vmul.f32 1.442695, %v2933_v16  ;;  %v7623_v36 = vpop.eup %5464 }
 0x657   : > { %v7607_v46 = vadd.f32 %v2816_v55, %v6863_v34  ;;  %v3016_v31 = vsel %vm1789_vm2, %v7623_v36, 0.0 }
 0x658   : > { %5466 = vpow2.f32 %v2964_v38 }
 0x659   : > { %v2884_v18 = vsel %vm1789_vm2, %v7607_v46, -inf }
 0x65a   : > { %2885 = vmax.xlane.f32.xlu1 %v2884_v18 }
 0x65b   : > { %v2880_v13 = vpop.xlane.xlu2 %2879 }
 0x65c   : > { %v2603_v7 = vpop.f32.mrf.mxu3  ;;  %v2934_v63 = vsub.f32 %v7557_v54, %v2880_v13 }
 0x65d   : > { %v2817_v56 = vmul.f32 0.5, %v2603_v7  ;;  %v8509_v7 = vld [vmem:[#allocation11_spill] sm:$0xff] }
 0x65e   : > { %v2966_v3 = vmul.f32 1.442695, %v2934_v63  ;;  %v7625_v39 = vpop.eup %5466 }
 0x65f   : > { %v7616_v22 = vadd.f32 %v2817_v56, %v6863_v34  ;;  %v3019_v54 = vsel %vm1789_vm2, %v7625_v39, 0.0 }
 0x660   : > { %5468 = vpow2.f32 %v2966_v3 }
 0x661   : > { %v2887_v52 = vsel %vm1789_vm2, %v7616_v22, -inf }
 0x662   : > { %2888 = vmax.xlane.f32.xlu2 %v2887_v52  ;;  %2915 = vmax.xlane.f32.xlu1 %v2914_v48 }
 0x663   : > { %v5262_v35 = vpop.permute.xlu2 %5261  ;;  %v3495_v55 = vpop.permute.xlu1 %3494 }
 0x664   : > { %v2797_v23 = vpop.f32.mrf.mxu3 }
 0x665   : > { %v2827_v9 = vmul.f32 0.5, %v2797_v23 }
 0x666   : > { %5256 = vrot.lane.b32.xlu0 %v8508_v53, %s5683_s28  ;;  %v7633_v32 = vpop.eup %5468 }
 0x667   : > { %v3022_v12 = vsel %vm1789_vm2, %v7633_v32, 0.0  ;;  %v7645_v43 = vadd.f32 %v2827_v9, %v6863_v34 }
 0x669   : > { %v2917_v62 = vsel %vm1789_vm2, %v7645_v43, -inf }
 0x66a   : > { %3020 = vadd.xlane.f32.xlu2 %v3019_v54  ;;  %3017 = vadd.xlane.f32.xlu1 %v3016_v31 }
 0x66b   : > { %v7649_v45 = vpop.permute.xlu2 %3496  ;;  %v3499_v40 = vpop.permute.xlu1 %3498 }
 0x66c   : > { %v3568_v38 = vsel %vm1373_vm15, %v7485_v47, %v3499_v40 }
 0x66d   : > { %v7659_v13 = vadd.f32 %v3568_v38, %v8509_v7  ;;  %v8510_v38 = vld [vmem:[#allocation7_spill] sm:$0xff] }
 0x66f   : > { %v3620_v56 = vsel %vm658_vm1, %v7659_v13, 0.0 }
 0x672   : > { %3023 = vadd.xlane.f32.xlu1 %v3022_v12 }
 0x673   : > { %v3501_v8 = vpop.permute.xlu2 %3500 }
 0x682   : > { %3504 = vrot.lane.b32.xlu2 %v3203_v57, %s5685_s29 }
 0x68b   : > { %3502 = vrot.lane.b32.xlu1 %v3200_v4, %s5685_s29 }
 0x690   : > { %2912 = vmax.xlane.f32.xlu0 %v2911_v25  ;;  %v5263_v25 = vunpack.i.l.bf16 %v5262_v35 }
 0x698   : > { %2918 = vmax.xlane.f32.xlu0 %v2917_v62  ;;  %v5264_v62 = vunpack.i.h.bf16 %v5262_v35 }
 0x6ac   : > { %v2910_v59 = vpop.xlane.xlu2 %2909 }
 0x6ad   : > { %v2944_v21 = vsub.f32 %v7592_v20, %v2910_v59 }
 0x6af   : > { %v2986_v16 = vmul.f32 1.442695, %v2944_v21 }
 0x6b1   : > { %5470 = vpow2.f32 %v2986_v16  ;;  %v3566_v16 = vsel %vm1373_vm15, %v7471_v58, %v3495_v55  ;;  %v8511_v55 = vld [vmem:[#allocation13_spill] sm:$0xff] }
 0x6b2   : > { %v7683_v7 = vadd.f32 %v3566_v16, %v8510_v38 }
 0x6b7   : > { %v7652_v18 = vpop.eup %5470 }
 0x6b8   : > { %v3052_v30 = vsel %vm1789_vm2, %v7652_v18, 0.0 }
 0x6b9   : > { %3053 = vadd.xlane.f32.xlu1 %v3052_v30 }
 0x6c1   : > { %3621 = vadd.xlane.f32.xlu1 %v3620_v56  ;;  %v3614_v56 = vsel %vm658_vm1, %v7683_v7, 0.0 }
 0x6c5   : > { %v2883_v20 = vpop.xlane.xlu0 %2882 }
 0x6c6   : > { %v2935_v63 = vsub.f32 %v7601_v1, %v2883_v20  ;;  %v3569_v20 = vsel %vm1373_vm15, %v7548_v51, %v3501_v8 }
 0x6c8   : > { %v2968_v52 = vmul.f32 1.442695, %v2935_v63 }
 0x6ca   : > { %5472 = vpow2.f32 %v2968_v52  ;;  %v7692_v52 = vadd.f32 %v3569_v20, %v8511_v55 }
 0x6cd   : > { %v2886_v48 = vpop.xlane.xlu1 %2885 }
 0x6ce   : > { %v2936_v3 = vsub.f32 %v7607_v46, %v2886_v48 }
 0x6d0   : > { %v7665_v53 = vpop.eup %5472  ;;  %v2970_v54 = vmul.f32 1.442695, %v2936_v3 }
 0x6d1   : > { %v3025_v47 = vsel %vm1789_vm2, %v7665_v53, 0.0 }
 0x6d2   : > { %5474 = vpow2.f32 %v2970_v54  ;;  %3026 = vadd.xlane.f32.xlu0 %v3025_v47  ;;  %v8512_v47 = vld [vmem:[#allocation15_spill] sm:$0xff] }
 0x6d5   : > { %v2889_v31 = vpop.xlane.xlu2 %2888  ;;  %v7669_v12 = vpop.xlane.xlu1 %2915 }
 0x6d6   : > { %v2937_v4 = vsub.f32 %v7616_v22, %v2889_v31 }
 0x6d8   : > { %v7672_v57 = vpop.eup %5474  ;;  %v2972_v1 = vmul.f32 1.442695, %v2937_v4  ;;  %v5257_v24 = vpop.permute.xlu0 %5256 }
 0x6d9   : > { %v5259_v23 = vunpack.i.h.bf16 %v5257_v24  ;;  %v5258_v9 = vunpack.i.l.bf16 %v5257_v24  ;;  %v3028_v46 = vsel %vm1789_vm2, %v7672_v57, 0.0 }
 0x6da   : > { %5476 = vpow2.f32 %v2972_v1  ;;  %3029 = vadd.xlane.f32.xlu0 %v3028_v46 }
 0x6db   : > { %3415 = vmatpush.msra.mxu2 %v5258_v9  ;;  %3457 = vmatpush.msra.mxu3 %v5259_v23  ;;  %v8513_v9 = vld [vmem:[#allocation9_spill] sm:$0xff] }
 0x6dd   : > { %3458 = vmatpush.msra.mxu3 %v5263_v25  ;;  %v3018_v59 = vpop.xlane.xlu1 %3017  ;;  %v3021_v40 = vpop.xlane.xlu2 %3020 }
 0x6de   : > { %5478 = vrcp.f32 %v3018_v59  ;;  %v8514_v59 = vld [vmem:[#allocation18_spill] sm:$0xff] }
 0x6df   : > { %3459 = vmatpush.msra.mxu3 %v5264_v62  ;;  %5480 = vrcp.f32 %v3021_v40 }
 0x6e0   : > { %v7676_v22 = vpop.eup %5476 }
 0x6e1   : > { %v3031_v21 = vsel %vm1789_vm2, %v7676_v22, 0.0 }
 0x6e2   : > { %3032 = vadd.xlane.f32.xlu0 %v3031_v21 }
 0x6e4   : > { %v5479_v30 = vpop.eup %5478 }
 0x6e5   : > { %v3100_v35 = vmul.f32 %v5479_v30, %v7623_v36  ;;  %v3024_v63 = vpop.xlane.xlu1 %3023  ;;  %v5481_v58 = vpop.eup %5480  ;;  %v3623_v36 = vsel %vm658_vm1, %v7692_v52, 0.0 }
 0x6e6   : > { %5482 = vrcp.f32 %v3024_v63  ;;  %v3101_v48 = vmul.f32 %v5481_v58, %v7625_v39  ;;  %v3505_v25 = vpop.permute.xlu2 %3504  ;;  %v3329_v63 = vpop.f32.mrf.mxu1 }
 0x6e7   : > { %5020 = vmatmul.msk.f32.vlgmr.msrb.gmra.mxu2 %vm1789_vm2, %v3100_v35 }
 0x6ea   : > { %3615 = vadd.xlane.f32.xlu0 %v3614_v56  ;;  %v8515_v56 = vld [vmem:[#allocation31_spill] sm:$0xff] }
 0x6ec   : > { %v5483_v3 = vpop.eup %5482 }
 0x6ed   : > { %v3102_v54 = vmul.f32 %v5483_v3, %v7633_v32 }
 0x6ef   : > { %5021 = vmatmul.msk.f32.gmra.mxu2 %vm1789_vm2, %v3101_v48 }
 0x6f2   : > { %3624 = vadd.xlane.f32.xlu0 %v3623_v36 }
 0x6f7   : > { %5022 = vmatmul.msk.f32.gmra.mxu2 %vm1789_vm2, %v3102_v54 }
 0x6fd   : > { %v3503_v51 = vpop.permute.xlu1 %3502 }
 0x6fe   : > { %v3570_v8 = vsel %vm1373_vm15, %v7561_v61, %v3503_v51  ;;  %v3567_v61 = vsel %vm1373_vm15, %v7479_v28, %v7649_v45 }
 0x6ff   : > { %v7703_v31 = vadd.f32 %v3570_v8, %v8512_v47  ;;  %v7716_v46 = vadd.f32 %v3567_v61, %v8513_v9  ;;  %v2946_v8 = vsub.f32 %v7613_v6, %v7669_v12 }
 0x701   : > { %v3626_v39 = vsel %vm658_vm1, %v7703_v31, 0.0  ;;  %v3617_v62 = vsel %vm658_vm1, %v7716_v46, 0.0  ;;  %v2990_v47 = vmul.f32 1.442695, %v2946_v8 }
 0x702   : > { %3627 = vadd.xlane.f32.xlu1 %v3626_v39 }
 0x703   : > { %v2913_v4 = vpop.xlane.xlu0 %2912 }
 0x704   : > { %v2945_v1 = vsub.f32 %v7639_v5, %v2913_v4  ;;  %v3571_v5 = vsel %vm1373_vm15, %v7568_v14, %v3505_v25 }
 0x705   : > { %v7723_v21 = vadd.f32 %v3571_v5, %v8514_v59  ;;  %v3373_v5 = vpop.f32.mrf.mxu0 }
 0x706   : > { %v2988_v24 = vmul.f32 1.442695, %v2945_v1 }
 0x707   : > { %v3629_v16 = vsel %vm658_vm1, %v7723_v21, 0.0 }
 0x708   : > { %5484 = vpow2.f32 %v2988_v24 }
 0x70b   : > { %v2919_v45 = vpop.xlane.xlu0 %2918 }
 0x70c   : > { %v2947_v40 = vsub.f32 %v7645_v43, %v2919_v45 }
 0x70d   : > { %v3376_v8 = vpop.f32.mrf.mxu0 }
 0x70e   : > { %v7708_v23 = vpop.eup %5484  ;;  %v2992_v14 = vmul.f32 1.442695, %v2947_v40 }
 0x70f   : > { %v3055_v32 = vsel %vm1789_vm2, %v7708_v23, 0.0 }
 0x710   : > { %3056 = vadd.xlane.f32.xlu2 %v3055_v32 }
 0x718   : > { %3618 = vadd.xlane.f32.xlu2 %v3617_v62 }
 0x720   : > { %3630 = vadd.xlane.f32.xlu2 %v3629_v16 }
 0x72c   : > { %v3054_v28 = vpop.xlane.xlu1 %3053 }
 0x72d   : > { %5486 = vrcp.f32 %v3054_v28 }
 0x72e   : > { %5488 = vpow2.f32 %v2992_v14 }
 0x733   : > { %v5487_v30 = vpop.eup %5486 }
 0x734   : > { %v3112_v38 = vmul.f32 %v5487_v30, %v7652_v18  ;;  %v3622_v35 = vpop.xlane.xlu1 %3621  ;;  %v7738_v18 = vpop.eup %5488 }
 0x735   : > { %v3688_v20 = vmul.f32 %v3622_v35, %v8515_v56  ;;  %v3061_v48 = vsel %vm1789_vm2, %v7738_v18, 0.0 }
 0x736   : > { %5032 = vmatmul.msk.f32.vlgmr.msra.gmra.mxu2 %vm1789_vm2, %v3112_v38 }
 0x737   : > { %v7732_v58 = vsub.f32 %v7659_v13, %v3688_v20  ;;  %v3332_v13 = vpop.f32.mrf.mxu1 }
 0x738   : > { %3518 = vrot.lane.b32.xlu2 %v3329_v63, %s5685_s29 }
 0x739   : > { %v3736_v55 = vmul.f32 %v7732_v58, %v7732_v58 }
 0x73b   : > { %v3764_v43 = vsel %vm658_vm1, %v3736_v55, 0.0 }
 0x73c   : > { %3765 = vadd.xlane.f32.xlu0 %v3764_v43 }
 0x73f   : > { %v3335_v24 = vpop.f32.mrf.mxu1 }
 0x744   : > { %3062 = vadd.xlane.f32.xlu0 %v3061_v48 }
 0x745   : > { %v3027_v36 = vpop.xlane.xlu0 %3026 }
 0x746   : > { %5490 = vrcp.f32 %v3027_v36 }
 0x74c   : > { %v5491_v3 = vpop.eup %5490 }
 0x74d   : > { %v3103_v54 = vmul.f32 %v5491_v3, %v7665_v53  ;;  %v3030_v51 = vpop.xlane.xlu0 %3029 }
 0x74e   : > { %5492 = vrcp.f32 %v3030_v51 }
 0x74f   : > { %5023 = vmatmul.msk.f32.vlgmr.msrb.gmra.mxu3 %vm1789_vm2, %v3103_v54 }
 0x754   : > { %v5493_v39 = vpop.eup %5492 }
 0x755   : > { %v3033_v4 = vpop.xlane.xlu0 %3032  ;;  %v3104_v1 = vmul.f32 %v5493_v39, %v7672_v57 }
 0x756   : > { %5494 = vrcp.f32 %v3033_v4  ;;  %v3379_v4 = vpop.f32.mrf.mxu0 }
 0x757   : > { %5496 = vpow2.f32 %v2990_v47  ;;  %5024 = vmatmul.msk.f32.gmra.mxu3 %vm1789_vm2, %v3104_v1 }
 0x758   : > { %3522 = vrot.lane.b32.xlu0 %v3335_v24, %s5685_s29 }
 0x75c   : > { %v5495_v53 = vpop.eup %5494 }
 0x75d   : > { %v7749_v32 = vpop.eup %5496  ;;  %v3616_v61 = vpop.xlane.xlu0 %3615  ;;  %v3105_v6 = vmul.f32 %v5495_v53, %v7676_v22 }
 0x75e   : > { %v3686_v12 = vmul.f32 %v3616_v61, %v8515_v56  ;;  %v3058_v57 = vsel %vm1789_vm2, %v7749_v32, 0.0 }
 0x75f   : > { %5025 = vmatmul.msk.f32.gmra.mxu3 %vm1789_vm2, %v3105_v6 }
 0x760   : > { %v7755_v9 = vsub.f32 %v7683_v7, %v3686_v12  ;;  %v7798_v12 = vpop.f32.mrf.mxu3 }
 0x761   : > { %3059 = vadd.xlane.f32.xlu2 %v3058_v57 }
 0x762   : > { %v3734_v25 = vmul.f32 %v7755_v9, %v7755_v9 }
 0x764   : > { %v3758_v62 = vsel %vm658_vm1, %v3734_v25, 0.0 }
 0x765   : > { %3759 = vadd.xlane.f32.xlu1 %v3758_v62  ;;  %v3625_v47 = vpop.xlane.xlu0 %3624  ;;  %v4142_v62 = vld [vmem:[%s8381_s6] sm:$0xff] }
 0x766   : > { %4234 = vmatpush.msrb.mxu1 %v4142_v62 }
 0x768   : > { %v7802_v57 = vpop.f32.mrf.mxu3 }
 0x76a   : > { %v3241_v39 = vpop.f32.mrf.mxu2 }
 0x772   : > { %v3244_v24 = vpop.f32.mrf.mxu2 }
 0x775   : > { %v3628_v38 = vpop.xlane.xlu1 %3627 }
 0x776   : > { %v3690_v63 = vmul.f32 %v3628_v38, %v8515_v56 }
 0x779   : > { %3524 = vrot.lane.b32.xlu2 %v3373_v5, %s5685_s29 }
 0x77a   : > { %v3247_v61 = vpop.f32.mrf.mxu2 }
 0x783   : > { %v3057_v22 = vpop.xlane.xlu2 %3056 }
 0x784   : > { %5498 = vrcp.f32 %v3057_v22 }
 0x78a   : > { %v5499_v59 = vpop.eup %5498 }
 0x78b   : > { %v3619_v16 = vpop.xlane.xlu2 %3618  ;;  %v3113_v28 = vmul.f32 %v5499_v59, %v7708_v23 }
 0x78c   : > { %v3687_v45 = vmul.f32 %v3619_v16, %v8515_v56 }
 0x78d   : > { %5033 = vmatmul.msk.f32.gmra.mxu2 %vm1789_vm2, %v3113_v28 }
 0x78e   : > { %v7767_v40 = vsub.f32 %v7716_v46, %v3687_v45  ;;  %v7780_v46 = vsub.f32 %v7703_v31, %v3690_v63 }
 0x790   : > { %v3735_v30 = vmul.f32 %v7767_v40, %v7767_v40  ;;  %v3738_v48 = vmul.f32 %v7780_v46, %v7780_v46 }
 0x792   : > { %v3761_v35 = vsel %vm658_vm1, %v3735_v30, 0.0  ;;  %v3770_v3 = vsel %vm658_vm1, %v3738_v48, 0.0 }
 0x793   : > { %v3631_v20 = vpop.xlane.xlu2 %3630  ;;  %3762 = vadd.xlane.f32.xlu1 %v3761_v35 }
 0x794   : > { %v3691_v14 = vmul.f32 %v3631_v20, %v8515_v56 }
 0x796   : > { %v7775_v23 = vsub.f32 %v7723_v21, %v3691_v14  ;;  %v8516_v21 = vld [vmem:[#allocation8_spill] sm:$0xff] }
 0x798   : > { %v3739_v55 = vmul.f32 %v7775_v23, %v7775_v23 }
 0x79a   : > { %v3773_v43 = vsel %vm658_vm1, %v3739_v55, 0.0 }
 0x79b   : > { %3774 = vadd.xlane.f32.xlu0 %v3773_v43  ;;  %v3519_v36 = vpop.permute.xlu2 %3518 }
 0x79c   : > { %v3578_v54 = vsel %vm1373_vm15, %v7511_v29, %v3519_v36 }
 0x79d   : > { %v7789_v51 = vadd.f32 %v3578_v54, %v8516_v21 }
 0x79f   : > { %v3650_v31 = vsel %vm658_vm1, %v7789_v51, 0.0 }
 0x7a2   : > { %3771 = vadd.xlane.f32.xlu2 %v3770_v3 }
 0x7aa   : > { %3651 = vadd.xlane.f32.xlu2 %v3650_v31 }
 0x7ac   : > { %3520 = vrot.lane.b32.xlu1 %v3332_v13, %s5685_s29  ;;  %v3689_v13 = vmul.f32 %v3625_v47, %v8515_v56 }
 0x7ae   : > { %v7805_v25 = vsub.f32 %v7692_v52, %v3689_v13 }
 0x7af   : > { %3528 = vrot.lane.b32.xlu0 %v3379_v4, %s5685_s29  ;;  %v3766_v1 = vpop.xlane.xlu0 %3765 }
 0x7b7   : > { %3508 = vrot.lane.b32.xlu0 %v3244_v24, %s5685_s29  ;;  %v3063_v29 = vpop.xlane.xlu0 %3062 }
 0x7b8   : > { %5500 = vrcp.f32 %v3063_v29 }
 0x7b9   : > { %v3417_v4 = vpop.f32.mrf.mxu2 }
 0x7be   : > { %v5501_v53 = vpop.eup %5500 }
 0x7bf   : > { %v3115_v6 = vmul.f32 %v5501_v53, %v7738_v18  ;;  %3510 = vrot.lane.b32.xlu0 %v3247_v61, %s5685_s29  ;;  %v3737_v18 = vmul.f32 %v7805_v25, %v7805_v25 }
 0x7c1   : > { %5035 = vmatmul.msk.f32.vlgmr.msra.gmra.mxu3 %vm1789_vm2, %v3115_v6  ;;  %v3767_v59 = vsel %vm658_vm1, %v3737_v18, 0.0 }
 0x7ca   : > { %v7825_v61 = vpop.permute.xlu0 %3522 }
 0x7d2   : > { %v3285_v5 = vpop.f32.mrf.mxu3 }
 0x7d3   : > { %3512 = vrot.lane.b32.xlu2 %v3285_v5, %s5685_s29 }
 0x7d4   : > { %v3060_v22 = vpop.xlane.xlu2 %3059 }
 0x7d5   : > { %5502 = vrcp.f32 %v3060_v22 }
 0x7d6   : > { %3768 = vadd.xlane.f32.xlu1 %v3767_v59 }
 0x7d8   : > { %v3760_v16 = vpop.xlane.xlu1 %3759 }
 0x7d9   : > { %v3830_v28 = vmul.f32 %v3760_v16, %v8515_v56 }
 0x7da   : > { %v3288_v45 = vpop.f32.mrf.mxu3 }
 0x7db   : > { %v5503_v30 = vpop.eup %5502  ;;  %v3854_v38 = vadd.f32 1e-05, %v3830_v28 }
 0x7dc   : > { %v3114_v35 = vmul.f32 %v5503_v30, %v7749_v32  ;;  %v3832_v32 = vmul.f32 %v3766_v1, %v8515_v56 }
 0x7dd   : > { %5504 = vrsqrt.f32 %v3854_v38  ;;  %vm3884_vm4 = vweird.f32 %v3854_v38 }
 0x7de   : > { %5034 = vmatmul.msk.f32.gmra.mxu2 %vm1789_vm2, %v3114_v35  ;;  %v3856_v21 = vadd.f32 1e-05, %v3832_v32 }
 0x7e0   : > { %5506 = vrsqrt.f32 %v3856_v21  ;;  %vm3904_vm10 = vweird.f32 %v3856_v21 }
 0x7e2   : > { %v3291_v20 = vpop.f32.mrf.mxu3 }
 0x7e3   : > { %v5505_v14 = vpop.eup %5504  ;;  %3516 = vrot.lane.b32.xlu0 %v3291_v20, %s5685_s29 }
 0x7e4   : > { %v3879_v63 = vmul.f32 %v5505_v14, %v3854_v38  ;;  %vm3885_vm3 = vweird.f32 %v5505_v14 }
 0x7e5   : > { %vm3886_vm5 = vmor %vm3884_vm4, %vm3885_vm3 }
 0x7e6   : > { %v3880_v55 = vmul.f32 %v5505_v14, %v3879_v63  ;;  %v5507_v29 = vpop.eup %5506  ;;  %v8517_v63 = vld [vmem:[#allocation19_spill] sm:$0xff] }
 0x7e7   : > { %vm3905_vm9 = vweird.f32 %v5507_v29 }
 0x7e8   : > { %v3881_v43 = vmul.f32 0.5, %v3880_v55  ;;  %vm3906_vm11 = vmor %vm3904_vm10, %vm3905_vm9 }
 0x7ea   : > { %v3882_v48 = vsub.f32 1.5, %v3881_v43  ;;  %v7841_v43 = vpop.permute.xlu2 %3524 }
 0x7ec   : > { %v3883_v36 = vmul.f32 %v5505_v14, %v3882_v48 }
 0x7ee   : > { %v3887_v3 = vsel %vm3886_vm5, %v5505_v14, %v3883_v36 }
 0x7ef   : > { %v4118_v54 = vmul.f32 %v3887_v3, %v7755_v9  ;;  %3526 = vrot.lane.b32.xlu1 %v3376_v8, %s5685_s29  ;;  %v3899_v9 = vmul.f32 %v5507_v29, %v3856_v21 }
 0x7f1   : > { %5038 = vmatmul.msk.f32.vlgmr.msrb.gmra.mxu1 %vm658_vm1, %v4118_v54 }
 0x7f7   : > { %3506 = vrot.lane.b32.xlu1 %v3241_v39, %s5685_s29  ;;  %v3900_v39 = vmul.f32 %v5507_v29, %v3899_v9 }
 0x7f9   : > { %v3901_v13 = vmul.f32 0.5, %v3900_v39 }
 0x7fb   : > { %v3902_v22 = vsub.f32 1.5, %v3901_v13 }
 0x7ff   : > { %3514 = vrot.lane.b32.xlu1 %v3288_v45, %s5685_s29  ;;  %v3903_v45 = vmul.f32 %v5507_v29, %v3902_v22 }
 0x801   : > { %v3907_v38 = vsel %vm3906_vm11, %v5507_v29, %v3903_v45 }
 0x802   : > { %v4120_v35 = vmul.f32 %v3907_v38, %v7732_v58  ;;  %v4527_v38 = vld [vmem:[%s8383_s8 + $0x18] sm:$0xff] }
 0x803   : > { %4617 = vmatpush.msrb.mxu0 %v4527_v38 }
 0x806   : > { %v3763_v47 = vpop.xlane.xlu1 %3762 }
 0x807   : > { %v3831_v31 = vmul.f32 %v3763_v47, %v8515_v56 }
 0x809   : > { %v3855_v24 = vadd.f32 1e-05, %v3831_v31 }
 0x80b   : > { %5508 = vrsqrt.f32 %v3855_v24  ;;  %vm3894_vm7 = vweird.f32 %v3855_v24 }
 0x80e   : > { %v3775_v5 = vpop.xlane.xlu0 %3774 }
 0x80f   : > { %v3835_v54 = vmul.f32 %v3775_v5, %v8515_v56 }
 0x810   : > { %v3420_v53 = vpop.f32.mrf.mxu2 }
 0x811   : > { %v5509_v8 = vpop.eup %5508  ;;  %3532 = vrot.lane.b32.xlu1 %v3420_v53, %s5685_s29  ;;  %v3859_v21 = vadd.f32 1e-05, %v3835_v54  ;;  %v8518_v54 = vld [vmem:[#allocation10_spill] sm:$0xff] }
 0x812   : > { %v3889_v1 = vmul.f32 %v5509_v8, %v3855_v24  ;;  %vm3895_vm6 = vweird.f32 %v5509_v8 }
 0x813   : > { %vm3896_vm8 = vmor %vm3894_vm7, %vm3895_vm6  ;;  %vm3934_vm6 = vweird.f32 %v3859_v21 }
 0x814   : > { %v3890_v6 = vmul.f32 %v5509_v8, %v3889_v1 }
 0x815   : > { %v3772_v48 = vpop.xlane.xlu2 %3771 }
 0x816   : > { %v3891_v62 = vmul.f32 0.5, %v3890_v6  ;;  %v3834_v36 = vmul.f32 %v3772_v48, %v8515_v56 }
 0x818   : > { %v3892_v18 = vsub.f32 1.5, %v3891_v62  ;;  %v3858_v58 = vadd.f32 1e-05, %v3834_v36 }
 0x81a   : > { %v3893_v59 = vmul.f32 %v5509_v8, %v3892_v18  ;;  %5510 = vrsqrt.f32 %v3858_v58  ;;  %vm3924_vm3 = vweird.f32 %v3858_v58 }
 0x81c   : > { %v3897_v16 = vsel %vm3896_vm8, %v5509_v8, %v3893_v59  ;;  %vm4532_vm8 = vcmask 261120  }
 0x81d   : > { %v4119_v28 = vmul.f32 %v3897_v16, %v7767_v40 }
 0x81e   : > { %v3521_v3 = vpop.permute.xlu1 %3520 }
 0x81f   : > { %5039 = vmatmul.msk.f32.gmra.mxu1 %vm658_vm1, %v4119_v28 }
 0x820   : > { %v5511_v31 = vpop.eup %5510 }
 0x821   : > { %v7830_v30 = vpop.permute.xlu0 %3528  ;;  %v3919_v24 = vmul.f32 %v5511_v31, %v3858_v58  ;;  %vm3925_vm0 = vweird.f32 %v5511_v31 }
 0x822   : > { %vm3926_vm4 = vmor %vm3924_vm3, %vm3925_vm0  ;;  %vm4700_vm0 = vcmask 1041409  }
 0x823   : > { %v3920_v9 = vmul.f32 %v5511_v31, %v3919_v24 }
 0x825   : > { %v3921_v6 = vmul.f32 0.5, %v3920_v9 }
 0x827   : > { %5040 = vmatmul.msk.f32.gmra.mxu1 %vm658_vm1, %v4120_v35  ;;  %v3922_v18 = vsub.f32 1.5, %v3921_v6  ;;  %v4526_v35 = vld [vmem:[%s8383_s8 + $0x10] sm:$0xff] }
 0x828   : > { %4618 = vmatpush.msrb.mxu0 %v4526_v35 }
 0x829   : > { %v3509_v20 = vpop.permute.xlu0 %3508  ;;  %v3923_v28 = vmul.f32 %v5511_v31, %v3922_v18 }
 0x82a   : > { %v3573_v14 = vsel %vm1373_vm15, %v7502_v50, %v3509_v20 }
 0x82b   : > { %v7837_v55 = vadd.f32 %v3573_v14, %v8517_v63  ;;  %v4525_v14 = vld [vmem:[%s8383_s8 + $0x8] sm:$0xff]  ;;  %v4524_v63 = vld [vmem:[%s8383_s8] sm:$0xff] }
 0x82c   : > { %4619 = vmatpush.msrb.mxu0 %v4525_v14  ;;  %v8523_v14 = vld [vmem:[#allocation25_spill] sm:$0xff] }
 0x82d   : > { %v3635_v40 = vsel %vm658_vm1, %v7837_v55, 0.0 }
 0x82e   : > { %3636 = vadd.xlane.f32.xlu2 %v3635_v40  ;;  %v3579_v40 = vsel %vm1373_vm15, %v7513_v27, %v3521_v3  ;;  %4620 = vmatpush.msrb.mxu0 %v4524_v63  ;;  %v7878_v27 = vld [vmem:[%s8382_s7] ss:$0 sm:$0xff] }
 0x846   : > { %3530 = vrot.lane.b32.xlu2 %v3417_v4, %s5685_s29 }
 0x849   : > { %v3769_v50 = vpop.xlane.xlu1 %3768 }
 0x84a   : > { %v3833_v32 = vmul.f32 %v3769_v50, %v8515_v56  ;;  %v7867_v50 = vadd.f32 %v3579_v40, %v8518_v54 }
 0x84c   : > { %v3857_v47 = vadd.f32 1e-05, %v3833_v32 }
 0x84e   : > { %5512 = vrsqrt.f32 %v3857_v47  ;;  %vm3914_vm13 = vweird.f32 %v3857_v47 }
 0x84f   : > { %5514 = vrsqrt.f32 %v3859_v21 }
 0x854   : > { %v5513_v29 = vpop.eup %5512 }
 0x855   : > { %v3909_v53 = vmul.f32 %v5513_v29, %v3857_v47  ;;  %v5515_v8 = vpop.eup %5514  ;;  %vm3915_vm12 = vweird.f32 %v5513_v29  ;;  %v8519_v47 = vld [vmem:[#allocation17_spill] sm:$0xff] }
 0x856   : > { %v3929_v1 = vmul.f32 %v5515_v8, %v3859_v21  ;;  %vm3916_vm14 = vmor %vm3914_vm13, %vm3915_vm12  ;;  %vm3935_vm5 = vweird.f32 %v5515_v8  ;;  %v3653_v21 = vsel %vm658_vm1, %v7867_v50, 0.0 }
 0x857   : > { %v3910_v39 = vmul.f32 %v5513_v29, %v3909_v53  ;;  %vm3936_vm7 = vmor %vm3934_vm6, %vm3935_vm5  ;;  %v8520_v53 = vld [vmem:[#allocation12_spill] sm:$0xff] }
 0x858   : > { %v3930_v62 = vmul.f32 %v5515_v8, %v3929_v1 }
 0x859   : > { %v3911_v4 = vmul.f32 0.5, %v3910_v39 }
 0x85a   : > { %v3931_v16 = vmul.f32 0.5, %v3930_v62 }
 0x85b   : > { %v3912_v13 = vsub.f32 1.5, %v3911_v4 }
 0x85c   : > { %v3932_v20 = vsub.f32 1.5, %v3931_v16 }
 0x85d   : > { %v3913_v5 = vmul.f32 %v5513_v29, %v3912_v13  ;;  %v8521_v13 = vld [vmem:[#allocation27_spill] sm:$0xff] }
 0x85e   : > { %v3933_v36 = vmul.f32 %v5515_v8, %v3932_v20 }
 0x85f   : > { %v3917_v22 = vsel %vm3916_vm14, %v5513_v29, %v3913_v5 }
 0x860   : > { %v4121_v59 = vmul.f32 %v3917_v22, %v7805_v25  ;;  %v3927_v25 = vsel %vm3926_vm4, %v5511_v31, %v3923_v28  ;;  %v3937_v3 = vsel %vm3936_vm7, %v5515_v8, %v3933_v36 }
 0x861   : > { %v7848_v45 = vpop.permute.xlu1 %3526  ;;  %v4122_v48 = vmul.f32 %v3927_v25, %v7780_v46  ;;  %v4123_v9 = vmul.f32 %v3937_v3, %v7775_v23 }
 0x862   : > { %5041 = vmatmul.msk.f32.gmra.mxu1 %vm658_vm1, %v4121_v59  ;;  %v8522_v59 = vld [vmem:[#allocation22_spill] sm:$0xff]  ;;  %v3582_v3 = vsel %vm1373_vm15, %v7585_v42, %v7848_v45 }
 0x869   : > { %v3507_v58 = vpop.permute.xlu1 %3506 }
 0x86a   : > { %v3572_v32 = vsel %vm1373_vm15, %v7497_v15, %v3507_v58  ;;  %5042 = vmatmul.msk.f32.gmra.mxu1 %vm658_vm1, %v4122_v48  ;;  %v3580_v15 = vsel %vm1373_vm15, %v7515_v60, %v7825_v61  ;;  %v7895_v60 = vpop.xlane.xlu2 %3651  ;;  %v3511_v61 = vpop.permute.xlu0 %3510 }
 0x86b   : > { %v7873_v31 = vadd.f32 %v3572_v32, %v8519_v47  ;;  %v7890_v39 = vadd.f32 %v3580_v15, %v8520_v53  ;;  %v3574_v22 = vsel %vm1373_vm15, %v7507_v49, %v3511_v61  ;;  %v3461_v58 = vpop.f32.mrf.mxu3  ;;  %v8525_v15 = vld [vmem:[#allocation16_spill] sm:$0xff] }
 0x86c   : > { %v7907_v16 = vadd.f32 %v3574_v22, %v8522_v59 }
 0x86d   : > { %v3632_v46 = vsel %vm658_vm1, %v7873_v31, 0.0  ;;  %v3656_v23 = vsel %vm658_vm1, %v7890_v39, 0.0 }
 0x86e   : > { %v4236_v24 = vpop.f32.mrf.mxu1  ;;  %3633 = vadd.xlane.f32.xlu0 %v3632_v46  ;;  %v3638_v35 = vsel %vm658_vm1, %v7907_v16, 0.0 }
 0x86f   : > { %v4237_v29 = vadd.f32 %v7878_v27, %v4236_v24  ;;  %3654 = vadd.xlane.f32.xlu2 %v3653_v21  ;;  %v7931_v24 = vadd.f32 %v3582_v3, %v8525_v15 }
 0x871   : > { %v4308_v1 = vmul.f32 %v4237_v29, %v4237_v29  ;;  %v3515_v6 = vpop.permute.xlu1 %3514  ;;  %v3662_v21 = vsel %vm658_vm1, %v7931_v24, 0.0 }
 0x872   : > { %v3576_v8 = vsel %vm1373_vm15, %v7577_v11, %v3515_v6  ;;  %5043 = vmatmul.msk.f32.gmra.mxu1 %vm658_vm1, %v4123_v9  ;;  %v3513_v38 = vpop.permute.xlu2 %3512  ;;  %v3517_v40 = vpop.permute.xlu0 %3516 }
 0x873   : > { %v4332_v4 = vmul.f32 %v4308_v1, %v4237_v29  ;;  %v7898_v62 = vadd.f32 %v3576_v8, %v8521_v13  ;;  %v3575_v20 = vsel %vm1373_vm15, %v7571_v19, %v3513_v38  ;;  %v3577_v54 = vsel %vm1373_vm15, %v7580_v10, %v3517_v40  ;;  %v8524_v19 = vld [vmem:[#allocation29_spill] sm:$0xff] }
 0x874   : > { %v7914_v63 = vadd.f32 %v3575_v20, %v8523_v14  ;;  %v7923_v47 = vadd.f32 %v3577_v54, %v8524_v19  ;;  %v2828_v10 = vmul.f32 0.5, %v7798_v12 }
 0x875   : > { %v4356_v18 = vmul.f32 0.044715, %v4332_v4  ;;  %v3644_v5 = vsel %vm658_vm1, %v7898_v62, 0.0 }
 0x876   : > { %3657 = vadd.xlane.f32.xlu0 %v3656_v23  ;;  %3645 = vadd.xlane.f32.xlu1 %v3644_v5  ;;  %v3641_v36 = vsel %vm658_vm1, %v7914_v63, 0.0  ;;  %v3647_v46 = vsel %vm658_vm1, %v7923_v47, 0.0 }
 0x877   : > { %v4380_v11 = vadd.f32 %v4356_v18, %v4237_v29 }
 0x879   : > { %v4404_v28 = vmul.f32 0.7978846, %v4380_v11  ;;  %v3583_v11 = vsel %vm1373_vm15, %v7587_v41, %v7830_v30 }
 0x87b   : > { %5516 = vtanh.f32 %v4404_v28 }
 0x87e   : > { %3639 = vadd.xlane.f32.xlu0 %v3638_v35 }
 0x881   : > { %v5517_v25 = vpop.eup %5516 }
 0x882   : > { %v4452_v49 = vadd.f32 1.0, %v5517_v25 }
 0x884   : > { %v4476_v48 = vmul.f32 0.5, %v4452_v49 }
 0x886   : > { %v4500_v32 = vmul.f32 %v4476_v48, %v4237_v29  ;;  %3642 = vadd.xlane.f32.xlu0 %v3641_v36  ;;  %v7937_v29 = vadd.f32 %v2828_v10, %v6863_v34 }
 0x887   : > { %3536 = vrot.lane.b32.xlu2 %v3461_v58, %s5685_s29 }
 0x888   : > { %5062 = vmatmul.msk.f32.vlgmr.msrb.gmra.mxu0 %vm4532_vm8, %v4500_v32  ;;  %v2920_v1 = vsel %vm1789_vm2, %v7937_v29, -inf }
 0x88e   : > { %3648 = vadd.xlane.f32.xlu0 %v3647_v46 }
 0x896   : > { %3663 = vadd.xlane.f32.xlu0 %v3662_v21 }
 0x89c   : > { %v4239_v9 = vpop.f32.mrf.mxu1 }
 0x89d   : > { %v4240_v53 = vadd.f32 %v7878_v27, %v4239_v9 }
 0x89e   : > { %2921 = vmax.xlane.f32.xlu0 %v2920_v1 }
 0x89f   : > { %v4309_v42 = vmul.f32 %v4240_v53, %v4240_v53 }
 0x8a1   : > { %v4333_v45 = vmul.f32 %v4309_v42, %v4240_v53  ;;  %v3637_v6 = vpop.xlane.xlu2 %3636 }
 0x8a2   : > { %v3693_v8 = vmul.f32 %v3637_v6, %v8515_v56 }
 0x8a3   : > { %v4357_v12 = vmul.f32 0.044715, %v4333_v45 }
 0x8a4   : > { %v7944_v61 = vsub.f32 %v7837_v55, %v3693_v8  ;;  %v4242_v4 = vpop.f32.mrf.mxu1  ;;  %v8526_v55 = vld [vmem:[#allocation20_spill] sm:$0xff] }
 0x8a5   : > { %v4381_v13 = vadd.f32 %v4357_v12, %v4240_v53  ;;  %v4243_v18 = vadd.f32 %v7878_v27, %v4242_v4  ;;  %v7954_v38 = vadd.f32 %v3583_v11, %v8526_v55  ;;  %v8527_v11 = vld [vmem:[#allocation26_spill] sm:$0xff] }
 0x8a6   : > { %v3741_v23 = vmul.f32 %v7944_v61, %v7944_v61 }
 0x8a7   : > { %v4405_v5 = vmul.f32 0.7978846, %v4381_v13  ;;  %v4310_v22 = vmul.f32 %v4243_v18, %v4243_v18  ;;  %v3665_v49 = vsel %vm658_vm1, %v7954_v38, 0.0 }
 0x8a8   : > { %v3779_v59 = vsel %vm658_vm1, %v3741_v23, 0.0 }
 0x8a9   : > { %5518 = vtanh.f32 %v4405_v5  ;;  %v4334_v28 = vmul.f32 %v4310_v22, %v4243_v18  ;;  %3780 = vadd.xlane.f32.xlu0 %v3779_v59  ;;  %v7960_v32 = vpop.permute.xlu2 %3530 }
 0x8ab   : > { %v4358_v35 = vmul.f32 0.044715, %v4334_v28 }
 0x8ad   : > { %v4382_v20 = vadd.f32 %v4358_v35, %v4243_v18 }
 0x8af   : > { %v5519_v25 = vpop.eup %5518  ;;  %v4406_v14 = vmul.f32 0.7978846, %v4382_v20 }
 0x8b0   : > { %3666 = vadd.xlane.f32.xlu2 %v3665_v49  ;;  %v4453_v40 = vadd.f32 1.0, %v5519_v25 }
 0x8b1   : > { %5520 = vtanh.f32 %v4406_v14  ;;  %v7983_v14 = vpop.permute.xlu1 %3532 }
 0x8b2   : > { %v4477_v48 = vmul.f32 0.5, %v4453_v40 }
 0x8b4   : > { %v4501_v41 = vmul.f32 %v4477_v48, %v4240_v53 }
 0x8b6   : > { %5063 = vmatmul.msk.f32.gmra.mxu0 %vm4532_vm8, %v4501_v41 }
 0x8b7   : > { %v5521_v30 = vpop.eup %5520 }
 0x8b8   : > { %v4454_v36 = vadd.f32 1.0, %v5521_v30 }
 0x8ba   : > { %v4478_v58 = vmul.f32 0.5, %v4454_v36 }
 0x8bc   : > { %v4502_v54 = vmul.f32 %v4478_v58, %v4243_v18 }
 0x8be   : > { %5064 = vmatmul.msk.f32.gmra.mxu0 %vm4532_vm8, %v4502_v54 }
 0x8df   : > { %v4245_v19 = vpop.f32.mrf.mxu1 }
 0x8e0   : > { %v4246_v46 = vadd.f32 %v7878_v27, %v4245_v19 }
 0x8e1   : > { %v3634_v3 = vpop.xlane.xlu0 %3633 }
 0x8e2   : > { %v4311_v15 = vmul.f32 %v4246_v46, %v4246_v46  ;;  %v3692_v10 = vmul.f32 %v3634_v3, %v8515_v56  ;;  %v7964_v21 = vpop.xlane.xlu2 %3654 }
 0x8e4   : > { %v4335_v9 = vmul.f32 %v4311_v15, %v4246_v46  ;;  %v7967_v53 = vsub.f32 %v7873_v31, %v3692_v10 }
 0x8e6   : > { %v4359_v1 = vmul.f32 0.044715, %v4335_v9  ;;  %v3740_v42 = vmul.f32 %v7967_v53, %v7967_v53 }
 0x8e7   : > { %v4248_v45 = vpop.f32.mrf.mxu1 }
 0x8e8   : > { %v4383_v6 = vadd.f32 %v4359_v1, %v4246_v46  ;;  %v4249_v8 = vadd.f32 %v7878_v27, %v4248_v45  ;;  %v3776_v12 = vsel %vm658_vm1, %v3740_v42, 0.0 }
 0x8e9   : > { %v7973_v4 = vpop.xlane.xlu0 %3657  ;;  %3777 = vadd.xlane.f32.xlu1 %v3776_v12  ;;  %v3646_v1 = vpop.xlane.xlu1 %3645 }
 0x8ea   : > { %v4407_v13 = vmul.f32 0.7978846, %v4383_v6  ;;  %v4312_v18 = vmul.f32 %v4249_v8, %v4249_v8  ;;  %v3537_v23 = vpop.permute.xlu2 %3536 }
 0x8eb   : > { %v3587_v5 = vsel %vm1373_vm15, %v7589_v2, %v3537_v23 }
 0x8ec   : > { %5522 = vtanh.f32 %v4407_v13  ;;  %v4336_v22 = vmul.f32 %v4312_v18, %v4249_v8  ;;  %v7978_v59 = vadd.f32 %v3587_v5, %v8527_v11  ;;  %v3696_v13 = vmul.f32 %v3646_v1, %v8515_v56 }
 0x8ee   : > { %v4360_v28 = vmul.f32 0.044715, %v4336_v22  ;;  %v3677_v55 = vsel %vm658_vm1, %v7978_v59, 0.0  ;;  %v8001_v22 = vsub.f32 %v7898_v62, %v3696_v13 }
 0x8ef   : > { %v4251_v35 = vpop.f32.mrf.mxu1  ;;  %3678 = vadd.xlane.f32.xlu2 %v3677_v55 }
 0x8f0   : > { %v4384_v20 = vadd.f32 %v4360_v28, %v4249_v8  ;;  %v4252_v25 = vadd.f32 %v7878_v27, %v4251_v35  ;;  %v3423_v28 = vpop.f32.mrf.mxu2 }
 0x8f1   : > { %v3640_v49 = vpop.xlane.xlu0 %3639 }
 0x8f2   : > { %v5523_v40 = vpop.eup %5522  ;;  %v4408_v48 = vmul.f32 0.7978846, %v4384_v20  ;;  %v4313_v2 = vmul.f32 %v4252_v25, %v4252_v25  ;;  %v3694_v41 = vmul.f32 %v3640_v49, %v8515_v56 }
 0x8f3   : > { %v4455_v30 = vadd.f32 1.0, %v5523_v40  ;;  %v3744_v40 = vmul.f32 %v8001_v22, %v8001_v22 }
 0x8f4   : > { %5524 = vtanh.f32 %v4408_v48  ;;  %v4337_v36 = vmul.f32 %v4313_v2, %v4252_v25  ;;  %v7987_v58 = vsub.f32 %v7907_v16, %v3694_v41 }
 0x8f5   : > { %v4479_v54 = vmul.f32 0.5, %v4455_v30  ;;  %v3788_v2 = vsel %vm658_vm1, %v3744_v40, 0.0  ;;  %v3698_v30 = vmul.f32 %v7895_v60, %v8515_v56 }
 0x8f6   : > { %v4361_v19 = vmul.f32 0.044715, %v4337_v36  ;;  %v3742_v3 = vmul.f32 %v7987_v58, %v7987_v58 }
 0x8f7   : > { %v4503_v15 = vmul.f32 %v4479_v54, %v4246_v46  ;;  %v8021_v54 = vsub.f32 %v7789_v51, %v3698_v30 }
 0x8f8   : > { %v4385_v10 = vadd.f32 %v4361_v19, %v4252_v25  ;;  %v3782_v9 = vsel %vm658_vm1, %v3742_v3, 0.0 }
 0x8f9   : > { %5065 = vmatmul.msk.f32.gmra.mxu0 %vm4532_vm8, %v4503_v15  ;;  %3783 = vadd.xlane.f32.xlu0 %v3782_v9  ;;  %v3643_v42 = vpop.xlane.xlu0 %3642  ;;  %v3746_v15 = vmul.f32 %v8021_v54, %v8021_v54 }
 0x8fa   : > { %v5525_v45 = vpop.eup %5524  ;;  %v4409_v6 = vmul.f32 0.7978846, %v4385_v10  ;;  %v3695_v12 = vmul.f32 %v3643_v42, %v8515_v56  ;;  %v2829_v10 = vmul.f32 0.5, %v7802_v57  ;;  %v3581_v57 = vsel %vm1373_vm15, %v7583_v0, %v7841_v43  ;;  %v8530_v0 = vld [vmem:[#allocation23_spill] sm:$0xff] }
 0x8fb   : > { %v4456_v16 = vadd.f32 1.0, %v5525_v45  ;;  %v3794_v60 = vsel %vm658_vm1, %v3746_v15, 0.0  ;;  %v3585_v45 = vsel %vm1373_vm15, %v7525_v17, %v7983_v14  ;;  %v3584_v17 = vsel %vm1373_vm15, %v7519_v37, %v7960_v32 }
 0x8fc   : > { %5526 = vtanh.f32 %v4409_v6  ;;  %v7996_v18 = vsub.f32 %v7914_v63, %v3695_v12  ;;  %v8032_v1 = vadd.f32 %v2829_v10, %v6863_v34  ;;  %v8528_v6 = vld [vmem:[#allocation21_spill] sm:$0xff]  ;;  %v8529_v34 = vld [vmem:[#allocation14_spill] sm:$0xff]  ;;  %v8058_v43 = vadd.f32 %v3584_v17, %v8530_v0 }
 0x8fd   : > { %v4480_v46 = vmul.f32 0.5, %v4456_v16  ;;  %v8045_v12 = vadd.f32 %v3585_v45, %v8528_v6  ;;  %v8048_v16 = vadd.f32 %v3581_v57, %v8529_v34  ;;  %v3699_v14 = vmul.f32 %v7964_v21, %v8515_v56  ;;  %v8084_v34 = vld [vmem:[%s8384_s9] ss:$0 sm:$0xff] }
 0x8fe   : > { %v3743_v23 = vmul.f32 %v7996_v18, %v7996_v18 }
 0x8ff   : > { %v4504_v5 = vmul.f32 %v4480_v46, %v4249_v8  ;;  %v3671_v13 = vsel %vm658_vm1, %v8045_v12, 0.0 }
 0x900   : > { %v3785_v11 = vsel %vm658_vm1, %v3743_v23, 0.0  ;;  %v3659_v23 = vsel %vm658_vm1, %v8048_v16, 0.0 }
 0x901   : > { %5066 = vmatmul.msk.f32.gmra.mxu0 %vm4532_vm8, %v4504_v5  ;;  %3786 = vadd.xlane.f32.xlu0 %v3785_v11  ;;  %v3649_v55 = vpop.xlane.xlu0 %3648  ;;  %v8063_v5 = vsub.f32 %v7867_v50, %v3699_v14 }
 0x902   : > { %v5527_v35 = vpop.eup %5526  ;;  %3534 = vrot.lane.b32.xlu1 %v3423_v28, %s5685_s29  ;;  %v3697_v49 = vmul.f32 %v3649_v55, %v8515_v56  ;;  %v3668_v28 = vsel %vm658_vm1, %v8058_v43, 0.0  ;;  %v3700_v55 = vmul.f32 %v7973_v4, %v8515_v56 }
 0x903   : > { %v4457_v20 = vadd.f32 1.0, %v5527_v35  ;;  %v3747_v37 = vmul.f32 %v8063_v5, %v8063_v5 }
 0x904   : > { %v8010_v62 = vsub.f32 %v7923_v47, %v3697_v49  ;;  %v8072_v32 = vsub.f32 %v7890_v39, %v3700_v55  ;;  %v8531_v55 = vld [vmem:[#allocation24_spill] sm:$0xff] }
 0x905   : > { %v4481_v8 = vmul.f32 0.5, %v4457_v20  ;;  %v4622_v46 = vpop.f32.mrf.mxu0  ;;  %v3797_v21 = vsel %vm658_vm1, %v3747_v37, 0.0 }
 0x906   : > { %v3745_v36 = vmul.f32 %v8010_v62, %v8010_v62  ;;  %v3748_v50 = vmul.f32 %v8072_v32, %v8072_v32 }
 0x907   : > { %v4505_v48 = vmul.f32 %v4481_v8, %v4252_v25 }
 0x908   : > { %v3791_v25 = vsel %vm658_vm1, %v3745_v36, 0.0  ;;  %v3800_v20 = vsel %vm658_vm1, %v3748_v50, 0.0 }
 0x909   : > { %5067 = vmatmul.msk.f32.gmra.mxu0 %vm4532_vm8, %v4505_v48  ;;  %v8014_v41 = vpop.xlane.xlu0 %3663  ;;  %3789 = vadd.xlane.f32.xlu0 %v3788_v2 }
 0x911   : > { %v2922_v47 = vpop.xlane.xlu0 %2921  ;;  %3792 = vadd.xlane.f32.xlu0 %v3791_v25 }
 0x912   : > { %v2948_v19 = vsub.f32 %v7937_v29, %v2922_v47  ;;  %v2923_v29 = vsel %vm1789_vm2, %v8032_v1, -inf }
 0x914   : > { %v2994_v3 = vmul.f32 1.442695, %v2948_v19 }
 0x916   : > { %5528 = vpow2.f32 %v2994_v3 }
 0x919   : > { %3795 = vadd.xlane.f32.xlu0 %v3794_v60 }
 0x91c   : > { %v8029_v9 = vpop.eup %5528  ;;  %v3781_v49 = vpop.xlane.xlu0 %3780 }
 0x91d   : > { %v3064_v42 = vsel %vm1789_vm2, %v8029_v9, 0.0  ;;  %v3837_v40 = vmul.f32 %v3781_v49, %v8515_v56 }
 0x91e   : > { %3065 = vadd.xlane.f32.xlu2 %v3064_v42 }
 0x91f   : > { %v3861_v4 = vadd.f32 1e-05, %v3837_v40 }
 0x921   : > { %2924 = vmax.xlane.f32.xlu0 %v2923_v29  ;;  %5530 = vrsqrt.f32 %v3861_v4  ;;  %vm3954_vm13 = vweird.f32 %v3861_v4 }
 0x927   : > { %v5531_v2 = vpop.eup %5530 }
 0x928   : > { %v3949_v30 = vmul.f32 %v5531_v2, %v3861_v4  ;;  %vm3955_vm12 = vweird.f32 %v5531_v2 }
 0x929   : > { %3672 = vadd.xlane.f32.xlu0 %v3671_v13  ;;  %vm3956_vm14 = vmor %vm3954_vm13, %vm3955_vm12 }
 0x92a   : > { %v3950_v25 = vmul.f32 %v5531_v2, %v3949_v30 }
 0x92c   : > { %3660 = vadd.xlane.f32.xlu1 %v3659_v23  ;;  %v3951_v3 = vmul.f32 0.5, %v3950_v25  ;;  %v3702_v23 = vmul.f32 %v8014_v41, %v8515_v56 }
 0x92e   : > { %v3952_v45 = vsub.f32 1.5, %v3951_v3 }
 0x930   : > { %v3953_v17 = vmul.f32 %v5531_v2, %v3952_v45 }
 0x932   : > { %v3957_v40 = vsel %vm3956_vm14, %v5531_v2, %v3953_v17 }
 0x933   : > { %v4625_v11 = vpop.f32.mrf.mxu0 }
 0x934   : > { %3669 = vadd.xlane.f32.xlu1 %v3668_v28 }
 0x93b   : > { %v4627_v35 = vpop.f32.mrf.mxu0 }
 0x93c   : > { %3798 = vadd.xlane.f32.xlu1 %v3797_v21  ;;  %v4623_v21 = vadd.f32 %v8084_v34, %v4622_v46 }
 0x93e   : > { %v4678_v46 = vadd.f32 %v4623_v21, %v7683_v7 }
 0x944   : > { %3801 = vadd.xlane.f32.xlu1 %v3800_v20  ;;  %v8099_v20 = vsub.f32 %v7931_v24, %v3702_v23 }
 0x946   : > { %v3750_v24 = vmul.f32 %v8099_v20, %v8099_v20 }
 0x95c   : > { %v3778_v8 = vpop.xlane.xlu1 %3777 }
 0x95d   : > { %v3836_v48 = vmul.f32 %v3778_v8, %v8515_v56 }
 0x95f   : > { %v3860_v39 = vadd.f32 1e-05, %v3836_v48 }
 0x961   : > { %5532 = vrsqrt.f32 %v3860_v39  ;;  %vm3944_vm10 = vweird.f32 %v3860_v39 }
 0x967   : > { %v5533_v36 = vpop.eup %5532 }
 0x968   : > { %v3939_v47 = vmul.f32 %v5533_v36, %v3860_v39  ;;  %vm3945_vm9 = vweird.f32 %v5533_v36  ;;  %v4125_v39 = vmul.f32 %v3957_v40, %v7944_v61  ;;  %v3806_v61 = vsel %vm658_vm1, %v3750_v24, 0.0 }
 0x969   : > { %vm3946_vm11 = vmor %vm3944_vm10, %vm3945_vm9 }
 0x96a   : > { %v3940_v19 = vmul.f32 %v5533_v36, %v3939_v47 }
 0x96c   : > { %v3941_v15 = vmul.f32 0.5, %v3940_v19  ;;  %v3784_v10 = vpop.xlane.xlu0 %3783 }
 0x96d   : > { %v3838_v60 = vmul.f32 %v3784_v10, %v8515_v56  ;;  %v8113_v10 = vpop.xlane.xlu2 %3666 }
 0x96e   : > { %v3942_v42 = vsub.f32 1.5, %v3941_v15 }
 0x96f   : > { %v3862_v29 = vadd.f32 1e-05, %v3838_v60 }
 0x970   : > { %v3943_v57 = vmul.f32 %v5533_v36, %v3942_v42 }
 0x971   : > { %5534 = vrsqrt.f32 %v3862_v29  ;;  %vm3964_vm4 = vweird.f32 %v3862_v29 }
 0x972   : > { %v3947_v6 = vsel %vm3946_vm11, %v5533_v36, %v3943_v57 }
 0x973   : > { %v4124_v13 = vmul.f32 %v3947_v6, %v7967_v53 }
 0x974   : > { %v3787_v0 = vpop.xlane.xlu0 %3786  ;;  %v3535_v14 = vpop.permute.xlu1 %3534 }
 0x975   : > { %v3839_v11 = vmul.f32 %v3787_v0, %v8515_v56  ;;  %v3586_v28 = vsel %vm1373_vm15, %v7531_v44, %v3535_v14  ;;  %5044 = vmatmul.msk.f32.gmra.mxu1 %vm658_vm1, %v4124_v13 }
 0x976   : > { %v8094_v37 = vadd.f32 %v3586_v28, %v8531_v55  ;;  %v4629_v35 = vpop.f32.mrf.mxu0  ;;  %v8118_v28 = vpop.xlane.xlu2 %3678 }
 0x977   : > { %v5535_v53 = vpop.eup %5534  ;;  %v3863_v41 = vadd.f32 1e-05, %v3839_v11  ;;  %v4630_v50 = vadd.f32 %v8084_v34, %v4629_v35 }
 0x978   : > { %v3959_v49 = vmul.f32 %v5535_v53, %v3862_v29  ;;  %v3674_v44 = vsel %vm658_vm1, %v8094_v37, 0.0  ;;  %vm3965_vm3 = vweird.f32 %v5535_v53 }
 0x979   : > { %5536 = vrsqrt.f32 %v3863_v41  ;;  %v4679_v4 = vadd.f32 %v4630_v50, %v7692_v52  ;;  %3675 = vadd.xlane.f32.xlu0 %v3674_v44  ;;  %vm3966_vm5 = vmor %vm3964_vm4, %vm3965_vm3  ;;  %vm3974_vm7 = vweird.f32 %v3863_v41 }
 0x97a   : > { %v3960_v8 = vmul.f32 %v5535_v53, %v3959_v49 }
 0x97b   : > { %v4699_v48 = vrot.slane %v4679_v4, 7 }
 0x97c   : > { %v3961_v30 = vmul.f32 0.5, %v3960_v8  ;;  %v3790_v36 = vpop.xlane.xlu0 %3789 }
 0x97d   : > { %v8108_v25 = vsel %vm4700_vm0, %v4699_v48, %v4678_v46  ;;  %v3840_v2 = vmul.f32 %v3790_v36, %v8515_v56  ;;  %5045 = vmatmul.msk.f32.gmra.mxu1 %vm658_vm1, %v4125_v39 }
 0x97e   : > { %v3962_v52 = vsub.f32 1.5, %v3961_v30  ;;  %v4632_v47 = vpop.f32.mrf.mxu0 }
 0x97f   : > { %v5537_v19 = vpop.eup %5536  ;;  %v3864_v3 = vadd.f32 1e-05, %v3840_v2 }
 0x980   : > { %v3963_v7 = vmul.f32 %v5535_v53, %v3962_v52  ;;  %v3969_v15 = vmul.f32 %v5537_v19, %v3863_v41  ;;  %vm3975_vm6 = vweird.f32 %v5537_v19 }
 0x981   : > { %5538 = vrsqrt.f32 %v3864_v3  ;;  %3807 = vadd.xlane.f32.xlu0 %v3806_v61  ;;  %vm3976_vm9 = vmor %vm3974_vm7, %vm3975_vm6  ;;  %vm3984_vm11 = vweird.f32 %v3864_v3 }
 0x982   : > { %v3970_v60 = vmul.f32 %v5537_v19, %v3969_v15  ;;  %v3967_v42 = vsel %vm3966_vm5, %v5535_v53, %v3963_v7 }
 0x983   : > { %v4126_v45 = vmul.f32 %v3967_v42, %v7987_v58 }
 0x984   : > { %v3971_v57 = vmul.f32 0.5, %v3970_v60  ;;  %v3793_v6 = vpop.xlane.xlu0 %3792 }
 0x985   : > { %v3841_v13 = vmul.f32 %v3793_v6, %v8515_v56  ;;  %5046 = vmatmul.msk.f32.gmra.mxu1 %vm658_vm1, %v4126_v45 }
 0x986   : > { %v3972_v23 = vsub.f32 1.5, %v3971_v57  ;;  %v4634_v29 = vpop.f32.mrf.mxu0 }
 0x987   : > { %v5539_v17 = vpop.eup %5538  ;;  %v3865_v0 = vadd.f32 1e-05, %v3841_v13  ;;  %v3703_v13 = vmul.f32 %v8113_v10, %v8515_v56 }
 0x988   : > { %v3973_v14 = vmul.f32 %v5537_v19, %v3972_v23  ;;  %v3979_v11 = vmul.f32 %v5539_v17, %v3864_v3  ;;  %vm3985_vm10 = vweird.f32 %v5539_v17 }
 0x989   : > { %5540 = vrsqrt.f32 %v3865_v0  ;;  %vm3986_vm12 = vmor %vm3984_vm11, %vm3985_vm10  ;;  %vm3994_vm14 = vweird.f32 %v3865_v0 }
 0x98a   : > { %v3980_v55 = vmul.f32 %v5539_v17, %v3979_v11  ;;  %v3977_v58 = vsel %vm3976_vm9, %v5537_v19, %v3973_v14  ;;  %v8148_v11 = vsub.f32 %v7954_v38, %v3703_v13 }
 0x98b   : > { %v4127_v35 = vmul.f32 %v3977_v58, %v7996_v18 }
 0x98c   : > { %v3981_v53 = vmul.f32 0.5, %v3980_v55  ;;  %v3796_v21 = vpop.xlane.xlu0 %3795 }
 0x98d   : > { %v3842_v50 = vmul.f32 %v3796_v21, %v8515_v56  ;;  %5047 = vmatmul.msk.f32.gmra.mxu1 %vm658_vm1, %v4127_v35 }
 0x98e   : > { %v3982_v49 = vsub.f32 1.5, %v3981_v53  ;;  %v3751_v53 = vmul.f32 %v8148_v11, %v8148_v11 }
 0x98f   : > { %v5541_v44 = vpop.eup %5540  ;;  %v3866_v40 = vadd.f32 1e-05, %v3842_v50 }
 0x990   : > { %v3983_v41 = vmul.f32 %v5539_v17, %v3982_v49  ;;  %v3989_v4 = vmul.f32 %v5541_v44, %v3865_v0  ;;  %vm3995_vm13 = vweird.f32 %v5541_v44  ;;  %v3809_v38 = vsel %vm658_vm1, %v3751_v53, 0.0 }
 0x991   : > { %5542 = vrsqrt.f32 %v3866_v40  ;;  %v3066_v8 = vpop.xlane.xlu2 %3065  ;;  %vm3996_vm0 = vmor %vm3994_vm14, %vm3995_vm13  ;;  %vm4004_vm4 = vweird.f32 %v3866_v40 }
 0x992   : > { %v3990_v46 = vmul.f32 %v5541_v44, %v3989_v4  ;;  %5544 = vrcp.f32 %v3066_v8  ;;  %v3987_v48 = vsel %vm3986_vm12, %v5539_v17, %v3983_v41 }
 0x993   : > { %v4128_v18 = vmul.f32 %v3987_v48, %v8001_v22 }
 0x994   : > { %v3991_v39 = vmul.f32 0.5, %v3990_v46  ;;  %v2925_v30 = vpop.xlane.xlu0 %2924 }
 0x995   : > { %5048 = vmatmul.msk.f32.gmra.mxu1 %vm658_vm1, %v4128_v18  ;;  %v2949_v14 = vsub.f32 %v8032_v1, %v2925_v30 }
 0x996   : > { %v3992_v36 = vsub.f32 1.5, %v3991_v39 }
 0x997   : > { %v5543_v24 = vpop.eup %5542  ;;  %v2996_v35 = vmul.f32 1.442695, %v2949_v14 }
 0x998   : > { %v5545_v2 = vpop.eup %5544  ;;  %v3993_v52 = vmul.f32 %v5541_v44, %v3992_v36  ;;  %v3999_v47 = vmul.f32 %v5543_v24, %v3866_v40  ;;  %vm4005_vm3 = vweird.f32 %v5543_v24 }
 0x999   : > { %v3116_v19 = vmul.f32 %v5545_v2, %v8029_v9  ;;  %vm4006_vm5 = vmor %vm4004_vm4, %vm4005_vm3  ;;  %5546 = vpow2.f32 %v2996_v35 }
 0x99a   : > { %v4000_v3 = vmul.f32 %v5543_v24, %v3999_v47  ;;  %v3997_v7 = vsel %vm3996_vm0, %v5541_v44, %v3993_v52  ;;  %v3707_v44 = vmul.f32 %v8118_v28, %v8515_v56 }
 0x99b   : > { %5036 = vmatmul.msk.f32.gmra.mxu3 %vm1789_vm2, %v3116_v19  ;;  %v4129_v22 = vmul.f32 %v3997_v7, %v8010_v62 }
 0x99c   : > { %v4001_v15 = vmul.f32 0.5, %v4000_v3  ;;  %v3673_v61 = vpop.xlane.xlu0 %3672  ;;  %v8167_v4 = vsub.f32 %v7978_v59, %v3707_v44 }
 0x99d   : > { %v3705_v60 = vmul.f32 %v3673_v61, %v8515_v56  ;;  %5049 = vmatmul.msk.f32.gmra.mxu1 %vm658_vm1, %v4129_v22 }
 0x99e   : > { %v4002_v42 = vsub.f32 1.5, %v4001_v15  ;;  %v3755_v30 = vmul.f32 %v8167_v4, %v8167_v4 }
 0x99f   : > { %v8131_v45 = vsub.f32 %v8045_v12, %v3705_v60  ;;  %v3661_v57 = vpop.xlane.xlu1 %3660  ;;  %v8164_v41 = vpop.eup %5546 }
 0x9a0   : > { %v4003_v6 = vmul.f32 %v5543_v24, %v4002_v42  ;;  %v3701_v9 = vmul.f32 %v3661_v57, %v8515_v56  ;;  %v3067_v8 = vsel %vm1789_vm2, %v8164_v41, 0.0 }
 0x9a1   : > { %v3753_v62 = vmul.f32 %v8131_v45, %v8131_v45 }
 0x9a2   : > { %v8139_v23 = vsub.f32 %v8048_v16, %v3701_v9  ;;  %v4007_v29 = vsel %vm4006_vm5, %v5543_v24, %v4003_v6  ;;  %v3821_v24 = vsel %vm658_vm1, %v3755_v30, 0.0 }
 0x9a3   : > { %v3815_v17 = vsel %vm658_vm1, %v3753_v62, 0.0  ;;  %v4130_v12 = vmul.f32 %v4007_v29, %v8021_v54 }
 0x9a4   : > { %3816 = vadd.xlane.f32.xlu2 %v3815_v17  ;;  %v3749_v0 = vmul.f32 %v8139_v23, %v8139_v23 }
 0x9a5   : > { %5050 = vmatmul.msk.f32.gmra.mxu1 %vm658_vm1, %v4130_v12 }
 0x9a6   : > { %v3803_v10 = vsel %vm658_vm1, %v3749_v0, 0.0 }
 0x9a7   : > { %3804 = vadd.xlane.f32.xlu1 %v3803_v10  ;;  %v3670_v55 = vpop.xlane.xlu1 %3669 }
 0x9a8   : > { %v3704_v58 = vmul.f32 %v3670_v55, %v8515_v56 }
 0x9aa   : > { %v8153_v54 = vsub.f32 %v8058_v43, %v3704_v58 }
 0x9ac   : > { %v3752_v1 = vmul.f32 %v8153_v54, %v8153_v54 }
 0x9ae   : > { %v3812_v21 = vsel %vm658_vm1, %v3752_v1, 0.0 }
 0x9af   : > { %3810 = vadd.xlane.f32.xlu1 %v3809_v38  ;;  %3813 = vadd.xlane.f32.xlu0 %v3812_v21  ;;  %v3799_v50 = vpop.xlane.xlu1 %3798 }
 0x9b0   : > { %v3843_v49 = vmul.f32 %v3799_v50, %v8515_v56 }
 0x9b2   : > { %v3867_v40 = vadd.f32 1e-05, %v3843_v49 }
 0x9b4   : > { %5548 = vrsqrt.f32 %v3867_v40  ;;  %vm4014_vm7 = vweird.f32 %v3867_v40 }
 0x9b7   : > { %3068 = vadd.xlane.f32.xlu1 %v3067_v8  ;;  %v3802_v46 = vpop.xlane.xlu1 %3801 }
 0x9b8   : > { %v3844_v48 = vmul.f32 %v3802_v46, %v8515_v56 }
 0x9ba   : > { %v5549_v18 = vpop.eup %5548  ;;  %v3868_v39 = vadd.f32 1e-05, %v3844_v48 }
 0x9bb   : > { %v4009_v28 = vmul.f32 %v5549_v18, %v3867_v40  ;;  %vm4015_vm6 = vweird.f32 %v5549_v18 }
 0x9bc   : > { %5550 = vrsqrt.f32 %v3868_v39  ;;  %vm4016_vm9 = vmor %vm4014_vm7, %vm4015_vm6  ;;  %vm4024_vm11 = vweird.f32 %v3868_v39 }
 0x9bd   : > { %v4010_v36 = vmul.f32 %v5549_v18, %v4009_v28 }
 0x9bf   : > { %v4011_v2 = vmul.f32 0.5, %v4010_v36  ;;  %3822 = vadd.xlane.f32.xlu1 %v3821_v24 }
 0x9c1   : > { %v4012_v52 = vsub.f32 1.5, %v4011_v2 }
 0x9c2   : > { %v5551_v47 = vpop.eup %5550 }
 0x9c3   : > { %v4013_v19 = vmul.f32 %v5549_v18, %v4012_v52  ;;  %v4019_v3 = vmul.f32 %v5551_v47, %v3868_v39  ;;  %vm4025_vm10 = vweird.f32 %v5551_v47 }
 0x9c4   : > { %vm4026_vm12 = vmor %vm4024_vm11, %vm4025_vm10 }
 0x9c5   : > { %v4020_v7 = vmul.f32 %v5551_v47, %v4019_v3  ;;  %v4017_v22 = vsel %vm4016_vm9, %v5549_v18, %v4013_v19 }
 0x9c6   : > { %v4131_v15 = vmul.f32 %v4017_v22, %v8063_v5 }
 0x9c7   : > { %v4021_v61 = vmul.f32 0.5, %v4020_v7 }
 0x9c8   : > { %5051 = vmatmul.msk.f32.gmra.mxu1 %vm658_vm1, %v4131_v15 }
 0x9c9   : > { %v4022_v60 = vsub.f32 1.5, %v4021_v61 }
 0x9cb   : > { %v4023_v42 = vmul.f32 %v5551_v47, %v4022_v60 }
 0x9cd   : > { %v4027_v57 = vsel %vm4026_vm12, %v5551_v47, %v4023_v42 }
 0x9ce   : > { %v4132_v6 = vmul.f32 %v4027_v57, %v8072_v32 }
 0x9d0   : > { %5052 = vmatmul.msk.f32.gmra.mxu1 %vm658_vm1, %v4132_v6 }
 0x9ec   : > { %v3676_v9 = vpop.xlane.xlu0 %3675 }
 0x9ed   : > { %v3706_v62 = vmul.f32 %v3676_v9, %v8515_v56 }
 0x9ef   : > { %v8181_v13 = vsub.f32 %v8094_v37, %v3706_v62 }
 0x9f1   : > { %v3754_v5 = vmul.f32 %v8181_v13, %v8181_v13 }
 0x9f2   : > { %v4254_v29 = vpop.f32.mrf.mxu1 }
 0x9f3   : > { %v4255_v17 = vadd.f32 %v7878_v27, %v4254_v29  ;;  %v3818_v12 = vsel %vm658_vm1, %v3754_v5, 0.0 }
 0x9f4   : > { %3819 = vadd.xlane.f32.xlu0 %v3818_v12  ;;  %v3808_v19 = vpop.xlane.xlu0 %3807 }
 0x9f5   : > { %v4314_v0 = vmul.f32 %v4255_v17, %v4255_v17  ;;  %v3846_v15 = vmul.f32 %v3808_v19, %v8515_v56 }
 0x9f7   : > { %v4338_v14 = vmul.f32 %v4314_v0, %v4255_v17  ;;  %v8198_v5 = vadd.f32 1e-05, %v3846_v15 }
 0x9f9   : > { %v4362_v32 = vmul.f32 0.044715, %v4338_v14  ;;  %vm4044_vm4 = vweird.f32 %v8198_v5 }
 0x9fa   : > { %v4257_v10 = vpop.f32.mrf.mxu1 }
 0x9fb   : > { %v4386_v55 = vadd.f32 %v4362_v32, %v4255_v17  ;;  %v4258_v58 = vadd.f32 %v7878_v27, %v4257_v10 }
 0x9fd   : > { %v4410_v35 = vmul.f32 0.7978846, %v4386_v55  ;;  %v4315_v53 = vmul.f32 %v4258_v58, %v4258_v58 }
 0x9ff   : > { %5552 = vtanh.f32 %v4410_v35  ;;  %v4339_v37 = vmul.f32 %v4315_v53, %v4258_v58 }
 0xa01   : > { %v4363_v1 = vmul.f32 0.044715, %v4339_v37 }
 0xa02   : > { %v4260_v38 = vpop.f32.mrf.mxu1 }
 0xa03   : > { %v4387_v21 = vadd.f32 %v4363_v1, %v4258_v58  ;;  %v4261_v50 = vadd.f32 %v7878_v27, %v4260_v38 }
 0xa05   : > { %v5553_v49 = vpop.eup %5552  ;;  %v4411_v44 = vmul.f32 0.7978846, %v4387_v21  ;;  %v4316_v40 = vmul.f32 %v4261_v50, %v4261_v50 }
 0xa06   : > { %v4458_v8 = vadd.f32 1.0, %v5553_v49 }
 0xa07   : > { %5554 = vtanh.f32 %v4411_v44  ;;  %v4340_v46 = vmul.f32 %v4316_v40, %v4261_v50 }
 0xa08   : > { %v4482_v48 = vmul.f32 0.5, %v4458_v8 }
 0xa09   : > { %v4364_v18 = vmul.f32 0.044715, %v4340_v46 }
 0xa0a   : > { %v4263_v39 = vpop.f32.mrf.mxu1  ;;  %v4506_v30 = vmul.f32 %v4482_v48, %v4255_v17 }
 0xa0b   : > { %v4388_v28 = vadd.f32 %v4364_v18, %v4261_v50  ;;  %v4264_v36 = vadd.f32 %v7878_v27, %v4263_v39 }
 0xa0c   : > { %5068 = vmatmul.msk.f32.gmra.mxu0 %vm4532_vm8, %v4506_v30 }
 0xa0d   : > { %v5555_v24 = vpop.eup %5554  ;;  %v4412_v2 = vmul.f32 0.7978846, %v4388_v28  ;;  %v4317_v52 = vmul.f32 %v4264_v36, %v4264_v36 }
 0xa0e   : > { %v4459_v47 = vadd.f32 1.0, %v5555_v24 }
 0xa0f   : > { %5556 = vtanh.f32 %v4412_v2  ;;  %v4341_v3 = vmul.f32 %v4317_v52, %v4264_v36 }
 0xa10   : > { %v4483_v7 = vmul.f32 0.5, %v4459_v47 }
 0xa11   : > { %v4365_v22 = vmul.f32 0.044715, %v4341_v3 }
 0xa12   : > { %v4266_v61 = vpop.f32.mrf.mxu1  ;;  %v4507_v60 = vmul.f32 %v4483_v7, %v4258_v58 }
 0xa13   : > { %v4389_v42 = vadd.f32 %v4365_v22, %v4264_v36  ;;  %v8193_v57 = vadd.f32 %v7878_v27, %v4266_v61 }
 0xa14   : > { %5069 = vmatmul.msk.f32.gmra.mxu0 %vm4532_vm8, %v4507_v60 }
 0xa15   : > { %v5557_v6 = vpop.eup %5556  ;;  %v4413_v9 = vmul.f32 0.7978846, %v4389_v42  ;;  %v4318_v62 = vmul.f32 %v8193_v57, %v8193_v57 }
 0xa16   : > { %v4460_v29 = vadd.f32 1.0, %v5557_v6 }
 0xa17   : > { %5558 = vtanh.f32 %v4413_v9  ;;  %v4342_v17 = vmul.f32 %v4318_v62, %v8193_v57  ;;  %v3817_v7 = vpop.xlane.xlu2 %3816 }
 0xa18   : > { %v4484_v12 = vmul.f32 0.5, %v4460_v29  ;;  %5560 = vrsqrt.f32 %v8198_v5  ;;  %v3849_v6 = vmul.f32 %v3817_v7, %v8515_v56 }
 0xa19   : > { %v4366_v0 = vmul.f32 0.044715, %v4342_v17 }
 0xa1a   : > { %v4269_v14 = vpop.f32.mrf.mxu1  ;;  %v3805_v32 = vpop.xlane.xlu1 %3804  ;;  %v4508_v10 = vmul.f32 %v4484_v12, %v4261_v50 }
 0xa1b   : > { %v4390_v55 = vadd.f32 %v4366_v0, %v8193_v57  ;;  %v8204_v58 = vadd.f32 %v7878_v27, %v4269_v14  ;;  %v3845_v35 = vmul.f32 %v3805_v32, %v8515_v56 }
 0xa1c   : > { %5070 = vmatmul.msk.f32.gmra.mxu0 %vm4532_vm8, %v4508_v10 }
 0xa1d   : > { %v5559_v53 = vpop.eup %5558  ;;  %v4414_v37 = vmul.f32 0.7978846, %v4390_v55  ;;  %v4319_v1 = vmul.f32 %v8204_v58, %v8204_v58  ;;  %v3869_v38 = vadd.f32 1e-05, %v3845_v35  ;;  %v8236_v55 = vadd.f32 1e-05, %v3849_v6 }
 0xa1e   : > { %v3464_v21 = vpop.f32.mrf.mxu3  ;;  %v4461_v49 = vadd.f32 1.0, %v5559_v53  ;;  %v8212_v44 = vpop.eup %5560 }
 0xa1f   : > { %5562 = vtanh.f32 %v4414_v37  ;;  %v4343_v50 = vmul.f32 %v4319_v1, %v8204_v58  ;;  %3538 = vrot.lane.b32.xlu2 %v3464_v21, %s5685_s29  ;;  %v4039_v39 = vmul.f32 %v8212_v44, %v8198_v5  ;;  %vm4034_vm14 = vweird.f32 %v3869_v38 }
 0xa20   : > { %5564 = vrsqrt.f32 %v3869_v38  ;;  %v4485_v40 = vmul.f32 0.5, %v4461_v49  ;;  %vm4045_vm3 = vweird.f32 %v8212_v44 }
 0xa21   : > { %v4367_v8 = vmul.f32 0.044715, %v4343_v50  ;;  %v4040_v61 = vmul.f32 %v8212_v44, %v4039_v39  ;;  %vm4046_vm5 = vmor %vm4044_vm4, %vm4045_vm3 }
 0xa22   : > { %v4272_v46 = vpop.f32.mrf.mxu1  ;;  %v3814_v48 = vpop.xlane.xlu0 %3813  ;;  %v4509_v18 = vmul.f32 %v4485_v40, %v4264_v36 }
 0xa23   : > { %v4391_v30 = vadd.f32 %v4367_v8, %v8204_v58  ;;  %v8218_v28 = vadd.f32 %v7878_v27, %v4272_v46  ;;  %v3811_v24 = vpop.xlane.xlu1 %3810  ;;  %v3848_v2 = vmul.f32 %v3814_v48, %v8515_v56  ;;  %v4041_v17 = vmul.f32 0.5, %v4040_v61 }
 0xa24   : > { %v3847_v52 = vmul.f32 %v3811_v24, %v8515_v56  ;;  %5071 = vmatmul.msk.f32.gmra.mxu0 %vm4532_vm8, %v4509_v18 }
 0xa25   : > { %v5563_v47 = vpop.eup %5562  ;;  %v4415_v19 = vmul.f32 0.7978846, %v4391_v30  ;;  %v4320_v36 = vmul.f32 %v8218_v28, %v8218_v28  ;;  %v8225_v22 = vadd.f32 1e-05, %v3848_v2  ;;  %v4042_v21 = vsub.f32 1.5, %v4041_v17 }
 0xa26   : > { %v5565_v3 = vpop.eup %5564  ;;  %v8227_v15 = vadd.f32 1e-05, %v3847_v52  ;;  %v4462_v27 = vadd.f32 1.0, %v5563_v47 }
 0xa27   : > { %5566 = vtanh.f32 %v4415_v19  ;;  %v4029_v60 = vmul.f32 %v5565_v3, %v3869_v38  ;;  %v4344_v42 = vmul.f32 %v4320_v36, %v8218_v28  ;;  %vm4035_vm13 = vweird.f32 %v5565_v3 }
 0xa28   : > { %5568 = vrsqrt.f32 %v8227_v15  ;;  %v4486_v62 = vmul.f32 0.5, %v4462_v27  ;;  %vm4036_vm0 = vmor %vm4034_vm14, %vm4035_vm13  ;;  %v4043_v30 = vmul.f32 %v8212_v44, %v4042_v21  ;;  %vm4064_vm10 = vweird.f32 %v8225_v22 }
 0xa29   : > { %v4030_v9 = vmul.f32 %v5565_v3, %v4029_v60  ;;  %v4368_v29 = vmul.f32 0.044715, %v4344_v42  ;;  %5570 = vrsqrt.f32 %v8225_v22  ;;  %vm4074_vm13 = vweird.f32 %v8236_v55 }
 0xa2a   : > { %v4510_v14 = vmul.f32 %v4486_v62, %v8193_v57  ;;  %v4047_v19 = vsel %vm4046_vm5, %v8212_v44, %v4043_v30 }
 0xa2b   : > { %v4031_v12 = vmul.f32 0.5, %v4030_v9  ;;  %v3069_v0 = vpop.xlane.xlu1 %3068  ;;  %v4392_v32 = vadd.f32 %v4368_v29, %v8218_v28  ;;  %v4134_v7 = vmul.f32 %v4047_v19, %v8099_v20 }
 0xa2c   : > { %5572 = vrcp.f32 %v3069_v0  ;;  %5072 = vmatmul.msk.f32.gmra.mxu0 %vm4532_vm8, %v4510_v14 }
 0xa2d   : > { %v5567_v10 = vpop.eup %5566  ;;  %v4032_v35 = vsub.f32 1.5, %v4031_v12  ;;  %v4416_v53 = vmul.f32 0.7978846, %v4392_v32 }
 0xa2e   : > { %v4463_v37 = vadd.f32 1.0, %v5567_v10  ;;  %v5569_v1 = vpop.eup %5568 }
 0xa2f   : > { %v4033_v49 = vmul.f32 %v5565_v3, %v4032_v35  ;;  %v5571_v50 = vpop.eup %5570  ;;  %5574 = vtanh.f32 %v4416_v53  ;;  %v4049_v57 = vmul.f32 %v5569_v1, %v8227_v15  ;;  %vm4055_vm6 = vweird.f32 %v5569_v1 }
 0xa30   : > { %v4487_v40 = vmul.f32 0.5, %v4463_v37  ;;  %5576 = vrsqrt.f32 %v8236_v55  ;;  %v4059_v38 = vmul.f32 %v5571_v50, %v8225_v22  ;;  %vm4065_vm9 = vweird.f32 %v5571_v50 }
 0xa31   : > { %v4037_v8 = vsel %vm4036_vm0, %v5565_v3, %v4033_v49  ;;  %v4050_v48 = vmul.f32 %v5569_v1, %v4049_v57  ;;  %vm4066_vm11 = vmor %vm4064_vm10, %vm4065_vm9  ;;  %vm4706_vm9 = vcmask 1043459   ;;  %vm4709_vm10 = vcmask 1044484  }
 0xa32   : > { %v5573_v46 = vpop.eup %5572  ;;  %v4133_v18 = vmul.f32 %v4037_v8, %v8139_v23  ;;  %v4511_v39 = vmul.f32 %v4487_v40, %v8204_v58  ;;  %v4060_v52 = vmul.f32 %v5571_v50, %v4059_v38 }
 0xa33   : > { %v3117_v24 = vmul.f32 %v5573_v46, %v8164_v41  ;;  %v4051_v2 = vmul.f32 0.5, %v4050_v48 }
 0xa34   : > { %5053 = vmatmul.msk.f32.gmra.mxu1 %vm658_vm1, %v4133_v18  ;;  %5073 = vmatmul.msk.f32.gmra.mxu0 %vm4532_vm8, %v4511_v39  ;;  %v4061_v27 = vmul.f32 0.5, %v4060_v52 }
 0xa35   : > { %5037 = vmatmul.msk.f32.gmra.mxu3 %vm1789_vm2, %v3117_v24  ;;  %v5575_v23 = vpop.eup %5574  ;;  %v4052_v47 = vsub.f32 1.5, %v4051_v2  ;;  %vm4054_vm2 = vweird.f32 %v8227_v15 }
 0xa36   : > { %v5577_v58 = vpop.eup %5576  ;;  %v4464_v36 = vadd.f32 1.0, %v5575_v23  ;;  %vm4056_vm7 = vmor %vm4054_vm2, %vm4055_vm6  ;;  %v4062_v44 = vsub.f32 1.5, %v4061_v27 }
 0xa37   : > { %v4069_v41 = vmul.f32 %v5577_v58, %v8236_v55  ;;  %v4053_v61 = vmul.f32 %v5569_v1, %v4052_v47  ;;  %vm4075_vm12 = vweird.f32 %v5577_v58  ;;  %v3823_v55 = vpop.xlane.xlu1 %3822 }
 0xa38   : > { %v4488_v3 = vmul.f32 0.5, %v4464_v36  ;;  %v4063_v62 = vmul.f32 %v5571_v50, %v4062_v44  ;;  %vm4076_vm14 = vmor %vm4074_vm13, %vm4075_vm12  ;;  %v3851_v18 = vmul.f32 %v3823_v55, %v8515_v56 }
 0xa39   : > { %v4070_v60 = vmul.f32 %v5577_v58, %v4069_v41  ;;  %v4057_v42 = vsel %vm4056_vm7, %v5569_v1, %v4053_v61  ;;  %vm4703_vm7 = vcmask 1042434  }
 0xa3a   : > { %v4512_v5 = vmul.f32 %v4488_v3, %v8218_v28  ;;  %v4135_v6 = vmul.f32 %v4057_v42, %v8148_v11  ;;  %v8264_v28 = vld [vmem:[%s8382_s7] ss:$0 sm:$0xff]  ;;  %v4067_v17 = vsel %vm4066_vm11, %v5571_v50, %v4063_v62  ;;  %v3875_v38 = vadd.f32 1e-05, %v3851_v18 }
 0xa3b   : > { %v4071_v9 = vmul.f32 0.5, %v4070_v60  ;;  %v4136_v0 = vmul.f32 %v4067_v17, %v8153_v54  ;;  %vm4712_vm11 = vcmask 1045509  }
 0xa3c   : > { %5054 = vmatmul.msk.f32.gmra.mxu1 %vm658_vm1, %v4134_v7  ;;  %5074 = vmatmul.msk.f32.gmra.mxu0 %vm4532_vm8, %v4512_v5  ;;  %vm4094_vm6 = vweird.f32 %v3875_v38 }
 0xa3d   : > { %v4072_v29 = vsub.f32 1.5, %v4071_v9 }
 0xa3f   : > { %v4073_v14 = vmul.f32 %v5577_v58, %v4072_v29 }
 0xa41   : > { %v4077_v53 = vsel %vm4076_vm14, %v5577_v58, %v4073_v14  ;;  %vm4715_vm14 = vcmask 1046534  }
 0xa42   : > { %v4137_v49 = vmul.f32 %v4077_v53, %v8131_v45 }
 0xa44   : > { %5055 = vmatmul.msk.f32.gmra.mxu1 %vm658_vm1, %v4135_v6  ;;  %v8532_v6 = vld [vmem:[#allocation28_spill] sm:$0xff] }
 0xa45   : > { %v4275_v20 = vpop.f32.mrf.mxu1 }
 0xa46   : > { %v4276_v15 = vadd.f32 %v8264_v28, %v4275_v20 }
 0xa48   : > { %v4321_v12 = vmul.f32 %v4276_v15, %v4276_v15 }
 0xa4a   : > { %v4345_v11 = vmul.f32 %v4321_v12, %v4276_v15 }
 0xa4c   : > { %v4369_v32 = vmul.f32 0.044715, %v4345_v11  ;;  %5056 = vmatmul.msk.f32.gmra.mxu1 %vm658_vm1, %v4136_v0 }
 0xa4d   : > { %v4278_v22 = vpop.f32.mrf.mxu1 }
 0xa4e   : > { %v4393_v10 = vadd.f32 %v4369_v32, %v4276_v15  ;;  %v4279_v35 = vadd.f32 %v8264_v28, %v4278_v22 }
 0xa50   : > { %v4417_v37 = vmul.f32 0.7978846, %v4393_v10  ;;  %v4322_v1 = vmul.f32 %v4279_v35, %v4279_v35 }
 0xa52   : > { %5578 = vtanh.f32 %v4417_v37  ;;  %v4346_v21 = vmul.f32 %v4322_v1, %v4279_v35 }
 0xa54   : > { %v4370_v54 = vmul.f32 0.044715, %v4346_v21  ;;  %5057 = vmatmul.msk.f32.gmra.mxu1 %vm658_vm1, %v4137_v49 }
 0xa56   : > { %v4394_v50 = vadd.f32 %v4370_v54, %v4279_v35 }
 0xa58   : > { %v5579_v57 = vpop.eup %5578  ;;  %v4418_v40 = vmul.f32 0.7978846, %v4394_v50 }
 0xa59   : > { %v4465_v8 = vadd.f32 1.0, %v5579_v57 }
 0xa5a   : > { %5580 = vtanh.f32 %v4418_v40 }
 0xa5b   : > { %v4489_v46 = vmul.f32 0.5, %v4465_v8  ;;  %5582 = vrsqrt.f32 %v3875_v38 }
 0xa5d   : > { %v4513_v48 = vmul.f32 %v4489_v46, %v4276_v15 }
 0xa5f   : > { %5075 = vmatmul.msk.f32.gmra.mxu0 %vm4532_vm8, %v4513_v48 }
 0xa60   : > { %v5581_v39 = vpop.eup %5580 }
 0xa61   : > { %v4466_v30 = vadd.f32 1.0, %v5581_v39  ;;  %v5583_v52 = vpop.eup %5582 }
 0xa62   : > { %v4089_v47 = vmul.f32 %v5583_v52, %v3875_v38  ;;  %vm4095_vm5 = vweird.f32 %v5583_v52 }
 0xa63   : > { %v4490_v24 = vmul.f32 0.5, %v4466_v30  ;;  %vm4096_vm2 = vmor %vm4094_vm6, %vm4095_vm5 }
 0xa64   : > { %v4090_v36 = vmul.f32 %v5583_v52, %v4089_v47 }
 0xa65   : > { %v4514_v45 = vmul.f32 %v4490_v24, %v4279_v35 }
 0xa66   : > { %v4091_v7 = vmul.f32 0.5, %v4090_v36 }
 0xa67   : > { %v3820_v2 = vpop.xlane.xlu0 %3819  ;;  %5076 = vmatmul.msk.f32.gmra.mxu0 %vm4532_vm8, %v4514_v45 }
 0xa68   : > { %v3850_v23 = vmul.f32 %v3820_v2, %v8515_v56  ;;  %v4092_v44 = vsub.f32 1.5, %v4091_v7 }
 0xa6a   : > { %v3874_v58 = vadd.f32 1e-05, %v3850_v23  ;;  %v4093_v29 = vmul.f32 %v5583_v52, %v4092_v44 }
 0xa6c   : > { %5584 = vrsqrt.f32 %v3874_v58  ;;  %vm4084_vm3 = vweird.f32 %v3874_v58 }
 0xa72   : > { %v5585_v19 = vpop.eup %5584 }
 0xa73   : > { %v4079_v3 = vmul.f32 %v5585_v19, %v3874_v58  ;;  %vm4085_vm0 = vweird.f32 %v5585_v19 }
 0xa74   : > { %vm4086_vm4 = vmor %vm4084_vm3, %vm4085_vm0  ;;  %vm4718_vm0 = vcmask 1047559  }
 0xa75   : > { %v4080_v41 = vmul.f32 %v5585_v19, %v4079_v3 }
 0xa77   : > { %v4081_v27 = vmul.f32 0.5, %v4080_v41 }
 0xa79   : > { %v4082_v61 = vsub.f32 1.5, %v4081_v27  ;;  %v3539_v5 = vpop.permute.xlu2 %3538 }
 0xa7a   : > { %v3588_v60 = vsel %vm1373_vm15, %v7596_v33, %v3539_v5  ;;  %v4097_v33 = vsel %vm4096_vm2, %v5583_v52, %v4093_v29 }
 0xa7b   : > { %v4083_v42 = vmul.f32 %v5585_v19, %v4082_v61  ;;  %v8280_v9 = vadd.f32 %v3588_v60, %v8532_v6  ;;  %v4139_v17 = vmul.f32 %v4097_v33, %v8167_v4 }
 0xa7d   : > { %v3680_v62 = vsel %vm658_vm1, %v8280_v9, 0.0  ;;  %v4087_v20 = vsel %vm4086_vm4, %v5585_v19, %v4083_v42 }
 0xa7e   : > { %3681 = vadd.xlane.f32.xlu1 %v3680_v62  ;;  %v4138_v15 = vmul.f32 %v4087_v20, %v8181_v13 }
 0xa80   : > { %5058 = vmatmul.msk.f32.gmra.mxu1 %vm658_vm1, %v4138_v15 }
 0xa88   : > { %5059 = vmatmul.msk.f32.gmra.mxu1 %vm658_vm1, %v4139_v17 }
 0xa89   : > { %v4636_v12 = vpop.f32.mrf.mxu0 }
 0xa8a   : > { %v4637_v11 = vadd.f32 %v8084_v34, %v4636_v12 }
 0xa8c   : > { %v4680_v0 = vadd.f32 %v4637_v11, %v7873_v31 }
 0xa8e   : > { %v4702_v14 = vrot.slane %v4680_v0, 6 }
 0xa90   : > { %v4704_v13 = vsel %vm4703_vm7, %v4702_v14, %v8108_v25 }
 0xa91   : > { %v4639_v32 = vpop.f32.mrf.mxu0 }
 0xa99   : > { %v4641_v22 = vpop.f32.mrf.mxu0 }
 0xaa1   : > { %v4643_v10 = vpop.f32.mrf.mxu0 }
 0xaa2   : > { %v4644_v35 = vadd.f32 %v8084_v34, %v4643_v10 }
 0xaa4   : > { %v4681_v53 = vadd.f32 %v4644_v35, %v7914_v63 }
 0xaa6   : > { %v4705_v4 = vrot.slane %v4681_v53, 5 }
 0xaa8   : > { %v4707_v37 = vsel %vm4706_vm9, %v4705_v4, %v4704_v13 }
 0xaa9   : > { %v4646_v1 = vpop.f32.mrf.mxu0 }
 0xab1   : > { %v4281_v21 = vpop.f32.mrf.mxu1  ;;  %v4648_v54 = vpop.f32.mrf.mxu0 }
 0xab2   : > { %v4282_v49 = vadd.f32 %v8264_v28, %v4281_v21 }
 0xab4   : > { %v4323_v31 = vmul.f32 %v4282_v49, %v4282_v49 }
 0xab6   : > { %v4347_v50 = vmul.f32 %v4323_v31, %v4282_v49 }
 0xab8   : > { %v4371_v57 = vmul.f32 0.044715, %v4347_v50  ;;  %v3467_v40 = vpop.f32.mrf.mxu3 }
 0xab9   : > { %v4284_v25 = vpop.f32.mrf.mxu1  ;;  %3540 = vrot.lane.b32.xlu0 %v3467_v40, %s5685_s29  ;;  %v4650_v46 = vpop.f32.mrf.mxu0  ;;  %s4776_s29 = scalar_lea.hbm %s8387_s12, %s5088_s17 }
 0xaba   : > { %v4395_v8 = vadd.f32 %v4371_v57, %v4282_v49  ;;  %v4285_v55 = vadd.f32 %v8264_v28, %v4284_v25  ;;  %v4651_v63 = vadd.f32 %v8084_v34, %v4650_v46  ;;  %s4780_s19 = sshll.u32 %s4776_s29, 4  ;;  %s4781_s19 = int_to_ptr.hbm [resolvable:$true] %s4780_s19 }
 0xabb   : > { %s5628_s28 = sshra.s32 %s4781_s19, 4  ;;  %s5629_s28 = int_to_ptr.hbm [resolvable:$true] %s5628_s28 }
 0xabc   : > { %v4419_v48 = vmul.f32 0.7978846, %v4395_v8  ;;  %v4324_v18 = vmul.f32 %v4285_v55, %v4285_v55  ;;  %v4682_v39 = vadd.f32 %v4651_v63, %v7789_v51  ;;  %s5630_s15 = scalar_lea.hbm %s5629_s28, 8  ;;  %p5635_p0 = scmp.lt.s32.totalorder %s5629_s28, %s8387_s12 }
 0xabd   : > { %p5631_p11 = scmp.ne.s32.totalorder %s5629_s28, %s5630_s15  ;;  %p5636_p1 = scmp.lt.s32.totalorder %s5634_s18, %s5630_s15 }
 0xabe   : > { %5586 = vtanh.f32 %v4419_v48  ;;  %v4348_v30 = vmul.f32 %v4324_v18, %v4285_v55  ;;  %v4708_v38 = vrot.slane %v4682_v39, 4 }
 0xabf   : > { %p5632_p12 = pnand %p5631_p11, %p5789_p5  ;;  %p5637_p2 = por %p5636_p1, %p5635_p0 }
 0xac0   : > { %v4372_v24 = vmul.f32 0.044715, %v4348_v30  ;;  %v8298_v45 = vsel %vm4709_vm10, %v4708_v38, %v4707_v37 }
 0xac1   : > { %v4287_v2 = vpop.f32.mrf.mxu1  ;;  %p5633_p13 = pneg %p5632_p12 }
 0xac2   : > { %v4396_v23 = vadd.f32 %v4372_v24, %v4285_v55  ;;  %v4288_v58 = vadd.f32 %v8264_v28, %v4287_v2 }
 0xac3   : > { %p5638_p3 = pnand %p5637_p2, %p5633_p13 }
 0xac4   : > { %v5587_v52 = vpop.eup %5586  ;;  %v4420_v47 = vmul.f32 0.7978846, %v4396_v23  ;;  %v4325_v19 = vmul.f32 %v4288_v58, %v4288_v58 }
 0xac5   : > { %v4467_v36 = vadd.f32 1.0, %v5587_v52 }
 0xac6   : > { %5588 = vtanh.f32 %v4420_v47  ;;  %v4349_v34 = vmul.f32 %v4325_v19, %v4288_v58 }
 0xac7   : > { %v4491_v3 = vmul.f32 0.5, %v4467_v36 }
 0xac8   : > { %v4373_v41 = vmul.f32 0.044715, %v4349_v34 }
 0xac9   : > { %v4290_v51 = vpop.f32.mrf.mxu1  ;;  %v4515_v7 = vmul.f32 %v4491_v3, %v4282_v49 }
 0xaca   : > { %v4397_v27 = vadd.f32 %v4373_v41, %v4288_v58  ;;  %v4291_v61 = vadd.f32 %v8264_v28, %v4290_v51 }
 0xacb   : > { %5077 = vmatmul.msk.f32.gmra.mxu0 %vm4532_vm8, %v4515_v7 }
 0xacc   : > { %v5589_v5 = vpop.eup %5588  ;;  %v4421_v60 = vmul.f32 0.7978846, %v4397_v27  ;;  %v4326_v44 = vmul.f32 %v4291_v61, %v4291_v61 }
 0xacd   : > { %v4468_v42 = vadd.f32 1.0, %v5589_v5 }
 0xace   : > { %5590 = vtanh.f32 %v4421_v60  ;;  %v4350_v6 = vmul.f32 %v4326_v44, %v4291_v61 }
 0xacf   : > { %v4492_v62 = vmul.f32 0.5, %v4468_v42  ;;  %v8533_v42 = vld [vmem:[#allocation30_spill] sm:$0xff] }
 0xad0   : > { %v4374_v20 = vmul.f32 0.044715, %v4350_v6 }
 0xad1   : > { %v4293_v15 = vpop.f32.mrf.mxu1  ;;  %v4516_v29 = vmul.f32 %v4492_v62, %v4285_v55 }
 0xad2   : > { %v4398_v33 = vadd.f32 %v4374_v20, %v4291_v61  ;;  %v4294_v17 = vadd.f32 %v8264_v28, %v4293_v15  ;;  %v5613_v15 = vld [vmem:[%s8384_s9] ss:$0 sm:$0xff] }
 0xad3   : > { %5078 = vmatmul.msk.f32.gmra.mxu0 %vm4532_vm8, %v4516_v29 }
 0xad4   : > { %v5591_v12 = vpop.eup %5590  ;;  %v4422_v11 = vmul.f32 0.7978846, %v4398_v33  ;;  %v4327_v0 = vmul.f32 %v4294_v17, %v4294_v17 }
 0xad5   : > { %v4469_v14 = vadd.f32 1.0, %v5591_v12 }
 0xad6   : > { %5592 = vtanh.f32 %v4422_v11  ;;  %v4351_v13 = vmul.f32 %v4327_v0, %v4294_v17 }
 0xad7   : > { %v4493_v32 = vmul.f32 0.5, %v4469_v14 }
 0xad8   : > { %v4375_v22 = vmul.f32 0.044715, %v4351_v13 }
 0xad9   : > { %v4517_v10 = vmul.f32 %v4493_v32, %v4288_v58 }
 0xada   : > { %v4399_v35 = vadd.f32 %v4375_v22, %v4294_v17 }
 0xadb   : > { %5079 = vmatmul.msk.f32.gmra.mxu0 %vm4532_vm8, %v4517_v10 }
 0xadc   : > { %v5593_v53 = vpop.eup %5592  ;;  %v4423_v4 = vmul.f32 0.7978846, %v4399_v35  ;;  %v4653_v37 = vpop.f32.mrf.mxu0 }
 0xadd   : > { %v4470_v1 = vadd.f32 1.0, %v5593_v53 }
 0xade   : > { %5594 = vtanh.f32 %v4423_v4 }
 0xadf   : > { %v4494_v21 = vmul.f32 0.5, %v4470_v1 }
 0xae1   : > { %v4518_v49 = vmul.f32 %v4494_v21, %v4291_v61  ;;  %v4686_v21 = vld [vmem:[%s8385_s10] sm:$0xff] }
 0xae2   : > { %4737 = vmatpush.msrb.mxu2 %v4686_v21 }
 0xae3   : > { %5080 = vmatmul.msk.f32.gmra.mxu0 %vm4532_vm8, %v4518_v49 }
 0xae4   : > { %v5595_v54 = vpop.eup %5594  ;;  %v4655_v31 = vpop.f32.mrf.mxu0 }
 0xae5   : > { %v4471_v50 = vadd.f32 1.0, %v5595_v54 }
 0xae7   : > { %v4495_v57 = vmul.f32 0.5, %v4471_v50 }
 0xae9   : > { %v4519_v40 = vmul.f32 %v4495_v57, %v4294_v17 }
 0xaeb   : > { %5081 = vmatmul.msk.f32.gmra.mxu0 %vm4532_vm8, %v4519_v40 }
 0xaf1   : > { %v3682_v25 = vpop.xlane.xlu1 %3681 }
 0xaf2   : > { %v3708_v8 = vmul.f32 %v3682_v25, %v8515_v56 }
 0xaf4   : > { %v3732_v55 = vsub.f32 %v8280_v9, %v3708_v8 }
 0xaf6   : > { %v3756_v46 = vmul.f32 %v3732_v55, %v3732_v55 }
 0xaf8   : > { %v3824_v63 = vsel %vm658_vm1, %v3756_v46, 0.0 }
 0xaf9   : > { %3825 = vadd.xlane.f32.xlu0 %v3824_v63 }
 0xafd   : > { %v4296_v48 = vpop.f32.mrf.mxu1 }
 0xafe   : > { %v4297_v18 = vadd.f32 %v8264_v28, %v4296_v48 }
 0xb00   : > { %v4328_v39 = vmul.f32 %v4297_v18, %v4297_v18 }
 0xb02   : > { %v4352_v30 = vmul.f32 %v4328_v39, %v4297_v18 }
 0xb04   : > { %v4376_v38 = vmul.f32 0.044715, %v4352_v30 }
 0xb05   : > { %v4299_v24 = vpop.f32.mrf.mxu1 }
 0xb06   : > { %v4400_v2 = vadd.f32 %v4376_v38, %v4297_v18  ;;  %v4300_v23 = vadd.f32 %v8264_v28, %v4299_v24 }
 0xb08   : > { %v4424_v58 = vmul.f32 0.7978846, %v4400_v2  ;;  %v4329_v52 = vmul.f32 %v4300_v23, %v4300_v23 }
 0xb0a   : > { %5596 = vtanh.f32 %v4424_v58  ;;  %v4353_v47 = vmul.f32 %v4329_v52, %v4300_v23 }
 0xb0c   : > { %v4377_v19 = vmul.f32 0.044715, %v4353_v47 }
 0xb0e   : > { %v4401_v9 = vadd.f32 %v4377_v19, %v4300_v23 }
 0xb10   : > { %v5597_v36 = vpop.eup %5596  ;;  %v4425_v34 = vmul.f32 0.7978846, %v4401_v9 }
 0xb11   : > { %v4472_v3 = vadd.f32 1.0, %v5597_v36 }
 0xb12   : > { %5598 = vtanh.f32 %v4425_v34 }
 0xb13   : > { %v4496_v41 = vmul.f32 0.5, %v4472_v3 }
 0xb15   : > { %v4520_v51 = vmul.f32 %v4496_v41, %v4297_v18  ;;  %v5269_v41 = vld [vmem:[%s8386_s11] ss:$0 sm:$0xff] }
 0xb17   : > { %5082 = vmatmul.msk.f32.gmra.mxu0 %vm4532_vm8, %v4520_v51 }
 0xb18   : > { %v5599_v7 = vpop.eup %5598 }
 0xb19   : > { %v4473_v27 = vadd.f32 1.0, %v5599_v7 }
 0xb1b   : > { %v4497_v61 = vmul.f32 0.5, %v4473_v27 }
 0xb1d   : > { %v4521_v5 = vmul.f32 %v4497_v61, %v4300_v23 }
 0xb1f   : > { %5083 = vmatmul.msk.f32.gmra.mxu0 %vm4532_vm8, %v4521_v5 }
 0xb2b   : > { %v3541_v60 = vpop.permute.xlu0 %3540 }
 0xb2c   : > { %v3589_v44 = vsel %vm1373_vm15, %v7598_v26, %v3541_v60 }
 0xb2d   : > { %v3613_v6 = vadd.f32 %v3589_v44, %v8533_v42 }
 0xb2f   : > { %v3683_v62 = vsel %vm658_vm1, %v3613_v6, 0.0 }
 0xb30   : > { %3684 = vadd.xlane.f32.xlu1 %v3683_v62 }
 0xb48   : > { %v4657_v20 = vpop.f32.mrf.mxu0 }
 0xb49   : > { %v4658_v29 = vadd.f32 %v5613_v15, %v4657_v20 }
 0xb4b   : > { %v4683_v33 = vadd.f32 %v4658_v29, %v8048_v16 }
 0xb4d   : > { %v4711_v17 = vrot.slane %v4683_v33, 3 }
 0xb4f   : > { %v4713_v12 = vsel %vm4712_vm11, %v4711_v17, %v8298_v45 }
 0xb50   : > { %v4660_v11 = vpop.f32.mrf.mxu0 }
 0xb58   : > { %v4662_v0 = vpop.f32.mrf.mxu0 }
 0xb60   : > { %v4664_v26 = vpop.f32.mrf.mxu0 }
 0xb61   : > { %v4665_v54 = vadd.f32 %v5613_v15, %v4664_v26 }
 0xb63   : > { %v4684_v31 = vadd.f32 %v4665_v54, %v8058_v43 }
 0xb65   : > { %v4714_v40 = vrot.slane %v4684_v31, 2 }
 0xb68   : > { %v4667_v14 = vpop.f32.mrf.mxu0 }
 0xb6c   : > { %v3826_v13 = vpop.xlane.xlu0 %3825 }
 0xb6d   : > { %v3852_v32 = vmul.f32 %v3826_v13, %v8515_v56 }
 0xb6f   : > { %v3876_v22 = vadd.f32 1e-05, %v3852_v32 }
 0xb71   : > { %5600 = vrsqrt.f32 %v3876_v22  ;;  %vm4104_vm12 = vweird.f32 %v3876_v22 }
 0xb77   : > { %v5601_v10 = vpop.eup %5600 }
 0xb78   : > { %v4099_v35 = vmul.f32 %v5601_v10, %v3876_v22  ;;  %vm4105_vm15 = vweird.f32 %v5601_v10 }
 0xb79   : > { %vm4106_vm13 = vmor %vm4104_vm12, %vm4105_vm15 }
 0xb7a   : > { %v4100_v53 = vmul.f32 %v5601_v10, %v4099_v35 }
 0xb7c   : > { %v4101_v4 = vmul.f32 0.5, %v4100_v53 }
 0xb7e   : > { %v4102_v37 = vsub.f32 1.5, %v4101_v4 }
 0xb80   : > { %v4103_v16 = vmul.f32 %v5601_v10, %v4102_v37 }
 0xb82   : > { %v4107_v1 = vsel %vm4106_vm13, %v5601_v10, %v4103_v16 }
 0xb83   : > { %v4140_v45 = vmul.f32 %v4107_v1, %v3732_v55  ;;  %v4716_v55 = vsel %vm4715_vm14, %v4714_v40, %v4713_v12 }
 0xb85   : > { %5060 = vmatmul.msk.f32.gmra.mxu1 %vm658_vm1, %v4140_v45 }
 0xb94   : > { %v4669_v49 = vpop.f32.mrf.mxu0 }
 0xb9c   : > { %v4671_v50 = vpop.f32.mrf.mxu0 }
 0xb9d   : > { %v4672_v57 = vadd.f32 %v5613_v15, %v4671_v50 }
 0xb9f   : > { %v4685_v25 = vadd.f32 %v4672_v57, %v7978_v59 }
 0xba1   : > { %v4717_v8 = vrot.slane %v4685_v25, 1 }
 0xba3   : > { %v4719_v46 = vsel %vm4718_vm0, %v4717_v8, %v4716_v55  ;;  %v3685_v63 = vpop.xlane.xlu1 %3684 }
 0xba4   : > { %v3709_v48 = vmul.f32 %v3685_v63, %v8515_v56  ;;  %5086 = vmatmul.msk.f32.vlgmr.msrb.gmra.mxu2 %vm658_vm1, %v4719_v46 }
 0xba6   : > { %v3733_v18 = vsub.f32 %v3613_v6, %v3709_v48 }
 0xba8   : > { %v3757_v39 = vmul.f32 %v3733_v18, %v3733_v18 }
 0xbaa   : > { %v3827_v30 = vsel %vm658_vm1, %v3757_v39, 0.0 }
 0xbab   : > { %3828 = vadd.xlane.f32.xlu1 %v3827_v30 }
 0xc02   : > { %v4302_v43 = vpop.f32.mrf.mxu1 }
 0xc03   : > { %v4303_v38 = vadd.f32 %v8264_v28, %v4302_v43 }
 0xc05   : > { %v4330_v24 = vmul.f32 %v4303_v38, %v4303_v38 }
 0xc07   : > { %v4354_v2 = vmul.f32 %v4330_v24, %v4303_v38 }
 0xc09   : > { %v4378_v59 = vmul.f32 0.044715, %v4354_v2 }
 0xc0b   : > { %v4402_v23 = vadd.f32 %v4378_v59, %v4303_v38 }
 0xc0d   : > { %v4426_v58 = vmul.f32 0.7978846, %v4402_v23 }
 0xc0f   : > { %5602 = vtanh.f32 %v4426_v58 }
 0xc15   : > { %v5603_v52 = vpop.eup %5602 }
 0xc16   : > { %v4474_v47 = vadd.f32 1.0, %v5603_v52 }
 0xc18   : > { %v4498_v19 = vmul.f32 0.5, %v4474_v47 }
 0xc1a   : > { %v4522_v9 = vmul.f32 %v4498_v19, %v4303_v38 }
 0xc1c   : > { %5084 = vmatmul.msk.f32.gmra.mxu0 %vm4532_vm8, %v4522_v9 }
 0xc1e   : > { %v3829_v36 = vpop.xlane.xlu1 %3828 }
 0xc1f   : > { %v3853_v34 = vmul.f32 %v3829_v36, %v8515_v56 }
 0xc21   : > { %v3877_v3 = vadd.f32 1e-05, %v3853_v34 }
 0xc23   : > { %5604 = vrsqrt.f32 %v3877_v3  ;;  %vm4114_vm4 = vweird.f32 %v3877_v3 }
 0xc27   : > { %v4739_v51 = vpop.f32.mrf.mxu2 }
 0xc28   : > { %v4740_v7 = vadd.f32 %v5269_v41, %v4739_v51 }
 0xc29   : > { %v5605_v27 = vpop.eup %5604 }
 0xc2a   : > { %v4109_v61 = vmul.f32 %v5605_v27, %v3877_v3  ;;  %4742 = vmax.xlane.f32.xlu2 %v4740_v7  ;;  %vm4115_vm3 = vweird.f32 %v5605_v27 }
 0xc2b   : > { %vm4116_vm5 = vmor %vm4114_vm4, %vm4115_vm3 }
 0xc2c   : > { %v4110_v5 = vmul.f32 %v5605_v27, %v4109_v61 }
 0xc2e   : > { %v4111_v60 = vmul.f32 0.5, %v4110_v5 }
 0xc30   : > { %v4112_v44 = vsub.f32 1.5, %v4111_v60 }
 0xc32   : > { %v4113_v42 = vmul.f32 %v5605_v27, %v4112_v44 }
 0xc34   : > { %v4117_v6 = vsel %vm4116_vm5, %v5605_v27, %v4113_v42 }
 0xc35   : > { %v4141_v56 = vmul.f32 %v4117_v6, %v3733_v18 }
 0xc37   : > { %5061 = vmatmul.msk.f32.gmra.mxu1 %vm658_vm1, %v4141_v56 }
 0xc99   : > { %v4674_v62 = vpop.f32.mrf.mxu0 }
 0xc9d   : > { %v4743_v20 = vpop.xlane.xlu2 %4742 }
 0xc9e   : > { %v4744_v15 = vsub.f32 %v4740_v7, %v4743_v20 }
 0xca0   : > { %v4745_v29 = vmul.f32 1.442695, %v4744_v15 }
 0xca2   : > { %5606 = vpow2.f32 %v4745_v29 }
 0xca8   : > { %v5607_v33 = vpop.eup %5606 }
 0xca9   : > { %4747 = vadd.xlane.f32.xlu1 %v5607_v33 }
 0xcb4   : > { %v4305_v17 = vpop.f32.mrf.mxu1 }
 0xcb5   : > { %v4306_v12 = vadd.f32 %v8264_v28, %v4305_v17 }
 0xcb7   : > { %v4331_v11 = vmul.f32 %v4306_v12, %v4306_v12 }
 0xcb9   : > { %v4355_v0 = vmul.f32 %v4331_v11, %v4306_v12 }
 0xcbb   : > { %v4379_v26 = vmul.f32 0.044715, %v4355_v0 }
 0xcbd   : > { %v4403_v14 = vadd.f32 %v4379_v26, %v4306_v12 }
 0xcbf   : > { %v4427_v13 = vmul.f32 0.7978846, %v4403_v14 }
 0xcc1   : > { %5608 = vtanh.f32 %v4427_v13 }
 0xcc7   : > { %v5609_v32 = vpop.eup %5608 }
 0xcc8   : > { %v4475_v22 = vadd.f32 1.0, %v5609_v32 }
 0xcca   : > { %v4499_v10 = vmul.f32 0.5, %v4475_v22 }
 0xccc   : > { %v4523_v35 = vmul.f32 %v4499_v10, %v4306_v12 }
 0xcce   : > { %5085 = vmatmul.msk.f32.gmra.mxu0 %vm4532_vm8, %v4523_v35 }
 0xd1c   : > { %v4748_v53 = vpop.xlane.xlu1 %4747 }
 0xd1d   : > { %5610 = vrcp.f32 %v4748_v53  ;;  %v4760_v16 = vand.u32 2147483648, %v4748_v53  ;;  %v4758_v45 = vand.u32 2147483647, %v4748_v53  ;;  %vm4754_vm6 = vweird.f32 %v4748_v53 }
 0xd1f   : > { %v4761_v49 = vor.u32 1.1754944e-38, %v4760_v16  ;;  %vm4759_vm8 = vcmp.eq.f32.partialorder %v4758_v45, 8.507059e+37 }
 0xd23   : > { %v5611_v4 = vpop.eup %5610 }
 0xd24   : > { %v4750_v37 = vmul.f32 %v5611_v4, %v4748_v53  ;;  %vm4755_vm1 = vweird.f32 %v5611_v4 }
 0xd25   : > { %vm4756_vm2 = vmor %vm4754_vm6, %vm4755_vm1 }
 0xd26   : > { %v4751_v28 = vsub.f32 1.0, %v4750_v37 }
 0xd28   : > { %v4752_v1 = vmul.f32 %v5611_v4, %v4751_v28 }
 0xd2a   : > { %v4753_v21 = vadd.f32 %v5611_v4, %v4752_v1 }
 0xd2c   : > { %v4757_v54 = vsel %vm4756_vm2, %v5611_v4, %v4753_v21 }
 0xd2d   : > { %v4762_v31 = vsel %vm4759_vm8, %v4761_v49, %v4757_v54 }
 0xd2e   : > { %v4763_v50 = vmul.f32 %v5607_v33, %v4762_v31 }
 0xd30   : > { %4764 = vst [vmem:[%s407_s23] sm:$0xff] %v4763_v50 }
 0xd31   : > { %5641 = shalt.err (!%p5638_p3)
}
 0xd32   : > { %5098 = dma.vmem_to_hbm [thread:$0]  (%p5789_p5), %s4779_s30, 128, %s4781_s19, %s4766_s25  }
 0xd4b   : > { %v4676_v57 = vpop.f32.mrf.mxu0 }
 0xd4c PF: > { %p5104_p4 = scmp.ge.s32.totalorder %s5676_s24, 2  ;;  %s4792_s16 = sand.u32 1, %s5664_s21  }
 0xd4d   : > { %s4793_s23 = scalar_lea.sflag [#allocation3], %s4792_s16 }
 0xd4e   : > { %p5101_p7 = pnand %p5104_p4, %p5793_p6 }
 0xd50   : > { %p5102_p8 = pneg %p5101_p7 }
 0xd52   : > { %5659 = dma.done.wait (%p5102_p8), %s4793_s23, 128  }
 0xd53   : > { %5661 = vsyncadd (%p5102_p8), %s4793_s23, 4294967168  ;;  %s8534_s28 = sld [smem:[#allocation5_spill]]  ;;  %p22_p9 = scmp.ge.s32.totalorder %s5776_s27, 4  }
 0xd54   : > { %s8535_s23 = sld [smem:[#allocation6_spill]]  ;;  %s8536_s21 = smov %s5668_s22 }
 0xd55   : > { %s8538_s24 = smov %s5776_s27  ;;  %24 = sbr.rel (!%p22_p9) target bundleno = 3 (0x3), region = 103 }
 0xd59   : > { %s8537_s22 = smov %s8534_s28 }
 0xd5a   :  { %4799 = vsyncpa [#allocation3], 1 }
 0xd5b   :  { %4801 = vsyncpa [#allocation3 + $0x1], 1 }

</bundles_post_ra>
